<compile_context>
chip_gen: v7x
topology: tpu7x:2x2x1
jax: 0.10.0
libtpu: 0.0.40
codegen_flags: <defaults>
</compile_context>

<pallas_src>
import math
import functools

import jax
import jax.numpy as jnp
from jax.experimental import pallas as pl
from jax.experimental.pallas import tpu as pltpu

PAD = 0           # onmt.Constants.PAD
NEG_INF = -1e9


# ----------------------------------------------------------------------------- kernel

def decoder_stack_kernel(
    x0_ref, ctx_ref, tgt_ref, src_ref,
    ln1g_ref, ln1b_ref, wq1_ref, wk1_ref, wv1_ref, wo1_ref,
    ln2g_ref, ln2b_ref, wq2_ref, wk2_ref, wv2_ref, wo2_ref,
    ln3g_ref, ln3b_ref, w1_ref, b1_ref, w2_ref, b2_ref,
    lnfg_ref, lnfb_ref,
    hid_ref, cov_ref,
    x_scr,
    *, n_heads,
):
    """Grid = (batch_tiles, n_layers). One grid step = one full decoder layer for
    one batch tile. Activations live in `x_scr` (VMEM) across the layer axis."""
    layer = pl.program_id(1)
    n_layers = pl.num_programs(1)

    Bt, T, D = x_scr.shape
    S = ctx_ref.shape[1]
    H = n_heads
    dh = D // H
    scale = 1.0 / math.sqrt(dh)
    bf16 = jnp.bfloat16

    # Seed the resident activations with the embedded input at layer 0.
    @pl.when(layer == 0)
    def _seed():
        x_scr[...] = x0_ref[...]

    x = x_scr[...]                                   # (Bt, T, D) f32
    ctx = ctx_ref[...]                               # (Bt, S, D) f32

    # ---- additive attention biases built in-kernel (no (B,T,T) mask DMA) ----
    q_pos = jax.lax.broadcasted_iota(jnp.int32, (T, T), 0)
    k_pos = jax.lax.broadcasted_iota(jnp.int32, (T, T), 1)
    causal = k_pos > q_pos                                           # (T, T)
    tgt_pad = tgt_ref[...] == PAD                                    # (Bt, T)
    src_pad = src_ref[...] == PAD                                    # (Bt, S)
    tgt_bias = jnp.where(tgt_pad[:, None, :] | causal[None, :, :],
                         NEG_INF, 0.0).astype(jnp.float32)           # (Bt, T, T)
    src_bias = jnp.where(src_pad[:, None, :],
                         NEG_INF, 0.0).astype(jnp.float32)           # (Bt, 1, S)

    def layer_norm(v, g, b, eps=1e-5):
        mu = jnp.mean(v, axis=-1, keepdims=True)
        var = jnp.mean((v - mu) ** 2, axis=-1, keepdims=True)
        return (v - mu) * jax.lax.rsqrt(var + eps) * g + b

    def split_heads(p2d, n_rows):
        # (Bt*n_rows, D) f32 -> (Bt*H, n_rows, dh) bf16. Only static lane slices,
        # leading-dim reshapes and a non-minor concat (no minor-dim reshapes).
        heads = [p2d[:, h * dh:(h + 1) * dh].reshape(Bt, n_rows, dh)
                 for h in range(H)]
        stacked = jnp.stack(heads, axis=1)           # (Bt, H, n_rows, dh)
        return stacked.reshape(Bt * H, n_rows, dh).astype(bf16)

    def merge_heads(oz, n_rows):
        # (Bt*H, n_rows, dh) f32 -> (Bt*n_rows, D): concat heads back along lanes.
        o4 = oz.reshape(Bt, H, n_rows, dh)
        return jnp.concatenate(
            [o4[:, h].reshape(Bt * n_rows, dh) for h in range(H)], axis=-1)

    def mha(q_in, kv_in, bias, wq_r, wk_r, wv_r, wo_r):
        # q_in: (Bt, Tq, D), kv_in: (Bt, Tk, D).  Fused all-head projections on
        # flattened rows, batched score / context contractions over (Bt*H).
        Tq, Tk = q_in.shape[1], kv_in.shape[1]
        q2d = q_in.astype(bf16).reshape(Bt * Tq, D)
        kv2d = kv_in.astype(bf16).reshape(Bt * Tk, D)
        q = jnp.dot(q2d, wq_r[0], preferred_element_type=jnp.float32)
        k = jnp.dot(kv2d, wk_r[0], preferred_element_type=jnp.float32)
        v = jnp.dot(kv2d, wv_r[0], preferred_element_type=jnp.float32)
        qz = split_heads(q, Tq)                      # (Bt*H, Tq, dh) bf16
        kz = split_heads(k, Tk)
        vz = split_heads(v, Tk)
        s = jnp.einsum('zqd,zkd->zqk', qz, kz,
                       preferred_element_type=jnp.float32) * scale   # (Bt*H,Tq,Tk)
        s = s.reshape(Bt, H, Tq, Tk) + bias[:, None, :, :]
        m = jnp.max(s, axis=-1, keepdims=True)
        p = jnp.exp(s - m)
        attn = p * pl.reciprocal(jnp.sum(p, axis=-1, keepdims=True), approx=True)
        o = jnp.einsum('zqk,zkd->zqd',
                       attn.astype(bf16).reshape(Bt * H, Tq, Tk), vz,
                       preferred_element_type=jnp.float32)           # (Bt*H,Tq,dh)
        o2d = merge_heads(o, Tq)                     # (Bt*Tq, D) f32
        out = jnp.dot(o2d.astype(bf16), wo_r[0],
                      preferred_element_type=jnp.float32).reshape(Bt, Tq, D)
        return out, attn                             # attn: (Bt, H, Tq, Tk) f32

    # --- self attention block (pre-LN, residual) ---
    q_ln = layer_norm(x, ln1g_ref[0], ln1b_ref[0])
    a, _ = mha(q_ln, q_ln, tgt_bias, wq1_ref, wk1_ref, wv1_ref, wo1_ref)
    x = x + a

    # --- encoder-decoder (cross) attention block ---
    q_ln = layer_norm(x, ln2g_ref[0], ln2b_ref[0])
    a, attn_x = mha(q_ln, ctx, src_bias, wq2_ref, wk2_ref, wv2_ref, wo2_ref)
    x = x + a

    # --- position-wise feed forward block ---
    q_ln = layer_norm(x, ln3g_ref[0], ln3b_ref[0])
    h = jnp.dot(q_ln.astype(bf16).reshape(Bt * T, D), w1_ref[0],
                preferred_element_type=jnp.float32) + b1_ref[0]
    h = jnp.maximum(h, 0.0)
    f = jnp.dot(h.astype(bf16), w2_ref[0],
                preferred_element_type=jnp.float32) + b2_ref[0]
    x = x + f.reshape(Bt, T, D)

    x_scr[...] = x

    # Final LayerNorm + outputs only on the last layer (coverage = last layer's
    # cross-attn weights averaged over heads; earlier layers skip it entirely).
    @pl.when(layer == n_layers - 1)
    def _finish():
        y = layer_norm(x, lnfg_ref[...], lnfb_ref[...])
        hid_ref[...] = y.astype(hid_ref.dtype)
        cov_ref[...] = (jnp.sum(attn_x, axis=1) * (1.0 / H)).astype(cov_ref.dtype)


# ----------------------------------------------------------------------------- wrapper

_LAYER_PARAM_NAMES = [
    "ln1_g", "ln1_b", "wq1", "wk1", "wv1", "wo1",
    "ln2_g", "ln2_b", "wq2", "wk2", "wv2", "wo2",
    "ln3_g", "ln3_b", "w1", "b1", "w2", "b2",
]


def run_decoder_stack(x0, ctx, tgt_ids, src_ids, params, *, n_heads, block_b=None):
    B, T, D = x0.shape
    S = ctx.shape[1]
    L = params["wq1"].shape[0]
    if block_b is None:
        block_b = B            # whole batch per grid step; tile B for huge batches
    assert B % block_b == 0

    layer_params = [params[n] for n in _LAYER_PARAM_NAMES]   # each (L, a, b)
    layer_specs = [pl.BlockSpec((1,) + p.shape[1:], lambda b, l: (l, 0, 0))
                   for p in layer_params]

    kernel = functools.partial(decoder_stack_kernel, n_heads=n_heads)
    hid, cov = pl.pallas_call(
        kernel,
        out_shape=(jax.ShapeDtypeStruct((B, T, D), jnp.float32),
                   jax.ShapeDtypeStruct((B, T, S), jnp.float32)),
        grid=(B // block_b, L),                       # (batch tiles, layers)
        in_specs=[
            pl.BlockSpec((block_b, T, D), lambda b, l: (b, 0, 0)),   # embedded x
            pl.BlockSpec((block_b, S, D), lambda b, l: (b, 0, 0)),   # context
            pl.BlockSpec((block_b, T), lambda b, l: (b, 0)),         # tgt ids
            pl.BlockSpec((block_b, S), lambda b, l: (b, 0)),         # src ids
        ] + layer_specs + [
            pl.BlockSpec((1, D), lambda b, l: (0, 0)),               # final LN g
            pl.BlockSpec((1, D), lambda b, l: (0, 0)),               # final LN b
        ],
        out_specs=(pl.BlockSpec((block_b, T, D), lambda b, l: (b, 0, 0)),
                   pl.BlockSpec((block_b, T, S), lambda b, l: (b, 0, 0))),
        scratch_shapes=[pltpu.VMEM((block_b, T, D), jnp.float32)],   # resident acts
        compiler_params=pltpu.CompilerParams(
            dimension_semantics=("parallel", "arbitrary"),
            vmem_limit_bytes=48 * 1024 * 1024),
    )(x0, ctx, tgt_ids, src_ids, *layer_params,
      params["ln_f_g"], params["ln_f_b"])
    return hid, cov


# ----------------------------------------------------------------------------- glue (plain JAX)

def positional_encoding(length, d_model):
    pos = jnp.arange(length, dtype=jnp.float32)[:, None]
    div = jnp.exp(jnp.arange(0, d_model, 2, dtype=jnp.float32)
                  * (-math.log(10000.0) / d_model))
    pe = jnp.zeros((length, d_model), jnp.float32)
    pe = pe.at[:, 0::2].set(jnp.sin(pos * div))
    pe = pe.at[:, 1::2].set(jnp.cos(pos * div))
    return pe


def transformer_decoder_forward(tgt_ids, context_sbd, src_ids, params, *, n_heads):
    B, T = tgt_ids.shape
    D = params["word_lut"].shape[1]

    # TODO(synk): embedding gather + positional encoding stay in JAX glue
    # (data-dependent vocab gather has no clean rectangular BlockSpec here).
    emb = params["word_lut"][tgt_ids] * math.sqrt(D)            # (B, T, D)
    emb = emb + positional_encoding(T, D)[None]
    # preprocess_layer (sequence='d'): emb_dropout -> identity in eval.

    ctx = jnp.transpose(context_sbd, (1, 0, 2)).astype(jnp.float32)   # (B, S, D)

    hid_btd, coverage = run_decoder_stack(
        emb.astype(jnp.float32), ctx,
        tgt_ids.astype(jnp.int32), src_ids.astype(jnp.int32),
        params, n_heads=n_heads)

    # TODO(synk): hidden (D=32) / coverage (S=12) outputs are sub-128-lane at these
    # toy shapes; production D/S should be padded to 128 multiples for lane-dense
    # (unmasked) stores.
    hidden = jnp.transpose(hid_btd, (1, 0, 2))                  # (T, B, D) time-first
    return {"hidden": hidden, "coverage": coverage}


# ----------------------------------------------------------------------------- params

def init_params(key, vocab, d_model, inner, n_layers, w_dtype=jnp.bfloat16):
    """Layer weights are stacked along a leading layer axis and stored in bf16
    (MXU-native, halves weight DMA); LN / bias params stay f32."""
    def nrm(k, shape, scale=0.02):
        return (scale * jax.random.normal(k, shape)).astype(jnp.float32)

    ks = jax.random.split(key, 11)
    word_lut = nrm(ks[0], (vocab, d_model), 1.0 / math.sqrt(d_model))
    word_lut = word_lut.at[PAD].set(0.0)                        # padding_idx row zero

    def w(k, shape):
        return nrm(k, shape).astype(w_dtype)

    ones = lambda s: jnp.ones(s, jnp.float32)
    zeros = lambda s: jnp.zeros(s, jnp.float32)
    L, D, I = n_layers, d_model, inner

    return dict(
        word_lut=word_lut,
        ln1_g=ones((L, 1, D)), ln1_b=zeros((L, 1, D)),
        wq1=w(ks[1], (L, D, D)), wk1=w(ks[2], (L, D, D)),
        wv1=w(ks[3], (L, D, D)), wo1=w(ks[4], (L, D, D)),
        ln2_g=ones((L, 1, D)), ln2_b=zeros((L, 1, D)),
        wq2=w(ks[5], (L, D, D)), wk2=w(ks[6], (L, D, D)),
        wv2=w(ks[7], (L, D, D)), wo2=w(ks[8], (L, D, D)),
        ln3_g=ones((L, 1, D)), ln3_b=zeros((L, 1, D)),
        w1=w(ks[9], (L, D, I)), b1=zeros((L, 1, I)),
        w2=w(ks[10], (L, I, D)), b2=zeros((L, 1, D)),
        ln_f_g=ones((1, D)), ln_f_b=zeros((1, D)),
    )


# ----------------------------------------------------------------------------- main

if __name__ == "__main__":
    B, T, S = 2, 8, 12
    D, H, INNER, L, VOCAB = 32, 4, 64, 2, 50

    key = jax.random.PRNGKey(0)
    k_par, k_tgt, k_src, k_ctx = jax.random.split(key, 4)

    params = init_params(k_par, VOCAB, D, INNER, L)

    tgt_ids = jax.random.randint(k_tgt, (B, T), 1, VOCAB, dtype=jnp.int32)
    tgt_ids = tgt_ids.at[1, -2:].set(PAD)                       # some target padding
    src_ids = jax.random.randint(k_src, (B, S), 1, VOCAB, dtype=jnp.int32)
    src_ids = src_ids.at[0, -3:].set(PAD)                       # some source padding
    context = (0.5 * jax.random.normal(k_ctx, (S, B, D))).astype(jnp.float32)

    out = transformer_decoder_forward(tgt_ids, context, src_ids, params, n_heads=H)
    jax.block_until_ready(out["hidden"])
    jax.block_until_ready(out["coverage"])

    assert out["hidden"].shape == (T, B, D)
    assert out["coverage"].shape == (B, T, S)
    assert bool(jnp.all(jnp.isfinite(out["hidden"])))
    assert bool(jnp.all(jnp.isfinite(out["coverage"])))
    # coverage rows are softmax weights -> should sum to ~1 over src positions
    assert bool(jnp.all(jnp.abs(jnp.sum(out["coverage"], axis=-1) - 1.0) < 1e-2))
    print("KERNEL_OK")
</pallas_src>

<mosaic_0001>
module attributes {stable_mosaic.version = 11 : i64} {
  func.func @decoder_stack_kernel(%arg0: i32, %arg1: i32, %arg2: memref<2x8x32xf32, #tpu.memory_space<vmem>>, %arg3: memref<2x12x32xf32, #tpu.memory_space<vmem>>, %arg4: memref<2x8xi32, #tpu.memory_space<vmem>>, %arg5: memref<2x12xi32, #tpu.memory_space<vmem>>, %arg6: memref<1x1x32xf32, #tpu.memory_space<vmem>>, %arg7: memref<1x1x32xf32, #tpu.memory_space<vmem>>, %arg8: memref<1x32x32xbf16, #tpu.memory_space<vmem>>, %arg9: memref<1x32x32xbf16, #tpu.memory_space<vmem>>, %arg10: memref<1x32x32xbf16, #tpu.memory_space<vmem>>, %arg11: memref<1x32x32xbf16, #tpu.memory_space<vmem>>, %arg12: memref<1x1x32xf32, #tpu.memory_space<vmem>>, %arg13: memref<1x1x32xf32, #tpu.memory_space<vmem>>, %arg14: memref<1x32x32xbf16, #tpu.memory_space<vmem>>, %arg15: memref<1x32x32xbf16, #tpu.memory_space<vmem>>, %arg16: memref<1x32x32xbf16, #tpu.memory_space<vmem>>, %arg17: memref<1x32x32xbf16, #tpu.memory_space<vmem>>, %arg18: memref<1x1x32xf32, #tpu.memory_space<vmem>>, %arg19: memref<1x1x32xf32, #tpu.memory_space<vmem>>, %arg20: memref<1x32x64xbf16, #tpu.memory_space<vmem>>, %arg21: memref<1x1x64xf32, #tpu.memory_space<vmem>>, %arg22: memref<1x64x32xbf16, #tpu.memory_space<vmem>>, %arg23: memref<1x1x32xf32, #tpu.memory_space<vmem>>, %arg24: memref<1x32xf32, #tpu.memory_space<vmem>>, %arg25: memref<1x32xf32, #tpu.memory_space<vmem>>, %arg26: memref<2x8x32xf32, #tpu.memory_space<vmem>>, %arg27: memref<2x8x12xf32, #tpu.memory_space<vmem>>, %arg28: memref<2x8x32xf32, #tpu.memory_space<vmem>>) attributes {dimension_semantics = [#tpu.dimension_semantics<parallel>, #tpu.dimension_semantics<arbitrary>], iteration_bounds = array<i64: 1, 2>, scalar_prefetch = 0 : i64, scratch_operands = 1 : i64, tpu.core_type = #tpu.core_type<tc>, window_params = [{transform_indices = @transform_0, window_bounds = array<i64: 2, 8, 32>}, {transform_indices = @transform_1, window_bounds = array<i64: 2, 12, 32>}, {transform_indices = @transform_2, window_bounds = array<i64: 2, 8>}, {transform_indices = @transform_3, window_bounds = array<i64: 2, 12>}, {transform_indices = @transform_4, window_bounds = array<i64: 1, 1, 32>}, {transform_indices = @transform_5, window_bounds = array<i64: 1, 1, 32>}, {transform_indices = @transform_6, window_bounds = array<i64: 1, 32, 32>}, {transform_indices = @transform_7, window_bounds = array<i64: 1, 32, 32>}, {transform_indices = @transform_8, window_bounds = array<i64: 1, 32, 32>}, {transform_indices = @transform_9, window_bounds = array<i64: 1, 32, 32>}, {transform_indices = @transform_10, window_bounds = array<i64: 1, 1, 32>}, {transform_indices = @transform_11, window_bounds = array<i64: 1, 1, 32>}, {transform_indices = @transform_12, window_bounds = array<i64: 1, 32, 32>}, {transform_indices = @transform_13, window_bounds = array<i64: 1, 32, 32>}, {transform_indices = @transform_14, window_bounds = array<i64: 1, 32, 32>}, {transform_indices = @transform_15, window_bounds = array<i64: 1, 32, 32>}, {transform_indices = @transform_16, window_bounds = array<i64: 1, 1, 32>}, {transform_indices = @transform_17, window_bounds = array<i64: 1, 1, 32>}, {transform_indices = @transform_18, window_bounds = array<i64: 1, 32, 64>}, {transform_indices = @transform_19, window_bounds = array<i64: 1, 1, 64>}, {transform_indices = @transform_20, window_bounds = array<i64: 1, 64, 32>}, {transform_indices = @transform_21, window_bounds = array<i64: 1, 1, 32>}, {pipeline_mode = #tpu.pipeline_mode<synchronous>, transform_indices = @transform_22, window_bounds = array<i64: 1, 32>}, {pipeline_mode = #tpu.pipeline_mode<synchronous>, transform_indices = @transform_23, window_bounds = array<i64: 1, 32>}, {transform_indices = @transform_24, window_bounds = array<i64: 2, 8, 32>}, {transform_indices = @transform_25, window_bounds = array<i64: 2, 8, 12>}]} {
    %c0_i32 = arith.constant 0 : i32
    %0 = arith.cmpi eq, %arg1, %c0_i32 : i32
    %1 = arith.extui %0 : i1 to i32
    %c0_i32_0 = arith.constant 0 : i32
    %2 = arith.cmpi ne, %1, %c0_i32_0 : i32
    scf.if %2 {
      %c0_109 = arith.constant 0 : index
      %c0_110 = arith.constant 0 : index
      %c0_111 = arith.constant 0 : index
      %331 = vector.load %arg2[%c0_109, %c0_110, %c0_111] : memref<2x8x32xf32, #tpu.memory_space<vmem>>, vector<2x8x32xf32>
      %c0_112 = arith.constant 0 : index
      %c0_113 = arith.constant 0 : index
      %c0_114 = arith.constant 0 : index
      %332 = vector.load %arg28[%c0_112, %c0_113, %c0_114] : memref<2x8x32xf32, #tpu.memory_space<vmem>>, vector<2x8x32xf32>
      tpu.vector_store %arg28[%c0_112, %c0_113, %c0_114], %331 {strides = array<i32>} : memref<2x8x32xf32, #tpu.memory_space<vmem>>, vector<2x8x32xf32>,
    } else {
    }
    %c0 = arith.constant 0 : index
    %c0_1 = arith.constant 0 : index
    %c0_2 = arith.constant 0 : index
    %3 = vector.load %arg28[%c0, %c0_1, %c0_2] : memref<2x8x32xf32, #tpu.memory_space<vmem>>, vector<2x8x32xf32>
    %c0_3 = arith.constant 0 : index
    %c0_4 = arith.constant 0 : index
    %c0_5 = arith.constant 0 : index
    %4 = vector.load %arg3[%c0_3, %c0_4, %c0_5] : memref<2x12x32xf32, #tpu.memory_space<vmem>>, vector<2x12x32xf32>
    %5 = tpu.iota {dimensions = array<i32: 0>} : vector<8x8xi32>
    %6 = tpu.iota {dimensions = array<i32: 1>} : vector<8x8xi32>
    %7 = arith.cmpi sgt, %6, %5 : vector<8x8xi32>
    %c0_6 = arith.constant 0 : index
    %c0_7 = arith.constant 0 : index
    %8 = vector.load %arg4[%c0_6, %c0_7] : memref<2x8xi32, #tpu.memory_space<vmem>>, vector<2x8xi32>
    %c0_i32_8 = arith.constant 0 : i32
    %9 = vector.broadcast %c0_i32_8 : i32 to vector<2x8xi32>
    %10 = arith.cmpi eq, %8, %9 : vector<2x8xi32>
    %c0_9 = arith.constant 0 : index
    %c0_10 = arith.constant 0 : index
    %11 = vector.load %arg5[%c0_9, %c0_10] : memref<2x12xi32, #tpu.memory_space<vmem>>, vector<2x12xi32>
    %c0_i32_11 = arith.constant 0 : i32
    %12 = vector.broadcast %c0_i32_11 : i32 to vector<2x12xi32>
    %13 = arith.cmpi eq, %11, %12 : vector<2x12xi32>
    %14 = vector.shape_cast %10 : vector<2x8xi1> to vector<2x1x8xi1>
    %15 = vector.shape_cast %7 : vector<8x8xi1> to vector<1x8x8xi1>
    %16 = vector.broadcast %14 : vector<2x1x8xi1> to vector<2x8x8xi1>
    %17 = vector.broadcast %15 : vector<1x8x8xi1> to vector<2x8x8xi1>
    %18 = arith.ori %16, %17 : vector<2x8x8xi1>
    %cst = arith.constant -1.000000e+09 : f32
    %cst_12 = arith.constant 0.000000e+00 : f32
    %19 = vector.broadcast %cst : f32 to vector<2x8x8xf32>
    %20 = vector.broadcast %cst_12 : f32 to vector<2x8x8xf32>
    %21 = arith.select %18, %19, %20 : vector<2x8x8xi1>, vector<2x8x8xf32>
    %22 = vector.shape_cast %13 : vector<2x12xi1> to vector<2x1x12xi1>
    %cst_13 = arith.constant -1.000000e+09 : f32
    %cst_14 = arith.constant 0.000000e+00 : f32
    %23 = vector.broadcast %cst_13 : f32 to vector<2x1x12xf32>
    %24 = vector.broadcast %cst_14 : f32 to vector<2x1x12xf32>
    %25 = arith.select %22, %23, %24 : vector<2x1x12xi1>, vector<2x1x12xf32>
    %c0_15 = arith.constant 0 : index
    %c0_16 = arith.constant 0 : index
    %c0_17 = arith.constant 0 : index
    %26 = vector.load %arg6[%c0_15, %c0_16, %c0_17] : memref<1x1x32xf32, #tpu.memory_space<vmem>>, vector<1x1x32xf32>
    %27 = vector.shape_cast %26 : vector<1x1x32xf32> to vector<1x32xf32>
    %c0_18 = arith.constant 0 : index
    %c0_19 = arith.constant 0 : index
    %c0_20 = arith.constant 0 : index
    %28 = vector.load %arg7[%c0_18, %c0_19, %c0_20] : memref<1x1x32xf32, #tpu.memory_space<vmem>>, vector<1x1x32xf32>
    %29 = vector.shape_cast %28 : vector<1x1x32xf32> to vector<1x32xf32>
    %cst_21 = arith.constant dense<0.000000e+00> : vector<2x8xf32>
    %30 = vector.multi_reduction <add>, %3, %cst_21 [2] : vector<2x8x32xf32> to vector<2x8xf32>
    %31 = vector.shape_cast %30 : vector<2x8xf32> to vector<2x8x1xf32>
    %cst_22 = arith.constant 3.200000e+01 : f32
    %32 = vector.broadcast %cst_22 : f32 to vector<2x8x1xf32>
    %33 = arith.divf %31, %32 : vector<2x8x1xf32>
    %34 = vector.broadcast %33 : vector<2x8x1xf32> to vector<2x8x32xf32>
    %35 = arith.subf %3, %34 : vector<2x8x32xf32>
    %36 = arith.mulf %35, %35 : vector<2x8x32xf32>
    %cst_23 = arith.constant dense<0.000000e+00> : vector<2x8xf32>
    %37 = vector.multi_reduction <add>, %36, %cst_23 [2] : vector<2x8x32xf32> to vector<2x8xf32>
    %38 = vector.shape_cast %37 : vector<2x8xf32> to vector<2x8x1xf32>
    %cst_24 = arith.constant 3.200000e+01 : f32
    %39 = vector.broadcast %cst_24 : f32 to vector<2x8x1xf32>
    %40 = arith.divf %38, %39 : vector<2x8x1xf32>
    %41 = vector.broadcast %33 : vector<2x8x1xf32> to vector<2x8x32xf32>
    %42 = arith.subf %3, %41 : vector<2x8x32xf32>
    %cst_25 = arith.constant 9.99999974E-6 : f32
    %43 = vector.broadcast %cst_25 : f32 to vector<2x8x1xf32>
    %44 = arith.addf %40, %43 : vector<2x8x1xf32>
    %45 = math.rsqrt %44 : vector<2x8x1xf32>
    %46 = vector.broadcast %45 : vector<2x8x1xf32> to vector<2x8x32xf32>
    %47 = arith.mulf %42, %46 : vector<2x8x32xf32>
    %48 = vector.shape_cast %27 : vector<1x32xf32> to vector<1x1x32xf32>
    %49 = vector.broadcast %48 : vector<1x1x32xf32> to vector<2x8x32xf32>
    %50 = arith.mulf %47, %49 : vector<2x8x32xf32>
    %51 = vector.shape_cast %29 : vector<1x32xf32> to vector<1x1x32xf32>
    %52 = vector.broadcast %51 : vector<1x1x32xf32> to vector<2x8x32xf32>
    %53 = arith.addf %50, %52 : vector<2x8x32xf32>
    %54 = arith.truncf %53 : vector<2x8x32xf32> to vector<2x8x32xbf16>
    %55 = vector.shape_cast %54 : vector<2x8x32xbf16> to vector<16x32xbf16>
    %56 = arith.truncf %53 : vector<2x8x32xf32> to vector<2x8x32xbf16>
    %57 = vector.shape_cast %56 : vector<2x8x32xbf16> to vector<16x32xbf16>
    %c0_26 = arith.constant 0 : index
    %c0_27 = arith.constant 0 : index
    %c0_28 = arith.constant 0 : index
    %58 = vector.load %arg8[%c0_26, %c0_27, %c0_28] : memref<1x32x32xbf16, #tpu.memory_space<vmem>>, vector<1x32x32xbf16>
    %59 = vector.shape_cast %58 : vector<1x32x32xbf16> to vector<32x32xbf16>
    %cst_29 = arith.constant dense<0.000000e+00> : vector<16x32xf32>
    %60 = tpu.matmul %55, %59, %cst_29 {dimension_numbers = #tpu.dot_dimension_numbers<[1], [0], [0], [1], [0, 0, 1, 1], [], []>} : vector<16x32xbf16>, vector<32x32xbf16>, vector<16x32xf32> -> vector<16x32xf32>
    %c0_30 = arith.constant 0 : index
    %c0_31 = arith.constant 0 : index
    %c0_32 = arith.constant 0 : index
    %61 = vector.load %arg9[%c0_30, %c0_31, %c0_32] : memref<1x32x32xbf16, #tpu.memory_space<vmem>>, vector<1x32x32xbf16>
    %62 = vector.shape_cast %61 : vector<1x32x32xbf16> to vector<32x32xbf16>
    %cst_33 = arith.constant dense<0.000000e+00> : vector<16x32xf32>
    %63 = tpu.matmul %57, %62, %cst_33 {dimension_numbers = #tpu.dot_dimension_numbers<[1], [0], [0], [1], [0, 0, 1, 1], [], []>} : vector<16x32xbf16>, vector<32x32xbf16>, vector<16x32xf32> -> vector<16x32xf32>
    %c0_34 = arith.constant 0 : index
    %c0_35 = arith.constant 0 : index
    %c0_36 = arith.constant 0 : index
    %64 = vector.load %arg10[%c0_34, %c0_35, %c0_36] : memref<1x32x32xbf16, #tpu.memory_space<vmem>>, vector<1x32x32xbf16>
    %65 = vector.shape_cast %64 : vector<1x32x32xbf16> to vector<32x32xbf16>
    %cst_37 = arith.constant dense<0.000000e+00> : vector<16x32xf32>
    %66 = tpu.matmul %57, %65, %cst_37 {dimension_numbers = #tpu.dot_dimension_numbers<[1], [0], [0], [1], [0, 0, 1, 1], [], []>} : vector<16x32xbf16>, vector<32x32xbf16>, vector<16x32xf32> -> vector<16x32xf32>
    %67 = vector.extract_strided_slice %60 {offsets = [0, 0], sizes = [16, 8], strides = [1, 1]} : vector<16x32xf32> to vector<16x8xf32>
    %68 = vector.shape_cast %67 : vector<16x8xf32> to vector<2x8x8xf32>
    %69 = vector.extract_strided_slice %60 {offsets = [0, 8], sizes = [16, 8], strides = [1, 1]} : vector<16x32xf32> to vector<16x8xf32>
    %70 = vector.shape_cast %69 : vector<16x8xf32> to vector<2x8x8xf32>
    %71 = vector.extract_strided_slice %60 {offsets = [0, 16], sizes = [16, 8], strides = [1, 1]} : vector<16x32xf32> to vector<16x8xf32>
    %72 = vector.shape_cast %71 : vector<16x8xf32> to vector<2x8x8xf32>
    %73 = vector.extract_strided_slice %60 {offsets = [0, 24], sizes = [16, 8], strides = [1, 1]} : vector<16x32xf32> to vector<16x8xf32>
    %74 = vector.shape_cast %73 : vector<16x8xf32> to vector<2x8x8xf32>
    %75 = vector.shape_cast %68 : vector<2x8x8xf32> to vector<2x1x8x8xf32>
    %76 = vector.shape_cast %70 : vector<2x8x8xf32> to vector<2x1x8x8xf32>
    %77 = vector.shape_cast %72 : vector<2x8x8xf32> to vector<2x1x8x8xf32>
    %78 = vector.shape_cast %74 : vector<2x8x8xf32> to vector<2x1x8x8xf32>
    %79 = tpu.concatenate %75, %76, %77, %78 in 1 : vector<2x1x8x8xf32>, vector<2x1x8x8xf32>, vector<2x1x8x8xf32>, vector<2x1x8x8xf32> -> vector<2x4x8x8xf32>
    %80 = vector.shape_cast %79 : vector<2x4x8x8xf32> to vector<8x8x8xf32>
    %81 = arith.truncf %80 : vector<8x8x8xf32> to vector<8x8x8xbf16>
    %82 = vector.extract_strided_slice %63 {offsets = [0, 0], sizes = [16, 8], strides = [1, 1]} : vector<16x32xf32> to vector<16x8xf32>
    %83 = vector.shape_cast %82 : vector<16x8xf32> to vector<2x8x8xf32>
    %84 = vector.extract_strided_slice %63 {offsets = [0, 8], sizes = [16, 8], strides = [1, 1]} : vector<16x32xf32> to vector<16x8xf32>
    %85 = vector.shape_cast %84 : vector<16x8xf32> to vector<2x8x8xf32>
    %86 = vector.extract_strided_slice %63 {offsets = [0, 16], sizes = [16, 8], strides = [1, 1]} : vector<16x32xf32> to vector<16x8xf32>
    %87 = vector.shape_cast %86 : vector<16x8xf32> to vector<2x8x8xf32>
    %88 = vector.extract_strided_slice %63 {offsets = [0, 24], sizes = [16, 8], strides = [1, 1]} : vector<16x32xf32> to vector<16x8xf32>
    %89 = vector.shape_cast %88 : vector<16x8xf32> to vector<2x8x8xf32>
    %90 = vector.shape_cast %83 : vector<2x8x8xf32> to vector<2x1x8x8xf32>
    %91 = vector.shape_cast %85 : vector<2x8x8xf32> to vector<2x1x8x8xf32>
    %92 = vector.shape_cast %87 : vector<2x8x8xf32> to vector<2x1x8x8xf32>
    %93 = vector.shape_cast %89 : vector<2x8x8xf32> to vector<2x1x8x8xf32>
    %94 = tpu.concatenate %90, %91, %92, %93 in 1 : vector<2x1x8x8xf32>, vector<2x1x8x8xf32>, vector<2x1x8x8xf32>, vector<2x1x8x8xf32> -> vector<2x4x8x8xf32>
    %95 = vector.shape_cast %94 : vector<2x4x8x8xf32> to vector<8x8x8xf32>
    %96 = arith.truncf %95 : vector<8x8x8xf32> to vector<8x8x8xbf16>
    %97 = vector.extract_strided_slice %66 {offsets = [0, 0], sizes = [16, 8], strides = [1, 1]} : vector<16x32xf32> to vector<16x8xf32>
    %98 = vector.shape_cast %97 : vector<16x8xf32> to vector<2x8x8xf32>
    %99 = vector.extract_strided_slice %66 {offsets = [0, 8], sizes = [16, 8], strides = [1, 1]} : vector<16x32xf32> to vector<16x8xf32>
    %100 = vector.shape_cast %99 : vector<16x8xf32> to vector<2x8x8xf32>
    %101 = vector.extract_strided_slice %66 {offsets = [0, 16], sizes = [16, 8], strides = [1, 1]} : vector<16x32xf32> to vector<16x8xf32>
    %102 = vector.shape_cast %101 : vector<16x8xf32> to vector<2x8x8xf32>
    %103 = vector.extract_strided_slice %66 {offsets = [0, 24], sizes = [16, 8], strides = [1, 1]} : vector<16x32xf32> to vector<16x8xf32>
    %104 = vector.shape_cast %103 : vector<16x8xf32> to vector<2x8x8xf32>
    %105 = vector.shape_cast %98 : vector<2x8x8xf32> to vector<2x1x8x8xf32>
    %106 = vector.shape_cast %100 : vector<2x8x8xf32> to vector<2x1x8x8xf32>
    %107 = vector.shape_cast %102 : vector<2x8x8xf32> to vector<2x1x8x8xf32>
    %108 = vector.shape_cast %104 : vector<2x8x8xf32> to vector<2x1x8x8xf32>
    %109 = tpu.concatenate %105, %106, %107, %108 in 1 : vector<2x1x8x8xf32>, vector<2x1x8x8xf32>, vector<2x1x8x8xf32>, vector<2x1x8x8xf32> -> vector<2x4x8x8xf32>
    %110 = vector.shape_cast %109 : vector<2x4x8x8xf32> to vector<8x8x8xf32>
    %111 = arith.truncf %110 : vector<8x8x8xf32> to vector<8x8x8xbf16>
    "tpu.trace_start"() <{level = 10 : i32, message = "zqd,zkd->zqk"}> : () -> ()
    %cst_38 = arith.constant dense<0.000000e+00> : vector<8x8x8xf32>
    %112 = tpu.matmul %81, %96, %cst_38 {dimension_numbers = #tpu.dot_dimension_numbers<[2], [2], [1], [1], [0, 0, 0, 1, 1, 1], [0], [0]>} : vector<8x8x8xbf16>, vector<8x8x8xbf16>, vector<8x8x8xf32> -> vector<8x8x8xf32>
    "tpu.trace_stop"() : () -> ()
    %cst_39 = arith.constant 0.353553385 : f32
    %113 = vector.broadcast %cst_39 : f32 to vector<8x8x8xf32>
    %114 = arith.mulf %112, %113 : vector<8x8x8xf32>
    %115 = vector.shape_cast %114 : vector<8x8x8xf32> to vector<2x4x8x8xf32>
    %116 = vector.shape_cast %21 : vector<2x8x8xf32> to vector<2x1x8x8xf32>
    %117 = vector.broadcast %116 : vector<2x1x8x8xf32> to vector<2x4x8x8xf32>
    %118 = arith.addf %115, %117 : vector<2x4x8x8xf32>
    %cst_40 = arith.constant dense<0xFF800000> : vector<2x4x8xf32>
    %119 = vector.multi_reduction <maximumf>, %118, %cst_40 [3] : vector<2x4x8x8xf32> to vector<2x4x8xf32>
    %120 = vector.shape_cast %119 : vector<2x4x8xf32> to vector<2x4x8x1xf32>
    %121 = vector.broadcast %120 : vector<2x4x8x1xf32> to vector<2x4x8x8xf32>
    %122 = arith.subf %118, %121 : vector<2x4x8x8xf32>
    %123 = math.exp %122 : vector<2x4x8x8xf32>
    %cst_41 = arith.constant dense<0.000000e+00> : vector<2x4x8xf32>
    %124 = vector.multi_reduction <add>, %123, %cst_41 [3] : vector<2x4x8x8xf32> to vector<2x4x8xf32>
    %125 = vector.shape_cast %124 : vector<2x4x8xf32> to vector<2x4x8x1xf32>
    %126 = tpu.reciprocal %125 {approx = true} : vector<2x4x8x1xf32> -> vector<2x4x8x1xf32>
    %127 = vector.broadcast %126 : vector<2x4x8x1xf32> to vector<2x4x8x8xf32>
    %128 = arith.mulf %123, %127 : vector<2x4x8x8xf32>
    %129 = arith.truncf %128 : vector<2x4x8x8xf32> to vector<2x4x8x8xbf16>
    %130 = vector.shape_cast %129 : vector<2x4x8x8xbf16> to vector<8x8x8xbf16>
    "tpu.trace_start"() <{level = 10 : i32, message = "zqk,zkd->zqd"}> : () -> ()
    %cst_42 = arith.constant dense<0.000000e+00> : vector<8x8x8xf32>
    %131 = tpu.matmul %130, %111, %cst_42 {dimension_numbers = #tpu.dot_dimension_numbers<[2], [1], [1], [2], [0, 0, 0, 1, 1, 2], [0], [0]>} : vector<8x8x8xbf16>, vector<8x8x8xbf16>, vector<8x8x8xf32> -> vector<8x8x8xf32>
    "tpu.trace_stop"() : () -> ()
    %132 = vector.shape_cast %131 : vector<8x8x8xf32> to vector<2x4x8x8xf32>
    %133 = vector.extract_strided_slice %132 {offsets = [0, 0, 0, 0], sizes = [2, 1, 8, 8], strides = [1, 1, 1, 1]} : vector<2x4x8x8xf32> to vector<2x1x8x8xf32>
    %134 = vector.shape_cast %133 : vector<2x1x8x8xf32> to vector<2x8x8xf32>
    %135 = vector.shape_cast %134 : vector<2x8x8xf32> to vector<16x8xf32>
    %136 = vector.extract_strided_slice %132 {offsets = [0, 1, 0, 0], sizes = [2, 1, 8, 8], strides = [1, 1, 1, 1]} : vector<2x4x8x8xf32> to vector<2x1x8x8xf32>
    %137 = vector.shape_cast %136 : vector<2x1x8x8xf32> to vector<2x8x8xf32>
    %138 = vector.shape_cast %137 : vector<2x8x8xf32> to vector<16x8xf32>
    %139 = vector.extract_strided_slice %132 {offsets = [0, 2, 0, 0], sizes = [2, 1, 8, 8], strides = [1, 1, 1, 1]} : vector<2x4x8x8xf32> to vector<2x1x8x8xf32>
    %140 = vector.shape_cast %139 : vector<2x1x8x8xf32> to vector<2x8x8xf32>
    %141 = vector.shape_cast %140 : vector<2x8x8xf32> to vector<16x8xf32>
    %142 = vector.extract_strided_slice %132 {offsets = [0, 3, 0, 0], sizes = [2, 1, 8, 8], strides = [1, 1, 1, 1]} : vector<2x4x8x8xf32> to vector<2x1x8x8xf32>
    %143 = vector.shape_cast %142 : vector<2x1x8x8xf32> to vector<2x8x8xf32>
    %144 = vector.shape_cast %143 : vector<2x8x8xf32> to vector<16x8xf32>
    %145 = tpu.concatenate %135, %138, %141, %144 in 1 : vector<16x8xf32>, vector<16x8xf32>, vector<16x8xf32>, vector<16x8xf32> -> vector<16x32xf32>
    %146 = arith.truncf %145 : vector<16x32xf32> to vector<16x32xbf16>
    %c0_43 = arith.constant 0 : index
    %c0_44 = arith.constant 0 : index
    %c0_45 = arith.constant 0 : index
    %147 = vector.load %arg11[%c0_43, %c0_44, %c0_45] : memref<1x32x32xbf16, #tpu.memory_space<vmem>>, vector<1x32x32xbf16>
    %148 = vector.shape_cast %147 : vector<1x32x32xbf16> to vector<32x32xbf16>
    %cst_46 = arith.constant dense<0.000000e+00> : vector<16x32xf32>
    %149 = tpu.matmul %146, %148, %cst_46 {dimension_numbers = #tpu.dot_dimension_numbers<[1], [0], [0], [1], [0, 0, 1, 1], [], []>} : vector<16x32xbf16>, vector<32x32xbf16>, vector<16x32xf32> -> vector<16x32xf32>
    %150 = vector.shape_cast %149 : vector<16x32xf32> to vector<2x8x32xf32>
    %151 = arith.addf %3, %150 : vector<2x8x32xf32>
    %c0_47 = arith.constant 0 : index
    %c0_48 = arith.constant 0 : index
    %c0_49 = arith.constant 0 : index
    %152 = vector.load %arg12[%c0_47, %c0_48, %c0_49] : memref<1x1x32xf32, #tpu.memory_space<vmem>>, vector<1x1x32xf32>
    %153 = vector.shape_cast %152 : vector<1x1x32xf32> to vector<1x32xf32>
    %c0_50 = arith.constant 0 : index
    %c0_51 = arith.constant 0 : index
    %c0_52 = arith.constant 0 : index
    %154 = vector.load %arg13[%c0_50, %c0_51, %c0_52] : memref<1x1x32xf32, #tpu.memory_space<vmem>>, vector<1x1x32xf32>
    %155 = vector.shape_cast %154 : vector<1x1x32xf32> to vector<1x32xf32>
    %cst_53 = arith.constant dense<0.000000e+00> : vector<2x8xf32>
    %156 = vector.multi_reduction <add>, %151, %cst_53 [2] : vector<2x8x32xf32> to vector<2x8xf32>
    %157 = vector.shape_cast %156 : vector<2x8xf32> to vector<2x8x1xf32>
    %cst_54 = arith.constant 3.200000e+01 : f32
    %158 = vector.broadcast %cst_54 : f32 to vector<2x8x1xf32>
    %159 = arith.divf %157, %158 : vector<2x8x1xf32>
    %160 = vector.broadcast %159 : vector<2x8x1xf32> to vector<2x8x32xf32>
    %161 = arith.subf %151, %160 : vector<2x8x32xf32>
    %162 = arith.mulf %161, %161 : vector<2x8x32xf32>
    %cst_55 = arith.constant dense<0.000000e+00> : vector<2x8xf32>
    %163 = vector.multi_reduction <add>, %162, %cst_55 [2] : vector<2x8x32xf32> to vector<2x8xf32>
    %164 = vector.shape_cast %163 : vector<2x8xf32> to vector<2x8x1xf32>
    %cst_56 = arith.constant 3.200000e+01 : f32
    %165 = vector.broadcast %cst_56 : f32 to vector<2x8x1xf32>
    %166 = arith.divf %164, %165 : vector<2x8x1xf32>
    %167 = vector.broadcast %159 : vector<2x8x1xf32> to vector<2x8x32xf32>
    %168 = arith.subf %151, %167 : vector<2x8x32xf32>
    %cst_57 = arith.constant 9.99999974E-6 : f32
    %169 = vector.broadcast %cst_57 : f32 to vector<2x8x1xf32>
    %170 = arith.addf %166, %169 : vector<2x8x1xf32>
    %171 = math.rsqrt %170 : vector<2x8x1xf32>
    %172 = vector.broadcast %171 : vector<2x8x1xf32> to vector<2x8x32xf32>
    %173 = arith.mulf %168, %172 : vector<2x8x32xf32>
    %174 = vector.shape_cast %153 : vector<1x32xf32> to vector<1x1x32xf32>
    %175 = vector.broadcast %174 : vector<1x1x32xf32> to vector<2x8x32xf32>
    %176 = arith.mulf %173, %175 : vector<2x8x32xf32>
    %177 = vector.shape_cast %155 : vector<1x32xf32> to vector<1x1x32xf32>
    %178 = vector.broadcast %177 : vector<1x1x32xf32> to vector<2x8x32xf32>
    %179 = arith.addf %176, %178 : vector<2x8x32xf32>
    %180 = arith.truncf %179 : vector<2x8x32xf32> to vector<2x8x32xbf16>
    %181 = vector.shape_cast %180 : vector<2x8x32xbf16> to vector<16x32xbf16>
    %182 = arith.truncf %4 : vector<2x12x32xf32> to vector<2x12x32xbf16>
    %183 = vector.shape_cast %182 : vector<2x12x32xbf16> to vector<24x32xbf16>
    %c0_58 = arith.constant 0 : index
    %c0_59 = arith.constant 0 : index
    %c0_60 = arith.constant 0 : index
    %184 = vector.load %arg14[%c0_58, %c0_59, %c0_60] : memref<1x32x32xbf16, #tpu.memory_space<vmem>>, vector<1x32x32xbf16>
    %185 = vector.shape_cast %184 : vector<1x32x32xbf16> to vector<32x32xbf16>
    %cst_61 = arith.constant dense<0.000000e+00> : vector<16x32xf32>
    %186 = tpu.matmul %181, %185, %cst_61 {dimension_numbers = #tpu.dot_dimension_numbers<[1], [0], [0], [1], [0, 0, 1, 1], [], []>} : vector<16x32xbf16>, vector<32x32xbf16>, vector<16x32xf32> -> vector<16x32xf32>
    %c0_62 = arith.constant 0 : index
    %c0_63 = arith.constant 0 : index
    %c0_64 = arith.constant 0 : index
    %187 = vector.load %arg15[%c0_62, %c0_63, %c0_64] : memref<1x32x32xbf16, #tpu.memory_space<vmem>>, vector<1x32x32xbf16>
    %188 = vector.shape_cast %187 : vector<1x32x32xbf16> to vector<32x32xbf16>
    %cst_65 = arith.constant dense<0.000000e+00> : vector<24x32xf32>
    %189 = tpu.matmul %183, %188, %cst_65 {dimension_numbers = #tpu.dot_dimension_numbers<[1], [0], [0], [1], [0, 0, 1, 1], [], []>} : vector<24x32xbf16>, vector<32x32xbf16>, vector<24x32xf32> -> vector<24x32xf32>
    %c0_66 = arith.constant 0 : index
    %c0_67 = arith.constant 0 : index
    %c0_68 = arith.constant 0 : index
    %190 = vector.load %arg16[%c0_66, %c0_67, %c0_68] : memref<1x32x32xbf16, #tpu.memory_space<vmem>>, vector<1x32x32xbf16>
    %191 = vector.shape_cast %190 : vector<1x32x32xbf16> to vector<32x32xbf16>
    %cst_69 = arith.constant dense<0.000000e+00> : vector<24x32xf32>
    %192 = tpu.matmul %183, %191, %cst_69 {dimension_numbers = #tpu.dot_dimension_numbers<[1], [0], [0], [1], [0, 0, 1, 1], [], []>} : vector<24x32xbf16>, vector<32x32xbf16>, vector<24x32xf32> -> vector<24x32xf32>
    %193 = vector.extract_strided_slice %186 {offsets = [0, 0], sizes = [16, 8], strides = [1, 1]} : vector<16x32xf32> to vector<16x8xf32>
    %194 = vector.shape_cast %193 : vector<16x8xf32> to vector<2x8x8xf32>
    %195 = vector.extract_strided_slice %186 {offsets = [0, 8], sizes = [16, 8], strides = [1, 1]} : vector<16x32xf32> to vector<16x8xf32>
    %196 = vector.shape_cast %195 : vector<16x8xf32> to vector<2x8x8xf32>
    %197 = vector.extract_strided_slice %186 {offsets = [0, 16], sizes = [16, 8], strides = [1, 1]} : vector<16x32xf32> to vector<16x8xf32>
    %198 = vector.shape_cast %197 : vector<16x8xf32> to vector<2x8x8xf32>
    %199 = vector.extract_strided_slice %186 {offsets = [0, 24], sizes = [16, 8], strides = [1, 1]} : vector<16x32xf32> to vector<16x8xf32>
    %200 = vector.shape_cast %199 : vector<16x8xf32> to vector<2x8x8xf32>
    %201 = vector.shape_cast %194 : vector<2x8x8xf32> to vector<2x1x8x8xf32>
    %202 = vector.shape_cast %196 : vector<2x8x8xf32> to vector<2x1x8x8xf32>
    %203 = vector.shape_cast %198 : vector<2x8x8xf32> to vector<2x1x8x8xf32>
    %204 = vector.shape_cast %200 : vector<2x8x8xf32> to vector<2x1x8x8xf32>
    %205 = tpu.concatenate %201, %202, %203, %204 in 1 : vector<2x1x8x8xf32>, vector<2x1x8x8xf32>, vector<2x1x8x8xf32>, vector<2x1x8x8xf32> -> vector<2x4x8x8xf32>
    %206 = vector.shape_cast %205 : vector<2x4x8x8xf32> to vector<8x8x8xf32>
    %207 = arith.truncf %206 : vector<8x8x8xf32> to vector<8x8x8xbf16>
    %208 = vector.extract_strided_slice %189 {offsets = [0, 0], sizes = [24, 8], strides = [1, 1]} : vector<24x32xf32> to vector<24x8xf32>
    %209 = vector.shape_cast %208 : vector<24x8xf32> to vector<2x12x8xf32>
    %210 = vector.extract_strided_slice %189 {offsets = [0, 8], sizes = [24, 8], strides = [1, 1]} : vector<24x32xf32> to vector<24x8xf32>
    %211 = vector.shape_cast %210 : vector<24x8xf32> to vector<2x12x8xf32>
    %212 = vector.extract_strided_slice %189 {offsets = [0, 16], sizes = [24, 8], strides = [1, 1]} : vector<24x32xf32> to vector<24x8xf32>
    %213 = vector.shape_cast %212 : vector<24x8xf32> to vector<2x12x8xf32>
    %214 = vector.extract_strided_slice %189 {offsets = [0, 24], sizes = [24, 8], strides = [1, 1]} : vector<24x32xf32> to vector<24x8xf32>
    %215 = vector.shape_cast %214 : vector<24x8xf32> to vector<2x12x8xf32>
    %216 = vector.shape_cast %209 : vector<2x12x8xf32> to vector<2x1x12x8xf32>
    %217 = vector.shape_cast %211 : vector<2x12x8xf32> to vector<2x1x12x8xf32>
    %218 = vector.shape_cast %213 : vector<2x12x8xf32> to vector<2x1x12x8xf32>
    %219 = vector.shape_cast %215 : vector<2x12x8xf32> to vector<2x1x12x8xf32>
    %220 = tpu.concatenate %216, %217, %218, %219 in 1 : vector<2x1x12x8xf32>, vector<2x1x12x8xf32>, vector<2x1x12x8xf32>, vector<2x1x12x8xf32> -> vector<2x4x12x8xf32>
    %221 = vector.shape_cast %220 : vector<2x4x12x8xf32> to vector<8x12x8xf32>
    %222 = arith.truncf %221 : vector<8x12x8xf32> to vector<8x12x8xbf16>
    %223 = vector.extract_strided_slice %192 {offsets = [0, 0], sizes = [24, 8], strides = [1, 1]} : vector<24x32xf32> to vector<24x8xf32>
    %224 = vector.shape_cast %223 : vector<24x8xf32> to vector<2x12x8xf32>
    %225 = vector.extract_strided_slice %192 {offsets = [0, 8], sizes = [24, 8], strides = [1, 1]} : vector<24x32xf32> to vector<24x8xf32>
    %226 = vector.shape_cast %225 : vector<24x8xf32> to vector<2x12x8xf32>
    %227 = vector.extract_strided_slice %192 {offsets = [0, 16], sizes = [24, 8], strides = [1, 1]} : vector<24x32xf32> to vector<24x8xf32>
    %228 = vector.shape_cast %227 : vector<24x8xf32> to vector<2x12x8xf32>
    %229 = vector.extract_strided_slice %192 {offsets = [0, 24], sizes = [24, 8], strides = [1, 1]} : vector<24x32xf32> to vector<24x8xf32>
    %230 = vector.shape_cast %229 : vector<24x8xf32> to vector<2x12x8xf32>
    %231 = vector.shape_cast %224 : vector<2x12x8xf32> to vector<2x1x12x8xf32>
    %232 = vector.shape_cast %226 : vector<2x12x8xf32> to vector<2x1x12x8xf32>
    %233 = vector.shape_cast %228 : vector<2x12x8xf32> to vector<2x1x12x8xf32>
    %234 = vector.shape_cast %230 : vector<2x12x8xf32> to vector<2x1x12x8xf32>
    %235 = tpu.concatenate %231, %232, %233, %234 in 1 : vector<2x1x12x8xf32>, vector<2x1x12x8xf32>, vector<2x1x12x8xf32>, vector<2x1x12x8xf32> -> vector<2x4x12x8xf32>
    %236 = vector.shape_cast %235 : vector<2x4x12x8xf32> to vector<8x12x8xf32>
    %237 = arith.truncf %236 : vector<8x12x8xf32> to vector<8x12x8xbf16>
    "tpu.trace_start"() <{level = 10 : i32, message = "zqd,zkd->zqk"}> : () -> ()
    %cst_70 = arith.constant dense<0.000000e+00> : vector<8x8x12xf32>
    %238 = tpu.matmul %207, %222, %cst_70 {dimension_numbers = #tpu.dot_dimension_numbers<[2], [2], [1], [1], [0, 0, 0, 1, 1, 1], [0], [0]>} : vector<8x8x8xbf16>, vector<8x12x8xbf16>, vector<8x8x12xf32> -> vector<8x8x12xf32>
    "tpu.trace_stop"() : () -> ()
    %cst_71 = arith.constant 0.353553385 : f32
    %239 = vector.broadcast %cst_71 : f32 to vector<8x8x12xf32>
    %240 = arith.mulf %238, %239 : vector<8x8x12xf32>
    %241 = vector.shape_cast %240 : vector<8x8x12xf32> to vector<2x4x8x12xf32>
    %242 = vector.shape_cast %25 : vector<2x1x12xf32> to vector<2x1x1x12xf32>
    %243 = vector.broadcast %242 : vector<2x1x1x12xf32> to vector<2x4x8x12xf32>
    %244 = arith.addf %241, %243 : vector<2x4x8x12xf32>
    %cst_72 = arith.constant dense<0xFF800000> : vector<2x4x8xf32>
    %245 = vector.multi_reduction <maximumf>, %244, %cst_72 [3] : vector<2x4x8x12xf32> to vector<2x4x8xf32>
    %246 = vector.shape_cast %245 : vector<2x4x8xf32> to vector<2x4x8x1xf32>
    %247 = vector.broadcast %246 : vector<2x4x8x1xf32> to vector<2x4x8x12xf32>
    %248 = arith.subf %244, %247 : vector<2x4x8x12xf32>
    %249 = math.exp %248 : vector<2x4x8x12xf32>
    %cst_73 = arith.constant dense<0.000000e+00> : vector<2x4x8xf32>
    %250 = vector.multi_reduction <add>, %249, %cst_73 [3] : vector<2x4x8x12xf32> to vector<2x4x8xf32>
    %251 = vector.shape_cast %250 : vector<2x4x8xf32> to vector<2x4x8x1xf32>
    %252 = tpu.reciprocal %251 {approx = true} : vector<2x4x8x1xf32> -> vector<2x4x8x1xf32>
    %253 = vector.broadcast %252 : vector<2x4x8x1xf32> to vector<2x4x8x12xf32>
    %254 = arith.mulf %249, %253 : vector<2x4x8x12xf32>
    %255 = arith.truncf %254 : vector<2x4x8x12xf32> to vector<2x4x8x12xbf16>
    %256 = vector.shape_cast %255 : vector<2x4x8x12xbf16> to vector<8x8x12xbf16>
    "tpu.trace_start"() <{level = 10 : i32, message = "zqk,zkd->zqd"}> : () -> ()
    %cst_74 = arith.constant dense<0.000000e+00> : vector<8x8x8xf32>
    %257 = tpu.matmul %256, %237, %cst_74 {dimension_numbers = #tpu.dot_dimension_numbers<[2], [1], [1], [2], [0, 0, 0, 1, 1, 2], [0], [0]>} : vector<8x8x12xbf16>, vector<8x12x8xbf16>, vector<8x8x8xf32> -> vector<8x8x8xf32>
    "tpu.trace_stop"() : () -> ()
    %258 = vector.shape_cast %257 : vector<8x8x8xf32> to vector<2x4x8x8xf32>
    %259 = vector.extract_strided_slice %258 {offsets = [0, 0, 0, 0], sizes = [2, 1, 8, 8], strides = [1, 1, 1, 1]} : vector<2x4x8x8xf32> to vector<2x1x8x8xf32>
    %260 = vector.shape_cast %259 : vector<2x1x8x8xf32> to vector<2x8x8xf32>
    %261 = vector.shape_cast %260 : vector<2x8x8xf32> to vector<16x8xf32>
    %262 = vector.extract_strided_slice %258 {offsets = [0, 1, 0, 0], sizes = [2, 1, 8, 8], strides = [1, 1, 1, 1]} : vector<2x4x8x8xf32> to vector<2x1x8x8xf32>
    %263 = vector.shape_cast %262 : vector<2x1x8x8xf32> to vector<2x8x8xf32>
    %264 = vector.shape_cast %263 : vector<2x8x8xf32> to vector<16x8xf32>
    %265 = vector.extract_strided_slice %258 {offsets = [0, 2, 0, 0], sizes = [2, 1, 8, 8], strides = [1, 1, 1, 1]} : vector<2x4x8x8xf32> to vector<2x1x8x8xf32>
    %266 = vector.shape_cast %265 : vector<2x1x8x8xf32> to vector<2x8x8xf32>
    %267 = vector.shape_cast %266 : vector<2x8x8xf32> to vector<16x8xf32>
    %268 = vector.extract_strided_slice %258 {offsets = [0, 3, 0, 0], sizes = [2, 1, 8, 8], strides = [1, 1, 1, 1]} : vector<2x4x8x8xf32> to vector<2x1x8x8xf32>
    %269 = vector.shape_cast %268 : vector<2x1x8x8xf32> to vector<2x8x8xf32>
    %270 = vector.shape_cast %269 : vector<2x8x8xf32> to vector<16x8xf32>
    %271 = tpu.concatenate %261, %264, %267, %270 in 1 : vector<16x8xf32>, vector<16x8xf32>, vector<16x8xf32>, vector<16x8xf32> -> vector<16x32xf32>
    %272 = arith.truncf %271 : vector<16x32xf32> to vector<16x32xbf16>
    %c0_75 = arith.constant 0 : index
    %c0_76 = arith.constant 0 : index
    %c0_77 = arith.constant 0 : index
    %273 = vector.load %arg17[%c0_75, %c0_76, %c0_77] : memref<1x32x32xbf16, #tpu.memory_space<vmem>>, vector<1x32x32xbf16>
    %274 = vector.shape_cast %273 : vector<1x32x32xbf16> to vector<32x32xbf16>
    %cst_78 = arith.constant dense<0.000000e+00> : vector<16x32xf32>
    %275 = tpu.matmul %272, %274, %cst_78 {dimension_numbers = #tpu.dot_dimension_numbers<[1], [0], [0], [1], [0, 0, 1, 1], [], []>} : vector<16x32xbf16>, vector<32x32xbf16>, vector<16x32xf32> -> vector<16x32xf32>
    %276 = vector.shape_cast %275 : vector<16x32xf32> to vector<2x8x32xf32>
    %277 = arith.addf %151, %276 : vector<2x8x32xf32>
    %c0_79 = arith.constant 0 : index
    %c0_80 = arith.constant 0 : index
    %c0_81 = arith.constant 0 : index
    %278 = vector.load %arg18[%c0_79, %c0_80, %c0_81] : memref<1x1x32xf32, #tpu.memory_space<vmem>>, vector<1x1x32xf32>
    %279 = vector.shape_cast %278 : vector<1x1x32xf32> to vector<1x32xf32>
    %c0_82 = arith.constant 0 : index
    %c0_83 = arith.constant 0 : index
    %c0_84 = arith.constant 0 : index
    %280 = vector.load %arg19[%c0_82, %c0_83, %c0_84] : memref<1x1x32xf32, #tpu.memory_space<vmem>>, vector<1x1x32xf32>
    %281 = vector.shape_cast %280 : vector<1x1x32xf32> to vector<1x32xf32>
    %cst_85 = arith.constant dense<0.000000e+00> : vector<2x8xf32>
    %282 = vector.multi_reduction <add>, %277, %cst_85 [2] : vector<2x8x32xf32> to vector<2x8xf32>
    %283 = vector.shape_cast %282 : vector<2x8xf32> to vector<2x8x1xf32>
    %cst_86 = arith.constant 3.200000e+01 : f32
    %284 = vector.broadcast %cst_86 : f32 to vector<2x8x1xf32>
    %285 = arith.divf %283, %284 : vector<2x8x1xf32>
    %286 = vector.broadcast %285 : vector<2x8x1xf32> to vector<2x8x32xf32>
    %287 = arith.subf %277, %286 : vector<2x8x32xf32>
    %288 = arith.mulf %287, %287 : vector<2x8x32xf32>
    %cst_87 = arith.constant dense<0.000000e+00> : vector<2x8xf32>
    %289 = vector.multi_reduction <add>, %288, %cst_87 [2] : vector<2x8x32xf32> to vector<2x8xf32>
    %290 = vector.shape_cast %289 : vector<2x8xf32> to vector<2x8x1xf32>
    %cst_88 = arith.constant 3.200000e+01 : f32
    %291 = vector.broadcast %cst_88 : f32 to vector<2x8x1xf32>
    %292 = arith.divf %290, %291 : vector<2x8x1xf32>
    %293 = vector.broadcast %285 : vector<2x8x1xf32> to vector<2x8x32xf32>
    %294 = arith.subf %277, %293 : vector<2x8x32xf32>
    %cst_89 = arith.constant 9.99999974E-6 : f32
    %295 = vector.broadcast %cst_89 : f32 to vector<2x8x1xf32>
    %296 = arith.addf %292, %295 : vector<2x8x1xf32>
    %297 = math.rsqrt %296 : vector<2x8x1xf32>
    %298 = vector.broadcast %297 : vector<2x8x1xf32> to vector<2x8x32xf32>
    %299 = arith.mulf %294, %298 : vector<2x8x32xf32>
    %300 = vector.shape_cast %279 : vector<1x32xf32> to vector<1x1x32xf32>
    %301 = vector.broadcast %300 : vector<1x1x32xf32> to vector<2x8x32xf32>
    %302 = arith.mulf %299, %301 : vector<2x8x32xf32>
    %303 = vector.shape_cast %281 : vector<1x32xf32> to vector<1x1x32xf32>
    %304 = vector.broadcast %303 : vector<1x1x32xf32> to vector<2x8x32xf32>
    %305 = arith.addf %302, %304 : vector<2x8x32xf32>
    %306 = arith.truncf %305 : vector<2x8x32xf32> to vector<2x8x32xbf16>
    %307 = vector.shape_cast %306 : vector<2x8x32xbf16> to vector<16x32xbf16>
    %c0_90 = arith.constant 0 : index
    %c0_91 = arith.constant 0 : index
    %c0_92 = arith.constant 0 : index
    %308 = vector.load %arg20[%c0_90, %c0_91, %c0_92] : memref<1x32x64xbf16, #tpu.memory_space<vmem>>, vector<1x32x64xbf16>
    %309 = vector.shape_cast %308 : vector<1x32x64xbf16> to vector<32x64xbf16>
    %cst_93 = arith.constant dense<0.000000e+00> : vector<16x64xf32>
    %310 = tpu.matmul %307, %309, %cst_93 {dimension_numbers = #tpu.dot_dimension_numbers<[1], [0], [0], [1], [0, 0, 1, 1], [], []>} : vector<16x32xbf16>, vector<32x64xbf16>, vector<16x64xf32> -> vector<16x64xf32>
    %c0_94 = arith.constant 0 : index
    %c0_95 = arith.constant 0 : index
    %c0_96 = arith.constant 0 : index
    %311 = vector.load %arg21[%c0_94, %c0_95, %c0_96] : memref<1x1x64xf32, #tpu.memory_space<vmem>>, vector<1x1x64xf32>
    %312 = vector.shape_cast %311 : vector<1x1x64xf32> to vector<1x64xf32>
    %313 = vector.broadcast %312 : vector<1x64xf32> to vector<16x64xf32>
    %314 = arith.addf %310, %313 : vector<16x64xf32>
    %cst_97 = arith.constant 0.000000e+00 : f32
    %315 = vector.broadcast %cst_97 : f32 to vector<16x64xf32>
    %316 = arith.maximumf %314, %315 : vector<16x64xf32>
    %317 = arith.truncf %316 : vector<16x64xf32> to vector<16x64xbf16>
    %c0_98 = arith.constant 0 : index
    %c0_99 = arith.constant 0 : index
    %c0_100 = arith.constant 0 : index
    %318 = vector.load %arg22[%c0_98, %c0_99, %c0_100] : memref<1x64x32xbf16, #tpu.memory_space<vmem>>, vector<1x64x32xbf16>
    %319 = vector.shape_cast %318 : vector<1x64x32xbf16> to vector<64x32xbf16>
    %cst_101 = arith.constant dense<0.000000e+00> : vector<16x32xf32>
    %320 = tpu.matmul %317, %319, %cst_101 {dimension_numbers = #tpu.dot_dimension_numbers<[1], [0], [0], [1], [0, 0, 1, 1], [], []>} : vector<16x64xbf16>, vector<64x32xbf16>, vector<16x32xf32> -> vector<16x32xf32>
    %c0_102 = arith.constant 0 : index
    %c0_103 = arith.constant 0 : index
    %c0_104 = arith.constant 0 : index
    %321 = vector.load %arg23[%c0_102, %c0_103, %c0_104] : memref<1x1x32xf32, #tpu.memory_space<vmem>>, vector<1x1x32xf32>
    %322 = vector.shape_cast %321 : vector<1x1x32xf32> to vector<1x32xf32>
    %323 = vector.broadcast %322 : vector<1x32xf32> to vector<16x32xf32>
    %324 = arith.addf %320, %323 : vector<16x32xf32>
    %325 = vector.shape_cast %324 : vector<16x32xf32> to vector<2x8x32xf32>
    %326 = arith.addf %277, %325 : vector<2x8x32xf32>
    %c0_105 = arith.constant 0 : index
    %c0_106 = arith.constant 0 : index
    %c0_107 = arith.constant 0 : index
    %327 = vector.load %arg28[%c0_105, %c0_106, %c0_107] : memref<2x8x32xf32, #tpu.memory_space<vmem>>, vector<2x8x32xf32>
    tpu.vector_store %arg28[%c0_105, %c0_106, %c0_107], %326 {strides = array<i32>} : memref<2x8x32xf32, #tpu.memory_space<vmem>>, vector<2x8x32xf32>,
    %c1_i32 = arith.constant 1 : i32
    %328 = arith.cmpi eq, %arg1, %c1_i32 : i32
    %329 = arith.extui %328 : i1 to i32
    %c0_i32_108 = arith.constant 0 : i32
    %330 = arith.cmpi ne, %329, %c0_i32_108 : i32
    scf.if %330 {
      %c0_109 = arith.constant 0 : index
      %c0_110 = arith.constant 0 : index
      %331 = vector.load %arg24[%c0_109, %c0_110] : memref<1x32xf32, #tpu.memory_space<vmem>>, vector<1x32xf32>
      %c0_111 = arith.constant 0 : index
      %c0_112 = arith.constant 0 : index
      %332 = vector.load %arg25[%c0_111, %c0_112] : memref<1x32xf32, #tpu.memory_space<vmem>>, vector<1x32xf32>
      %cst_113 = arith.constant dense<0.000000e+00> : vector<2x8xf32>
      %333 = vector.multi_reduction <add>, %326, %cst_113 [2] : vector<2x8x32xf32> to vector<2x8xf32>
      %334 = vector.shape_cast %333 : vector<2x8xf32> to vector<2x8x1xf32>
      %cst_114 = arith.constant 3.200000e+01 : f32
      %335 = vector.broadcast %cst_114 : f32 to vector<2x8x1xf32>
      %336 = arith.divf %334, %335 : vector<2x8x1xf32>
      %337 = vector.broadcast %336 : vector<2x8x1xf32> to vector<2x8x32xf32>
      %338 = arith.subf %326, %337 : vector<2x8x32xf32>
      %339 = arith.mulf %338, %338 : vector<2x8x32xf32>
      %cst_115 = arith.constant dense<0.000000e+00> : vector<2x8xf32>
      %340 = vector.multi_reduction <add>, %339, %cst_115 [2] : vector<2x8x32xf32> to vector<2x8xf32>
      %341 = vector.shape_cast %340 : vector<2x8xf32> to vector<2x8x1xf32>
      %cst_116 = arith.constant 3.200000e+01 : f32
      %342 = vector.broadcast %cst_116 : f32 to vector<2x8x1xf32>
      %343 = arith.divf %341, %342 : vector<2x8x1xf32>
      %344 = vector.broadcast %336 : vector<2x8x1xf32> to vector<2x8x32xf32>
      %345 = arith.subf %326, %344 : vector<2x8x32xf32>
      %cst_117 = arith.constant 9.99999974E-6 : f32
      %346 = vector.broadcast %cst_117 : f32 to vector<2x8x1xf32>
      %347 = arith.addf %343, %346 : vector<2x8x1xf32>
      %348 = math.rsqrt %347 : vector<2x8x1xf32>
      %349 = vector.broadcast %348 : vector<2x8x1xf32> to vector<2x8x32xf32>
      %350 = arith.mulf %345, %349 : vector<2x8x32xf32>
      %351 = vector.shape_cast %331 : vector<1x32xf32> to vector<1x1x32xf32>
      %352 = vector.broadcast %351 : vector<1x1x32xf32> to vector<2x8x32xf32>
      %353 = arith.mulf %350, %352 : vector<2x8x32xf32>
      %354 = vector.shape_cast %332 : vector<1x32xf32> to vector<1x1x32xf32>
      %355 = vector.broadcast %354 : vector<1x1x32xf32> to vector<2x8x32xf32>
      %356 = arith.addf %353, %355 : vector<2x8x32xf32>
      %c0_118 = arith.constant 0 : index
      %c0_119 = arith.constant 0 : index
      %c0_120 = arith.constant 0 : index
      %357 = vector.load %arg26[%c0_118, %c0_119, %c0_120] : memref<2x8x32xf32, #tpu.memory_space<vmem>>, vector<2x8x32xf32>
      tpu.vector_store %arg26[%c0_118, %c0_119, %c0_120], %356 {strides = array<i32>} : memref<2x8x32xf32, #tpu.memory_space<vmem>>, vector<2x8x32xf32>,
      %cst_121 = arith.constant dense<0.000000e+00> : vector<2x8x12xf32>
      %358 = vector.multi_reduction <add>, %254, %cst_121 [1] : vector<2x4x8x12xf32> to vector<2x8x12xf32>
      %cst_122 = arith.constant 2.500000e-01 : f32
      %359 = vector.broadcast %cst_122 : f32 to vector<2x8x12xf32>
      %360 = arith.mulf %358, %359 : vector<2x8x12xf32>
      %c0_123 = arith.constant 0 : index
      %c0_124 = arith.constant 0 : index
      %c0_125 = arith.constant 0 : index
      %361 = vector.load %arg27[%c0_123, %c0_124, %c0_125] : memref<2x8x12xf32, #tpu.memory_space<vmem>>, vector<2x8x12xf32>
      tpu.vector_store %arg27[%c0_123, %c0_124, %c0_125], %360 {strides = array<i32>} : memref<2x8x12xf32, #tpu.memory_space<vmem>>, vector<2x8x12xf32>,
    } else {
    }
    return
  }
  func.func @transform_0(%arg0: i32, %arg1: i32) -> (i32, i32, i32) {
    %c0_i32 = arith.constant 0 : i32
    %c0_i32_0 = arith.constant 0 : i32
    %c0_i32_1 = arith.constant 0 : i32
    return %arg0, %c0_i32, %c0_i32_0 : i32, i32, i32
  }
  func.func @transform_1(%arg0: i32, %arg1: i32) -> (i32, i32, i32) {
    %c0_i32 = arith.constant 0 : i32
    %c0_i32_0 = arith.constant 0 : i32
    %c0_i32_1 = arith.constant 0 : i32
    return %arg0, %c0_i32, %c0_i32_0 : i32, i32, i32
  }
  func.func @transform_2(%arg0: i32, %arg1: i32) -> (i32, i32) {
    %c0_i32 = arith.constant 0 : i32
    %c0_i32_0 = arith.constant 0 : i32
    return %arg0, %c0_i32 : i32, i32
  }
  func.func @transform_3(%arg0: i32, %arg1: i32) -> (i32, i32) {
    %c0_i32 = arith.constant 0 : i32
    %c0_i32_0 = arith.constant 0 : i32
    return %arg0, %c0_i32 : i32, i32
  }
  func.func @transform_4(%arg0: i32, %arg1: i32) -> (i32, i32, i32) {
    %c0_i32 = arith.constant 0 : i32
    %c0_i32_0 = arith.constant 0 : i32
    %c0_i32_1 = arith.constant 0 : i32
    return %arg1, %c0_i32, %c0_i32_0 : i32, i32, i32
  }
  func.func @transform_5(%arg0: i32, %arg1: i32) -> (i32, i32, i32) {
    %c0_i32 = arith.constant 0 : i32
    %c0_i32_0 = arith.constant 0 : i32
    %c0_i32_1 = arith.constant 0 : i32
    return %arg1, %c0_i32, %c0_i32_0 : i32, i32, i32
  }
  func.func @transform_6(%arg0: i32, %arg1: i32) -> (i32, i32, i32) {
    %c0_i32 = arith.constant 0 : i32
    %c0_i32_0 = arith.constant 0 : i32
    %c0_i32_1 = arith.constant 0 : i32
    return %arg1, %c0_i32, %c0_i32_0 : i32, i32, i32
  }
  func.func @transform_7(%arg0: i32, %arg1: i32) -> (i32, i32, i32) {
    %c0_i32 = arith.constant 0 : i32
    %c0_i32_0 = arith.constant 0 : i32
    %c0_i32_1 = arith.constant 0 : i32
    return %arg1, %c0_i32, %c0_i32_0 : i32, i32, i32
  }
  func.func @transform_8(%arg0: i32, %arg1: i32) -> (i32, i32, i32) {
    %c0_i32 = arith.constant 0 : i32
    %c0_i32_0 = arith.constant 0 : i32
    %c0_i32_1 = arith.constant 0 : i32
    return %arg1, %c0_i32, %c0_i32_0 : i32, i32, i32
  }
  func.func @transform_9(%arg0: i32, %arg1: i32) -> (i32, i32, i32) {
    %c0_i32 = arith.constant 0 : i32
    %c0_i32_0 = arith.constant 0 : i32
    %c0_i32_1 = arith.constant 0 : i32
    return %arg1, %c0_i32, %c0_i32_0 : i32, i32, i32
  }
  func.func @transform_10(%arg0: i32, %arg1: i32) -> (i32, i32, i32) {
    %c0_i32 = arith.constant 0 : i32
    %c0_i32_0 = arith.constant 0 : i32
    %c0_i32_1 = arith.constant 0 : i32
    return %arg1, %c0_i32, %c0_i32_0 : i32, i32, i32
  }
  func.func @transform_11(%arg0: i32, %arg1: i32) -> (i32, i32, i32) {
    %c0_i32 = arith.constant 0 : i32
    %c0_i32_0 = arith.constant 0 : i32
    %c0_i32_1 = arith.constant 0 : i32
    return %arg1, %c0_i32, %c0_i32_0 : i32, i32, i32
  }
  func.func @transform_12(%arg0: i32, %arg1: i32) -> (i32, i32, i32) {
    %c0_i32 = arith.constant 0 : i32
    %c0_i32_0 = arith.constant 0 : i32
    %c0_i32_1 = arith.constant 0 : i32
    return %arg1, %c0_i32, %c0_i32_0 : i32, i32, i32
  }
  func.func @transform_13(%arg0: i32, %arg1: i32) -> (i32, i32, i32) {
    %c0_i32 = arith.constant 0 : i32
    %c0_i32_0 = arith.constant 0 : i32
    %c0_i32_1 = arith.constant 0 : i32
    return %arg1, %c0_i32, %c0_i32_0 : i32, i32, i32
  }
  func.func @transform_14(%arg0: i32, %arg1: i32) -> (i32, i32, i32) {
    %c0_i32 = arith.constant 0 : i32
    %c0_i32_0 = arith.constant 0 : i32
    %c0_i32_1 = arith.constant 0 : i32
    return %arg1, %c0_i32, %c0_i32_0 : i32, i32, i32
  }
  func.func @transform_15(%arg0: i32, %arg1: i32) -> (i32, i32, i32) {
    %c0_i32 = arith.constant 0 : i32
    %c0_i32_0 = arith.constant 0 : i32
    %c0_i32_1 = arith.constant 0 : i32
    return %arg1, %c0_i32, %c0_i32_0 : i32, i32, i32
  }
  func.func @transform_16(%arg0: i32, %arg1: i32) -> (i32, i32, i32) {
    %c0_i32 = arith.constant 0 : i32
    %c0_i32_0 = arith.constant 0 : i32
    %c0_i32_1 = arith.constant 0 : i32
    return %arg1, %c0_i32, %c0_i32_0 : i32, i32, i32
  }
  func.func @transform_17(%arg0: i32, %arg1: i32) -> (i32, i32, i32) {
    %c0_i32 = arith.constant 0 : i32
    %c0_i32_0 = arith.constant 0 : i32
    %c0_i32_1 = arith.constant 0 : i32
    return %arg1, %c0_i32, %c0_i32_0 : i32, i32, i32
  }
  func.func @transform_18(%arg0: i32, %arg1: i32) -> (i32, i32, i32) {
    %c0_i32 = arith.constant 0 : i32
    %c0_i32_0 = arith.constant 0 : i32
    %c0_i32_1 = arith.constant 0 : i32
    return %arg1, %c0_i32, %c0_i32_0 : i32, i32, i32
  }
  func.func @transform_19(%arg0: i32, %arg1: i32) -> (i32, i32, i32) {
    %c0_i32 = arith.constant 0 : i32
    %c0_i32_0 = arith.constant 0 : i32
    %c0_i32_1 = arith.constant 0 : i32
    return %arg1, %c0_i32, %c0_i32_0 : i32, i32, i32
  }
  func.func @transform_20(%arg0: i32, %arg1: i32) -> (i32, i32, i32) {
    %c0_i32 = arith.constant 0 : i32
    %c0_i32_0 = arith.constant 0 : i32
    %c0_i32_1 = arith.constant 0 : i32
    return %arg1, %c0_i32, %c0_i32_0 : i32, i32, i32
  }
  func.func @transform_21(%arg0: i32, %arg1: i32) -> (i32, i32, i32) {
    %c0_i32 = arith.constant 0 : i32
    %c0_i32_0 = arith.constant 0 : i32
    %c0_i32_1 = arith.constant 0 : i32
    return %arg1, %c0_i32, %c0_i32_0 : i32, i32, i32
  }
  func.func @transform_22(%arg0: i32, %arg1: i32) -> (i32, i32) {
    %c0_i32 = arith.constant 0 : i32
    %c0_i32_0 = arith.constant 0 : i32
    %c0_i32_1 = arith.constant 0 : i32
    return %c0_i32, %c0_i32_0 : i32, i32
  }
  func.func @transform_23(%arg0: i32, %arg1: i32) -> (i32, i32) {
    %c0_i32 = arith.constant 0 : i32
    %c0_i32_0 = arith.constant 0 : i32
    %c0_i32_1 = arith.constant 0 : i32
    return %c0_i32, %c0_i32_0 : i32, i32
  }
  func.func @transform_24(%arg0: i32, %arg1: i32) -> (i32, i32, i32) {
    %c0_i32 = arith.constant 0 : i32
    %c0_i32_0 = arith.constant 0 : i32
    %c0_i32_1 = arith.constant 0 : i32
    return %arg0, %c0_i32, %c0_i32_0 : i32, i32, i32
  }
  func.func @transform_25(%arg0: i32, %arg1: i32) -> (i32, i32, i32) {
    %c0_i32 = arith.constant 0 : i32
    %c0_i32_0 = arith.constant 0 : i32
    %c0_i32_1 = arith.constant 0 : i32
    return %arg0, %c0_i32, %c0_i32_0 : i32, i32, i32
  }
}

</mosaic_0001>

<bundles_post_ra>
// kernel: tpu_custom_call.1
= control target key start
LH: loop header
LB: loop body
LE: loop exit
PB: predicated region body
PF: predicated region fallthrough
CT: control target
= control target key end

     0   :  { %s7466_s0 = inlined_call_operand.hbm [shape: f32[2,8,32], index: 0, kind: input, shape index: {}]   ;;  %s7467_s1 = inlined_call_operand.vmem [shape: f32[2,12,32], index: 1, kind: input, shape index: {}]   ;;  %s7468_s2 = inlined_call_operand.hbm [shape: s32[2,8], index: 2, kind: input, shape index: {}]   ;;  %s7469_s3 = inlined_call_operand.hbm [shape: s32[2,12], index: 3, kind: input, shape index: {}]   ;;  %s7470_s4 = inlined_call_operand.hbm [shape: f32[2,1,32], index: 4, kind: input, shape index: {}]   ;;  %s7471_s5 = inlined_call_operand.hbm [shape: f32[2,1,32], index: 5, kind: input, shape index: {}]   ;;  %s7472_s6 = inlined_call_operand.vmem [shape: bf16[2,32,32], index: 6, kind: input, shape index: {}]   ;;  %s7473_s7 = inlined_call_operand.vmem [shape: bf16[2,32,32], index: 7, kind: input, shape index: {}]   ;;  %s7474_s8 = inlined_call_operand.vmem [shape: bf16[2,32,32], index: 8, kind: input, shape index: {}]   ;;  %s7475_s9 = inlined_call_operand.vmem [shape: bf16[2,32,32], index: 9, kind: input, shape index: {}]   ;;  %s7476_s10 = inlined_call_operand.hbm [shape: f32[2,1,32], index: 10, kind: input, shape index: {}]   ;;  %s7477_s11 = inlined_call_operand.hbm [shape: f32[2,1,32], index: 11, kind: input, shape index: {}]   ;;  %s7478_s12 = inlined_call_operand.vmem [shape: bf16[2,32,32], index: 12, kind: input, shape index: {}]   ;;  %s7479_s13 = inlined_call_operand.hbm [shape: bf16[2,32,32], index: 13, kind: input, shape index: {}]   ;;  %s7480_s14 = inlined_call_operand.hbm [shape: bf16[2,32,32], index: 14, kind: input, shape index: {}]   ;;  %s7481_s15 = inlined_call_operand.hbm [shape: bf16[2,32,32], index: 15, kind: input, shape index: {}]   ;;  %s7482_s16 = inlined_call_operand.vmem [shape: f32[2,1,32], index: 16, kind: input, shape index: {}]   ;;  %s7483_s17 = inlined_call_operand.vmem [shape: f32[2,1,32], index: 17, kind: input, shape index: {}]   ;;  %s7484_s18 = inlined_call_operand.hbm [shape: bf16[2,32,64], index: 18, kind: input, shape index: {}]   ;;  %s7485_s19 = inlined_call_operand.vmem [shape: f32[2,1,64], index: 19, kind: input, shape index: {}]   ;;  %s7486_s20 = inlined_call_operand.vmem [shape: bf16[2,64,32], index: 20, kind: input, shape index: {}]   ;;  %s7487_s21 = inlined_call_operand.vmem [shape: f32[2,1,32], index: 21, kind: input, shape index: {}]   ;;  %s7488_s22 = inlined_call_operand.vmem [shape: f32[1,32], index: 22, kind: input, shape index: {}]   ;;  %s7489_s23 = inlined_call_operand.vmem [shape: f32[1,32], index: 23, kind: input, shape index: {}]   ;;  %s7490_s24 = inlined_call_operand.hbm [shape: f32[2,8,32], index: 24, kind: output, shape index: {0}]   ;;  %s7491_s25 = inlined_call_operand.hbm [shape: f32[2,8,12], index: 25, kind: output, shape index: {1}]  }
   0x1   :  { %7539 = sst [smem:[#allocation42_spill]] %s7466_s0 }
   0x2   :  { %7540 = sst [smem:[#allocation43_spill]] %s7467_s1 }
   0x3   :  { %7541 = sst [smem:[#allocation44_spill]] %s7468_s2 }
   0x4   :  { %7542 = sst [smem:[#allocation45_spill]] %s7469_s3 }
   0x5   :  { %7543 = sst [smem:[#allocation46_spill]] %s7470_s4 }
   0x6   :  { %7544 = sst [smem:[#allocation47_spill]] %s7471_s5 }
   0x7   :  { %7545 = sst [smem:[#allocation48_spill]] %s7472_s6 }
   0x8   :  { %7546 = sst [smem:[#allocation49_spill]] %s7473_s7 }
   0x9   :  { %7547 = sst [smem:[#allocation50_spill]] %s7474_s8 }
   0xa   :  { %7548 = sst [smem:[#allocation51_spill]] %s7475_s9 }
   0xb   :  { %7549 = sst [smem:[#allocation52_spill]] %s7476_s10 }
   0xc   :  { %7550 = sst [smem:[#allocation53_spill]] %s7477_s11 }
   0xd   :  { %7551 = sst [smem:[#allocation54_spill]] %s7478_s12 }
   0xe   :  { %7552 = sst [smem:[#allocation55_spill]] %s7479_s13 }
   0xf   :  { %7553 = sst [smem:[#allocation56_spill]] %s7480_s14 }
  0x10   :  { %7554 = sst [smem:[#allocation57_spill]] %s7481_s15 }
  0x11   :  { %7555 = sst [smem:[#allocation58_spill]] %s7482_s16 }
  0x12   :  { %7556 = sst [smem:[#allocation59_spill]] %s7483_s17 }
  0x13   :  { %7557 = sst [smem:[#allocation60_spill]] %s7484_s18 }
  0x14   :  { %7558 = sst [smem:[#allocation61_spill]] %s7485_s19 }
  0x15   :  { %7559 = sst [smem:[#allocation62_spill]] %s7486_s20 }
  0x16   :  { %7560 = sst [smem:[#allocation63_spill]] %s7487_s21 }
  0x17   :  { %7561 = sst [smem:[#allocation64_spill]] %s7488_s22 }
  0x18   :  { %7562 = sst [smem:[#allocation65_spill]] %s7489_s23 }
  0x19   :  { %7563 = sst [smem:[#allocation66_spill]] %s7490_s24 }
  0x1a   :  { %7564 = sst [smem:[#allocation67_spill]] %s7491_s25 }
  0x1b   :  { %31 = vsyncpa [#allocation4], 0 }
  0x1c   :  { %32 = vsyncpa [#allocation7], 0 }
  0x1d   :  { %33 = vsyncpa [#allocation10], 0 }
  0x1e   :  { %35 = vsyncpa [#allocation10 + $0x1], 0 }
  0x1f   :  { %36 = vsyncpa [#allocation13], 0 }
  0x20   :  { %38 = vsyncpa [#allocation13 + $0x1], 0 }
  0x21   :  { %39 = vsyncpa [#allocation16], 0 }
  0x22   :  { %41 = vsyncpa [#allocation16 + $0x1], 0 }
  0x23   :  { %42 = vsyncpa [#allocation19], 0 }
  0x24   :  { %44 = vsyncpa [#allocation19 + $0x1], 0 }
  0x25   :  { %45 = vsyncpa [#allocation5], 0 }
  0x26   :  { %46 = vsyncpa [#allocation23], 0  ;;  %s6198_s29 = smov 0   ;;  %s6200_s2 = smov 0  }
  0x27   :  { %s6202_s6 = smov 0   ;;  %s6204_s30 = smov 0  }
  0x28   :  { %s6206_s7 = smov 0   ;;  %s6208_s3 = smov 0  }
  0x29 LB: > { %7565 = sst [smem:[#allocation32_spill]] %s6021_s2  ;;  %s6227_s26 = sadd.s32 4294967295, %s6037_s3   ;;  %s6037_s3 = sphi %s6208_s3, %s52_s3   ;;  %s6033_s7 = sphi %s6206_s7, %s7658_s7   ;;  %s6029_s30 = sphi %s6204_s30, %s7657_s30   ;;  %s6025_s6 = sphi %s6202_s6, %s7656_s6   ;;  %s6021_s2 = sphi %s6200_s2, %s7655_s2   ;;  %s6017_s29 = sphi %s6198_s29, %s7654_s29  }
  0x2a   : > { %7566 = sst [smem:[#allocation33_spill]] %s6025_s6  ;;  %p188_p0 = scmp.ne.s32.totalorder %s6021_s2, %s6017_s29 }
  0x2b   : > { %7567 = sst [smem:[#allocation34_spill]] %s6029_s30  ;;  %p7500_p1 = scmp.eq.s32.totalorder %s6227_s26, 0 }
  0x2c   : > { %7568 = sst [smem:[#allocation35_spill]] %s6033_s7  ;;  %p4765_p2 = scmp.ge.s32.totalorder %s6037_s3, 1 }
  0x2d   : > { %7569 = sst [smem:[#allocation36_spill]] %s6037_s3  ;;  %p735_p3 = scmp.lt.s32.totalorder %s6037_s3, 3 }
  0x2e   : > { %7570 = sst [smem:[#allocation37_spill]] %s6227_s26  ;;  %p6235_p4 = por %p7500_p1, %p188_p0 }
  0x2f   : > { %p6239_p5 = pnand %p4765_p2, %p735_p3  ;;  %s6039_s27 = smov [#allocation6]  }
  0x30   : > { %s7571_s1 = scalar_select %p6235_p4, 1, 0 }
  0x31   : > { %s7573_s8 = scalar_select %p6239_p5, 1, 0 }
  0x32   : > { %7572 = sst [smem:[#allocation38_spill]] %s7571_s1  ;;  %s776_s4 = sshll.u32 %s6039_s27, 4  ;;  %s777_s4 = int_to_ptr.vmem [resolvable:$true] %s776_s4 }
  0x33   : > { %7574 = sst [smem:[#allocation39_spill]] %s7573_s8  ;;  %p5319_p6 = pneg %p6239_p5 }
  0x34   : > { %s61_s9 = sadd.s32 1, %s6033_s7  ;;  %s7577_s24 = sld [smem:[#allocation44_spill]] }
  0x35   : > { %p6247_p7 = pnand %p5319_p6, %p7500_p1  ;;  %p6253_p8 = scmp.ge.s32.totalorder %s61_s9, 2 }
  0x37   : > { %s7575_s28 = scalar_select %p6247_p7, 1, 0 }
  0x38   : > { %s7576_s0 = scalar_select %p6253_p8, 1, 0 }
  0x39   : > { %p6265_p10 = pneg %p6247_p7 }
  0x3a   : > { %s5583_s23 = scalar_lea.hbm %s7577_s24, 32 }
  0x3b   : > { %p5584_p9 = scmp.ne.s32.totalorder %s7577_s24, %s5583_s23  ;;  %p5590_p13 = scmp.lt.u32.totalorder %s5583_s23, %s7577_s24 }
  0x3c   : > { %s7578_s21 = scalar_select %p6265_p10, 1, 0 }
  0x3d   : > { %p5586_p11 = pnand %p6265_p10, %p5584_p9 }
  0x3f   : > { %p5587_p12 = pneg %p5586_p11 }
  0x41   : > { %p5592_p0 = pnand %p5590_p13, %p5587_p12 }
  0x43   : > { %5595 = shalt.err (!%p5592_p0)
}
  0x44   : > { %s5596_s25 = scalar_lea.vmem %s777_s4, 32  ;;  %p5604_p1 = scmp.lt.s32.totalorder %s777_s4, %s777_s4 }
  0x45   : > { %p5597_p2 = scmp.ne.s32.totalorder %s777_s4, %s5596_s25  ;;  %p5605_p4 = scmp.lt.s32.totalorder %s5596_s25, %s5596_s25 }
  0x47   : > { %p5599_p3 = pnand %p5597_p2, %p6265_p10  ;;  %p5606_p5 = por %p5605_p4, %p5604_p1 }
  0x49   : > { %p5600_p6 = pneg %p5599_p3 }
  0x4b   : > { %p5607_p8 = pnand %p5606_p5, %p5600_p6 }
  0x4d   : > { %5610 = shalt.err (!%p5607_p8)
}
  0x4e   : > { %5325 = dma.hbm_to_vmem [thread:$0]  (!%p6247_p7), %s7577_s24, 32, %s777_s4, [#allocation7]  }
  0x4f   : > { %p7579_p1 = scmp.ne.s32.totalorder %s7576_s0, 0  ;;  %p182_p4 = scmp.ne.s32.totalorder %s6025_s6, %s6021_s2 }
  0x50   : > { %p183_p5 = scmp.eq.s32.totalorder %s6037_s3, 0  ;;  %p5357_p8 = scmp.lt.s32.totalorder %s6037_s3, 2 }
  0x51   : > { %s7660_s9 = smov (%p7579_p1, %s61_s9), 0  ;;  %s6292_s23 = sand.u32 1, %s6037_s3  }
  0x52   : > { %7580 = sst [smem:[#allocation40_spill]] %s7660_s9  ;;  %s172_s20 = ssub.s32 %s6033_s7, %s7660_s9 }
  0x53   : > { %p173_p9 = scmp.eq.s32.totalorder %s172_s20, 0  ;;  %p184_p11 = por %p183_p5, %p182_p4 }
  0x54   : > { %s6295_s5 = sand.u32 1, %s6025_s6   ;;  %s7581_s27 = sadd.s32 1, %s6025_s6 }
  0x55   : > { %s6300_s25 = scalar_select %p173_p9, %s6025_s6, %s7581_s27  }
  0x56   : > { %s6303_s4 = sshll.u32 %s6033_s7, 4  ;;  %s809_s0 = scalar_lea.vmem [#allocation9], %s6295_s5 }
  0x57   : > { %7582 = sst [smem:[#allocation41_spill]] %s6300_s25  ;;  %s816_s22 = sshll.u32 %s809_s0, 4  ;;  %s6312_s22 = int_to_ptr.vmem [resolvable:$true] %s816_s22 }
  0x58   : > { %s7583_s20 = sld [smem:[#allocation46_spill]]  ;;  %p6314_p12 = pnand %p5357_p8, %p184_p11 }
  0x59   : > { %s7585_s10 = sld [smem:[#allocation52_spill]]  ;;  %s875_s3 = scalar_lea.vmem [#allocation12], %s6295_s5 }
  0x5a   : > { %s7584_s27 = scalar_select %p6314_p12, 1, 0 }
  0x5b   : > { %s6325_s24 = sshll.u32 %s875_s3, 4  ;;  %s7512_s29 = scalar_lea.sflag [#allocation10], %s6292_s23  ;;  %s883_s24 = int_to_ptr.vmem [resolvable:$true] %s6325_s24 }
  0x5c   : > { %p6332_p0 = pneg %p6314_p12 }
  0x5e   : > { %s6310_s9 = scalar_lea.hbm %s7583_s20, %s6303_s4  ;;  %s5616_s25 = scalar_lea.hbm %s7583_s20, 32 }
  0x5f   : > { %s6322_s0 = scalar_lea.hbm %s7585_s10, %s6303_s4  ;;  %s5611_s19 = scalar_lea.hbm %s6310_s9, 16 }
  0x60   : > { %p5612_p13 = scmp.ne.s32.totalorder %s6310_s9, %s5611_s19  ;;  %p5617_p6 = scmp.lt.u32.totalorder %s6310_s9, %s7583_s20 }
  0x61   : > { %s7586_s17 = scalar_select %p6332_p0, 1, 0 }
  0x62   : > { %p5614_p2 = pnand %p6332_p0, %p5612_p13  ;;  %p5618_p1 = scmp.lt.u32.totalorder %s5616_s25, %s5611_s19 }
  0x63   : > { %p5620_p5 = scmp.lt.u32.totalorder %s5611_s19, %s6310_s9 }
  0x64   : > { %p5615_p3 = pneg %p5614_p2  ;;  %p5619_p4 = por %p5618_p1, %p5617_p6 }
  0x66   : > { %p5621_p8 = por %p5620_p5, %p5619_p4 }
  0x68   : > { %p5622_p9 = pnand %p5621_p8, %p5615_p3 }
  0x6a   : > { %5625 = shalt.err (!%p5622_p9)
}
  0x6b   : > { %s5626_s3 = scalar_lea.vmem %s6312_s22, 16  ;;  %s6040_s12 = smov [#allocation9]  }
  0x6c   : > { %p5627_p11 = scmp.ne.s32.totalorder %s6312_s22, %s5626_s3  ;;  %s5631_s6 = sshll.u32 %s6040_s12, 4  ;;  %s5632_s6 = int_to_ptr.vmem [resolvable:$false] %s5631_s6 }
  0x6d   : > { %s5633_s16 = scalar_lea.vmem %s5632_s6, 32  ;;  %p5634_p7 = scmp.lt.s32.totalorder %s6312_s22, %s5632_s6 }
  0x6e   : > { %p5629_p13 = pnand %p5627_p11, %p6332_p0  ;;  %p5635_p10 = scmp.lt.s32.totalorder %s5633_s16, %s5626_s3 }
  0x70   : > { %p5630_p2 = pneg %p5629_p13  ;;  %p5636_p6 = por %p5635_p10, %p5634_p7 }
  0x72   : > { %p5637_p1 = pnand %p5636_p6, %p5630_p2 }
  0x74   : > { %5640 = shalt.err (!%p5637_p1)
}
  0x75   : > { %5332 = dma.hbm_to_vmem [thread:$0]  (!%p6314_p12), %s6310_s9, 16, %s6312_s22, %s7512_s29  }
  0x76   : > { %s7515_s19 = scalar_lea.sflag [#allocation13], %s6292_s23  ;;  %s5641_s30 = scalar_lea.hbm %s6322_s0, 16 }
  0x77   : > { %p5642_p7 = scmp.ne.s32.totalorder %s6322_s0, %s5641_s30  ;;  %s5646_s12 = scalar_lea.hbm %s7585_s10, 32 }
  0x78   : > { %p5647_p4 = scmp.lt.u32.totalorder %s6322_s0, %s7585_s10  ;;  %p5648_p5 = scmp.lt.u32.totalorder %s5646_s12, %s5641_s30 }
  0x79   : > { %p5644_p10 = pnand %p5642_p7, %p6332_p0  ;;  %p5650_p9 = scmp.lt.u32.totalorder %s5641_s30, %s6322_s0 }
  0x7a   : > { %p5649_p8 = por %p5648_p5, %p5647_p4 }
  0x7b   : > { %p5645_p3 = pneg %p5644_p10 }
  0x7c   : > { %p5651_p11 = por %p5650_p9, %p5649_p8 }
  0x7e   : > { %p5652_p13 = pnand %p5651_p11, %p5645_p3 }
  0x80   : > { %5655 = shalt.err (!%p5652_p13)
}
  0x81   : > { %s5656_s9 = scalar_lea.vmem %s883_s24, 16  ;;  %s6041_s22 = smov [#allocation12]  }
  0x82   : > { %p5657_p2 = scmp.ne.s32.totalorder %s883_s24, %s5656_s9  ;;  %s5661_s29 = sshll.u32 %s6041_s22, 4  ;;  %s5662_s29 = int_to_ptr.vmem [resolvable:$false] %s5661_s29 }
  0x83   : > { %s5663_s25 = scalar_lea.vmem %s5662_s29, 32  ;;  %p5664_p7 = scmp.lt.s32.totalorder %s883_s24, %s5662_s29 }
  0x84   : > { %p5659_p6 = pnand %p5657_p2, %p6332_p0  ;;  %p5665_p10 = scmp.lt.s32.totalorder %s5663_s25, %s5656_s9 }
  0x86   : > { %p5660_p1 = pneg %p5659_p6  ;;  %p5666_p12 = por %p5665_p10, %p5664_p7 }
  0x88   : > { %p5667_p4 = pnand %p5666_p12, %p5660_p1 }
  0x8a   : > { %5670 = shalt.err (!%p5667_p4)
}
  0x8b   : > { %p7587_p5 = scmp.ne.s32.totalorder %s7584_s27, 0  ;;  %s6379_s30 = sshll.u32 %s6295_s5, 4 }
  0x8c   : > { %s6382_s3 = sshll.u32 %s6033_s7, 8  ;;  %s7588_s13 = sld [smem:[#allocation55_spill]] }
  0x8d   : > { %5338 = dma.hbm_to_vmem [thread:$0]  (!%p7587_p5), %s6322_s0, 16, %s883_s24, %s7515_s19  }
  0x8e   : > { %s918_s16 = scalar_lea.vmem [#allocation15], %s6379_s30  ;;  %s7516_s0 = scalar_lea.sflag [#allocation16], %s6292_s23 }
  0x8f   : > { %s925_s9 = sshll.u32 %s918_s16, 4  ;;  %s6391_s9 = int_to_ptr.vmem [resolvable:$true] %s925_s9 }
  0x92   : > { %s6388_s6 = scalar_lea.hbm %s7588_s13, %s6382_s3  ;;  %s5676_s29 = scalar_lea.hbm %s7588_s13, 512 }
  0x93   : > { %s5671_s24 = scalar_lea.hbm %s6388_s6, 256  ;;  %p5677_p9 = scmp.lt.u32.totalorder %s6388_s6, %s7588_s13 }
  0x94   : > { %p5672_p12 = scmp.ne.s32.totalorder %s6388_s6, %s5671_s24  ;;  %p5678_p11 = scmp.lt.u32.totalorder %s5676_s29, %s5671_s24 }
  0x95   : > { %p5680_p2 = scmp.lt.u32.totalorder %s5671_s24, %s6388_s6 }
  0x96   : > { %p5674_p3 = pnand %p5672_p12, %p6332_p0  ;;  %p5679_p13 = por %p5678_p11, %p5677_p9 }
  0x98   : > { %p5675_p8 = pneg %p5674_p3  ;;  %p5681_p6 = por %p5680_p2, %p5679_p13 }
  0x9a   : > { %p5682_p1 = pnand %p5681_p6, %p5675_p8 }
  0x9c   : > { %5685 = shalt.err (!%p5682_p1)
}
  0x9d   : > { %s5686_s16 = scalar_lea.vmem %s6391_s9, 256  ;;  %s6042_s22 = smov [#allocation15]  }
  0x9e   : > { %p5687_p7 = scmp.ne.s32.totalorder %s6391_s9, %s5686_s16  ;;  %s5691_s25 = sshll.u32 %s6042_s22, 4  ;;  %s5692_s25 = int_to_ptr.vmem [resolvable:$false] %s5691_s25 }
  0x9f   : > { %s5693_s19 = scalar_lea.vmem %s5692_s25, 512  ;;  %p5694_p12 = scmp.lt.s32.totalorder %s6391_s9, %s5692_s25 }
  0xa0   : > { %p5689_p10 = pnand %p5687_p7, %p6332_p0  ;;  %p5695_p3 = scmp.lt.s32.totalorder %s5693_s19, %s5686_s16 }
  0xa2   : > { %p5690_p4 = pneg %p5689_p10  ;;  %p5696_p9 = por %p5695_p3, %p5694_p12 }
  0xa4   : > { %p5697_p11 = pnand %p5696_p9, %p5690_p4 }
  0xa6   : > { %5700 = shalt.err (!%p5697_p11)
}
  0xa7   : > { %s7521_s24 = smov 64   ;;  %s7523_s29 = smov 4  }
  0xa8   : > { %5344 = dma.hbm_to_vmem [thread:$0]  (!%p7587_p5), %s6388_s6, 256, %s6391_s9, %s7516_s0, %s7521_s24, %s7521_s24, %s7523_s29  }
  0xa9   : > { %s7589_s15 = sld [smem:[#allocation57_spill]]  ;;  %s960_s25 = scalar_lea.vmem [#allocation18], %s6379_s30 }
  0xaa   : > { %s967_s19 = sshll.u32 %s960_s25, 4  ;;  %s7520_s10 = scalar_lea.sflag [#allocation19], %s6292_s23  ;;  %s6427_s19 = int_to_ptr.vmem [resolvable:$true] %s967_s19 }
  0xaf   : > { %s6424_s22 = scalar_lea.hbm %s7589_s15, %s6382_s3  ;;  %s5706_s12 = scalar_lea.hbm %s7589_s15, 512 }
  0xb0   : > { %s5701_s13 = scalar_lea.hbm %s6424_s22, 256  ;;  %p5707_p6 = scmp.lt.u32.totalorder %s6424_s22, %s7589_s15 }
  0xb1   : > { %p5702_p8 = scmp.ne.s32.totalorder %s6424_s22, %s5701_s13  ;;  %p5708_p1 = scmp.lt.u32.totalorder %s5706_s12, %s5701_s13 }
  0xb2   : > { %p5710_p10 = scmp.lt.u32.totalorder %s5701_s13, %s6424_s22 }
  0xb3   : > { %p5704_p13 = pnand %p5702_p8, %p6332_p0  ;;  %p5709_p7 = por %p5708_p1, %p5707_p6 }
  0xb5   : > { %p5705_p2 = pneg %p5704_p13  ;;  %p5711_p4 = por %p5710_p10, %p5709_p7 }
  0xb7   : > { %p5712_p12 = pnand %p5711_p4, %p5705_p2 }
  0xb9   : > { %5715 = shalt.err (!%p5712_p12)
}
  0xba   : > { %s5716_s25 = scalar_lea.vmem %s6427_s19, 256  ;;  %s6045_s6 = smov [#allocation18]  }
  0xbb   : > { %p5717_p3 = scmp.ne.s32.totalorder %s6427_s19, %s5716_s25  ;;  %s5721_s9 = sshll.u32 %s6045_s6, 4  ;;  %s5722_s9 = int_to_ptr.vmem [resolvable:$false] %s5721_s9 }
  0xbc   : > { %s5723_s0 = scalar_lea.vmem %s5722_s9, 512  ;;  %p5724_p8 = scmp.lt.s32.totalorder %s6427_s19, %s5722_s9 }
  0xbd   : > { %p5719_p9 = pnand %p5717_p3, %p6332_p0  ;;  %p5725_p13 = scmp.lt.s32.totalorder %s5723_s0, %s5716_s25 }
  0xbf   : > { %p5720_p11 = pneg %p5719_p9  ;;  %p5726_p6 = por %p5725_p13, %p5724_p8 }
  0xc1   : > { %p5727_p1 = pnand %p5726_p6, %p5720_p11 }
  0xc3   : > { %5730 = shalt.err (!%p5727_p1)
}
  0xc4   : > { %5350 = dma.hbm_to_vmem [thread:$0]  (!%p7587_p5), %s6424_s22, 256, %s6427_s19, %s7520_s10, %s7521_s24, %s7521_s24, %s7523_s29  }
  0xc5   : > { %s6046_s13 = smov [#allocation3]   ;;  %s7590_s25 = sld [smem:[#allocation42_spill]] }
  0xc6   : > { %s750_s12 = sshll.u32 %s6046_s13, 4  ;;  %p7591_p7 = scmp.ne.s32.totalorder %s7578_s21, 0  ;;  %s751_s12 = int_to_ptr.vmem [resolvable:$true] %s750_s12 }
  0xcb   : > { %s5731_s9 = scalar_lea.hbm %s7590_s25, 256 }
  0xcc   : > { %p5732_p2 = scmp.ne.s32.totalorder %s7590_s25, %s5731_s9  ;;  %p5738_p12 = scmp.lt.u32.totalorder %s5731_s9, %s7590_s25 }
  0xce   : > { %p5734_p10 = pnand %p5732_p2, %p7591_p7 }
  0xd0   : > { %p5735_p4 = pneg %p5734_p10 }
  0xd2   : > { %p5740_p3 = pnand %p5738_p12, %p5735_p4 }
  0xd4   : > { %5743 = shalt.err (!%p5740_p3)
}
  0xd5   : > { %s5744_s22 = scalar_lea.vmem %s751_s12, 256  ;;  %p5752_p13 = scmp.lt.s32.totalorder %s751_s12, %s751_s12 }
  0xd6   : > { %p5745_p9 = scmp.ne.s32.totalorder %s751_s12, %s5744_s22  ;;  %p5753_p6 = scmp.lt.s32.totalorder %s5744_s22, %s5744_s22 }
  0xd8   : > { %p5747_p11 = pnand %p5745_p9, %p7591_p7  ;;  %p5754_p1 = por %p5753_p6, %p5752_p13 }
  0xda   : > { %p5748_p8 = pneg %p5747_p11 }
  0xdc   : > { %p5755_p5 = pnand %p5754_p1, %p5748_p8 }
  0xde   : > { %5758 = shalt.err (!%p5755_p5)
}
  0xdf   : > { %s6047_s15 = smov 128   ;;  %s6048_s7 = smov 8  }
  0xe0   : > { %p7592_p2 = scmp.ne.s32.totalorder %s7575_s28, 0  ;;  %s6049_s13 = smov [#allocation8]  }
  0xe1   : > { %s789_s16 = sshll.u32 %s6049_s13, 4  ;;  %s7593_s0 = sld [smem:[#allocation47_spill]]  ;;  %s790_s16 = int_to_ptr.vmem [resolvable:$true] %s789_s16 }
  0xe2   : > { %5322 = dma.hbm_to_vmem [thread:$0]  (!%p7592_p2), %s7590_s25, 256, %s751_s12, [#allocation4], %s6047_s15, %s6047_s15, %s6048_s7  }
  0xe3   : > { %s826_s10 = scalar_lea.vmem [#allocation11], %s6295_s5  ;;  %s7594_s2 = sld [smem:[#allocation45_spill]] }
  0xe4   : > { %s833_s24 = sshll.u32 %s826_s10, 4  ;;  %s834_s24 = int_to_ptr.vmem [resolvable:$true] %s833_s24 }
  0xe7   : > { %s6478_s22 = scalar_lea.hbm %s7593_s0, %s6303_s4 }
  0xe9   : > { %s7595_s26 = smov %s7594_s2  ;;  %s5759_s8 = scalar_lea.hbm %s7594_s2, 32 }
  0xea   : > { %p5760_p5 = scmp.ne.s32.totalorder %s7595_s26, %s5759_s8  ;;  %p5766_p12 = scmp.lt.u32.totalorder %s5759_s8, %s7595_s26 }
  0xec   : > { %p5762_p10 = pnand %p5760_p5, %p7591_p7 }
  0xee   : > { %p5763_p4 = pneg %p5762_p10 }
  0xf0   : > { %p5768_p3 = pnand %p5766_p12, %p5763_p4 }
  0xf2   : > { %5771 = shalt.err (!%p5768_p3)
}
  0xf3   : > { %s5772_s7 = scalar_lea.vmem %s790_s16, 32  ;;  %p5780_p13 = scmp.lt.s32.totalorder %s790_s16, %s790_s16 }
  0xf4   : > { %p5773_p9 = scmp.ne.s32.totalorder %s790_s16, %s5772_s7  ;;  %p5781_p6 = scmp.lt.s32.totalorder %s5772_s7, %s5772_s7 }
  0xf6   : > { %p5775_p11 = pnand %p5773_p9, %p7591_p7  ;;  %p5782_p1 = por %p5781_p6, %p5780_p13 }
  0xf8   : > { %p5776_p8 = pneg %p5775_p11 }
  0xfa   : > { %p5783_p0 = pnand %p5782_p1, %p5776_p8 }
  0xfc   : > { %5786 = shalt.err (!%p5783_p0)
}
  0xfd   : > { %5328 = dma.hbm_to_vmem [thread:$0]  (!%p7592_p2), %s7595_s26, 32, %s790_s16, [#allocation7]  }
  0xfe   : > { %s5787_s18 = scalar_lea.hbm %s6478_s22, 16  ;;  %p7596_p5 = scmp.ne.s32.totalorder %s7586_s17, 0 }
  0xff   : > { %p5788_p7 = scmp.ne.s32.totalorder %s6478_s22, %s5787_s18  ;;  %s5792_s1 = scalar_lea.hbm %s7593_s0, 32 }
 0x100   : > { %p5793_p0 = scmp.lt.u32.totalorder %s6478_s22, %s7593_s0  ;;  %p5794_p12 = scmp.lt.u32.totalorder %s5792_s1, %s5787_s18 }
 0x101   : > { %p5790_p10 = pnand %p5788_p7, %p7596_p5  ;;  %p5796_p9 = scmp.lt.u32.totalorder %s5787_s18, %s6478_s22 }
 0x102   : > { %p5795_p3 = por %p5794_p12, %p5793_p0 }
 0x103   : > { %p5791_p4 = pneg %p5790_p10 }
 0x104   : > { %p5797_p11 = por %p5796_p9, %p5795_p3 }
 0x106   : > { %p5798_p8 = pnand %p5797_p11, %p5791_p4 }
 0x108   : > { %5801 = shalt.err (!%p5798_p8)
}
 0x109   : > { %s5802_s29 = scalar_lea.vmem %s834_s24, 16  ;;  %s6050_s20 = smov [#allocation11]  }
 0x10a   : > { %p5803_p2 = scmp.ne.s32.totalorder %s834_s24, %s5802_s29  ;;  %s5807_s19 = sshll.u32 %s6050_s20, 4  ;;  %s5808_s19 = int_to_ptr.vmem [resolvable:$false] %s5807_s19 }
 0x10b   : > { %s5809_s13 = scalar_lea.vmem %s5808_s19, 32  ;;  %p5810_p1 = scmp.lt.s32.totalorder %s834_s24, %s5808_s19 }
 0x10c   : > { %p5805_p13 = pnand %p5803_p2, %p7596_p5  ;;  %p5811_p7 = scmp.lt.s32.totalorder %s5809_s13, %s5802_s29 }
 0x10e   : > { %p5806_p6 = pneg %p5805_p13  ;;  %p5812_p10 = por %p5811_p7, %p5810_p1 }
 0x110   : > { %p5813_p0 = pnand %p5812_p10, %p5806_p6 }
 0x112   : > { %5816 = shalt.err (!%p5813_p0)
}
 0x113   : > { %p7597_p12 = scmp.ne.s32.totalorder %s7584_s27, 0  ;;  %s7598_s16 = scalar_lea.sflag [#allocation10], %s6292_s23 }
 0x114   : > { %s7599_s11 = sld [smem:[#allocation53_spill]]  ;;  %s892_s15 = scalar_lea.vmem [#allocation14], %s6295_s5 }
 0x115   : > { %5335 = dma.hbm_to_vmem [thread:$0]  (!%p7597_p12), %s6478_s22, 16, %s834_s24, %s7598_s16  }
 0x116   : > { %s899_s7 = sshll.u32 %s892_s15, 4  ;;  %s900_s7 = int_to_ptr.vmem [resolvable:$true] %s899_s7 }
 0x11a   : > { %s6522_s12 = scalar_lea.hbm %s7599_s11, %s6303_s4  ;;  %s5822_s24 = scalar_lea.hbm %s7599_s11, 32 }
 0x11b   : > { %s5817_s10 = scalar_lea.hbm %s6522_s12, 16  ;;  %p5823_p11 = scmp.lt.u32.totalorder %s6522_s12, %s7599_s11 }
 0x11c   : > { %p5818_p4 = scmp.ne.s32.totalorder %s6522_s12, %s5817_s10  ;;  %p5824_p8 = scmp.lt.u32.totalorder %s5822_s24, %s5817_s10 }
 0x11d   : > { %p5826_p13 = scmp.lt.u32.totalorder %s5817_s10, %s6522_s12 }
 0x11e   : > { %p5820_p3 = pnand %p5818_p4, %p7596_p5  ;;  %p5825_p2 = por %p5824_p8, %p5823_p11 }
 0x120   : > { %p5821_p9 = pneg %p5820_p3  ;;  %p5827_p6 = por %p5826_p13, %p5825_p2 }
 0x122   : > { %p5828_p1 = pnand %p5827_p6, %p5821_p9 }
 0x124   : > { %5831 = shalt.err (!%p5828_p1)
}
 0x125   : > { %s5832_s5 = scalar_lea.vmem %s900_s7, 16  ;;  %s6051_s4 = smov [#allocation14]  }
 0x126   : > { %p5833_p7 = scmp.ne.s32.totalorder %s900_s7, %s5832_s5  ;;  %s5837_s2 = sshll.u32 %s6051_s4, 4  ;;  %s5838_s2 = int_to_ptr.vmem [resolvable:$false] %s5837_s2 }
 0x127   : > { %s5839_s1 = scalar_lea.vmem %s5838_s2, 32  ;;  %p5840_p4 = scmp.lt.s32.totalorder %s900_s7, %s5838_s2 }
 0x128   : > { %p5835_p10 = pnand %p5833_p7, %p7596_p5  ;;  %p5841_p3 = scmp.lt.s32.totalorder %s5839_s1, %s5832_s5 }
 0x12a   : > { %p5836_p0 = pneg %p5835_p10  ;;  %p5842_p12 = por %p5841_p3, %p5840_p4 }
 0x12c   : > { %p5843_p8 = pnand %p5842_p12, %p5836_p0 }
 0x12e   : > { %5846 = shalt.err (!%p5843_p8)
}
 0x12f   : > { %p7600_p11 = scmp.ne.s32.totalorder %s7584_s27, 0  ;;  %s7601_s8 = scalar_lea.sflag [#allocation13], %s6292_s23 }
 0x130   : > { %s7602_s20 = sld [smem:[#allocation56_spill]]  ;;  %s939_s13 = scalar_lea.vmem [#allocation17], %s6379_s30 }
 0x131   : > { %5341 = dma.hbm_to_vmem [thread:$0]  (!%p7600_p11), %s6522_s12, 16, %s900_s7, %s7601_s8  }
 0x132   : > { %s946_s16 = sshll.u32 %s939_s13, 4  ;;  %s6551_s16 = int_to_ptr.vmem [resolvable:$true] %s946_s16 }
 0x136   : > { %s6548_s19 = scalar_lea.hbm %s7602_s20, %s6382_s3  ;;  %s5852_s15 = scalar_lea.hbm %s7602_s20, 512 }
 0x137   : > { %s5847_s6 = scalar_lea.hbm %s6548_s19, 256  ;;  %p5853_p13 = scmp.lt.u32.totalorder %s6548_s19, %s7602_s20 }
 0x138   : > { %p5848_p12 = scmp.ne.s32.totalorder %s6548_s19, %s5847_s6  ;;  %p5854_p6 = scmp.lt.u32.totalorder %s5852_s15, %s5847_s6 }
 0x139   : > { %p5856_p7 = scmp.lt.u32.totalorder %s5847_s6, %s6548_s19 }
 0x13a   : > { %p5850_p9 = pnand %p5848_p12, %p7596_p5  ;;  %p5855_p1 = por %p5854_p6, %p5853_p13 }
 0x13c   : > { %p5851_p2 = pneg %p5850_p9  ;;  %p5857_p10 = por %p5856_p7, %p5855_p1 }
 0x13e   : > { %p5858_p0 = pnand %p5857_p10, %p5851_p2 }
 0x140   : > { %5861 = shalt.err (!%p5858_p0)
}
 0x141   : > { %s5862_s14 = scalar_lea.vmem %s6551_s16, 256  ;;  %s6052_s18 = smov [#allocation17]  }
 0x142   : > { %p5863_p4 = scmp.ne.s32.totalorder %s6551_s16, %s5862_s14  ;;  %s5867_s24 = sshll.u32 %s6052_s18, 4  ;;  %s5868_s24 = int_to_ptr.vmem [resolvable:$false] %s5867_s24 }
 0x143   : > { %s5869_s22 = scalar_lea.vmem %s5868_s24, 512  ;;  %p5870_p12 = scmp.lt.s32.totalorder %s6551_s16, %s5868_s24 }
 0x144   : > { %p5865_p3 = pnand %p5863_p4, %p7596_p5  ;;  %p5871_p9 = scmp.lt.s32.totalorder %s5869_s22, %s5862_s14 }
 0x146   : > { %p5866_p8 = pneg %p5865_p3  ;;  %p5872_p13 = por %p5871_p9, %p5870_p12 }
 0x148   : > { %p5873_p6 = pnand %p5872_p13, %p5866_p8 }
 0x14a   : > { %5876 = shalt.err (!%p5873_p6)
}
 0x14b   : > { %s7603_s21 = smov 4   ;;  %s7604_s5 = smov 64  }
 0x14c   : > { %s7605_s4 = scalar_lea.sflag [#allocation16], %s6292_s23  ;;  %s7606_s8 = sld [smem:[#allocation60_spill]] }
 0x14d   : > { %5347 = dma.hbm_to_vmem [thread:$0]  (!%p7600_p11), %s6548_s19, 256, %s6551_s16, %s7605_s4, %s7604_s5, %s7604_s5, %s7603_s21  }
 0x14e   : > { %s993_s29 = scalar_lea.vmem [#allocation20], %s6379_s30 }
 0x14f   : > { %s1000_s13 = sshll.u32 %s993_s29, 4  ;;  %s6586_s13 = int_to_ptr.vmem [resolvable:$true] %s1000_s13 }
 0x152   : > { %s6583_s28 = scalar_lea.hbm %s7606_s8, %s6382_s3  ;;  %s5882_s16 = scalar_lea.hbm %s7606_s8, 512 }
 0x153   : > { %s5877_s6 = scalar_lea.hbm %s6583_s28, 256  ;;  %p5883_p10 = scmp.lt.u32.totalorder %s6583_s28, %s7606_s8 }
 0x154   : > { %p5878_p2 = scmp.ne.s32.totalorder %s6583_s28, %s5877_s6  ;;  %p5884_p0 = scmp.lt.u32.totalorder %s5882_s16, %s5877_s6 }
 0x155   : > { %p5886_p3 = scmp.lt.u32.totalorder %s5877_s6, %s6583_s28 }
 0x156   : > { %p5880_p1 = pnand %p5878_p2, %p7596_p5  ;;  %p5885_p4 = por %p5884_p0, %p5883_p10 }
 0x158   : > { %p5881_p7 = pneg %p5880_p1  ;;  %p5887_p8 = por %p5886_p3, %p5885_p4 }
 0x15a   : > { %p5888_p12 = pnand %p5887_p8, %p5881_p7 }
 0x15c   : > { %5891 = shalt.err (!%p5888_p12)
}
 0x15d   : > { %s5892_s30 = scalar_lea.vmem %s6586_s13, 256  ;;  %s6053_s15 = smov [#allocation20]  }
 0x15e   : > { %p5893_p9 = scmp.ne.s32.totalorder %s6586_s13, %s5892_s30  ;;  %s5897_s7 = sshll.u32 %s6053_s15, 4  ;;  %s5898_s7 = int_to_ptr.vmem [resolvable:$false] %s5897_s7 }
 0x15f   : > { %s5899_s10 = scalar_lea.vmem %s5898_s7, 512  ;;  %p5900_p2 = scmp.lt.s32.totalorder %s6586_s13, %s5898_s7 }
 0x160   : > { %p5895_p13 = pnand %p5893_p9, %p7596_p5  ;;  %p5901_p1 = scmp.lt.s32.totalorder %s5899_s10, %s5892_s30 }
 0x162   : > { %p5896_p6 = pneg %p5895_p13  ;;  %p5902_p10 = por %p5901_p1, %p5900_p2 }
 0x164   : > { %p5903_p0 = pnand %p5902_p10, %p5896_p6 }
 0x166   : > { %5906 = shalt.err (!%p5903_p0)
}
 0x167   : > { %s7607_s14 = scalar_lea.sflag [#allocation19], %s6292_s23  ;;  %s7608_s17 = sld [smem:[#allocation39_spill]] }
 0x168   : > { %5353 = dma.hbm_to_vmem [thread:$0]  (!%p7600_p11), %s6583_s28, 256, %s6586_s13, %s7607_s14, %s7604_s5, %s7604_s5, %s7603_s21  }
 0x16d   : > { %p7609_p5 = scmp.ne.s32.totalorder %s7608_s17, 0 }
 0x16e   : > { %s7610_s18 = sld [smem:[#allocation37_spill]] (!%p7609_p5) }
 0x16f   : > { %1032 = sbr.rel (%p7609_p5) target bundleno = 5163 (0x142b), region = 116 }
 0x174   : > { %p7611_p7 = scmp.eq.s32.totalorder (!%p7609_p5), %s7610_s18, 0 }
 0x176   : > { %5984 = dma.done.wait (%p7611_p7), [#allocation4], 256   ;;  %p7612_p4 = pmov %p7611_p7 }
 0x178   : > { %5986 = vsyncadd (%p7612_p4), [#allocation4], 4294967040  ;;  %p7613_p3 = pmov %p7612_p4 }
 0x17a   : > { %5988 = dma.done.wait (%p7613_p3), [#allocation7], 64   ;;  %p7614_p8 = pmov %p7613_p3 }
 0x17b   : > { %s7615_s23 = sld [smem:[#allocation32_spill]]  ;;  %s1046_s24 = sand.u32 1, %s7610_s18  }
 0x17c   : > { %5990 = vsyncadd (%p7614_p8), [#allocation7], 4294967232  ;;  %s7616_s27 = sld [smem:[#allocation38_spill]]  ;;  %s1047_s21 = scalar_lea.sflag [#allocation10], %s1046_s24 }
 0x181   : > { %s6626_s22 = sand.u32 1, %s7615_s23  }
 0x182   : > { %p7617_p11 = scmp.ne.s32.totalorder %s7616_s27, 0 }
 0x184   : > { %5992 = dma.done.wait (%p7617_p11), %s1047_s21, 32  }
 0x185   : > { %5994 = vsyncadd (%p7617_p11), %s1047_s21, 4294967264  ;;  %s1063_s2 = scalar_lea.sflag [#allocation13], %s1046_s24 }
 0x186   : > { %5996 = dma.done.wait (%p7617_p11), %s1063_s2, 32  }
 0x187   : > { %5998 = vsyncadd (%p7617_p11), %s1063_s2, 4294967264  ;;  %s6640_s28 = sshll.u32 %s6626_s22, 4  ;;  %s1079_s13 = scalar_lea.sflag [#allocation16], %s1046_s24 }
 0x188   : > { %6000 = dma.done.wait (%p7617_p11), %s1079_s13, 512  }
 0x189   : > { %6002 = vsyncadd (%p7617_p11), %s1079_s13, 4294966784  ;;  %s1097_s19 = scalar_lea.sflag [#allocation19], %s1046_s24 }
 0x18a   : > { %6004 = dma.done.wait (%p7617_p11), %s1097_s19, 512  }
 0x18b   : > { %6006 = vsyncadd (%p7617_p11), %s1097_s19, 4294966784  ;;  %s7618_s12 = sld [smem:[#allocation34_spill]]  ;;  %s7620_s23 = sld [smem:[#allocation48_spill]] }
 0x18c   : > { %s7621_s2 = sld [smem:[#allocation49_spill]]  ;;  %s7622_s29 = sld [smem:[#allocation50_spill]] }
 0x18d   : > { %s7623_s4 = sld [smem:[#allocation51_spill]]  ;;  %s7624_s17 = sld [smem:[#allocation54_spill]] }
 0x18e   : > { %s7625_s24 = sld [smem:[#allocation59_spill]]  ;;  %s7626_s0 = sld [smem:[#allocation61_spill]] }
 0x18f   : > { %s7627_s11 = sld [smem:[#allocation62_spill]]  ;;  %s7628_s20 = sld [smem:[#allocation63_spill]] }
 0x191   : > { %p1258_p12 = scmp.lt.s32.totalorder %s7618_s12, 1  ;;  %p4807_p9 = scmp.ne.s32.totalorder %s7618_s12, 0 }
 0x192   : > { %v1307_v0 = vld [vmem:[#allocation3] sm:$0xff] (!%p4807_p9)  ;;  %vm1309_vm0 = vcmask (!%p4807_p9), 261120   ;;  %v1308_v1 = vld [vmem:[#allocation3 + $0x8] sm:$0xff] (!%p4807_p9) }
 0x193   : > { %s6656_s3 = scalar_select %p1258_p12, %s7618_s12, 1 }
 0x194   : > { %1306 = sbr.rel (%p4807_p9) target bundleno = 411 (0x19b), region = 164  ;;  %1310 = vst.msk [vmem:[#allocation2] sm:$0xff] (!%p4807_p9), %vm1309_vm0, %v1307_v0  ;;  %1311 = vst.msk [vmem:[#allocation2 + $0x8] sm:$0xff] (!%p4807_p9), %vm1309_vm0, %v1308_v1 }
 0x195   : > { %s4900_s30 = sshll.u32 %s6656_s3, 4  ;;  %s1288_s21 = scalar_lea.vmem %s7625_s24, %s6656_s3 }
 0x196   : > { %s6666_s27 = scalar_lea.vmem %s7620_s23, %s4900_s30  ;;  %s6671_s13 = scalar_lea.vmem %s7621_s2, %s4900_s30 }
 0x197   : > { %s6676_s1 = scalar_lea.vmem %s7622_s29, %s4900_s30  ;;  %s6681_s15 = scalar_lea.vmem %s7623_s4, %s4900_s30 }
 0x198   : > { %s6686_s18 = scalar_lea.vmem %s7624_s17, %s4900_s30  ;;  %s1291_s16 = scalar_lea.vmem %s7626_s0, %s6656_s3 }
 0x199   : > { %s4905_s29 = sshll.u32 %s6656_s3, 5  ;;  %s1299_s7 = scalar_lea.vmem %s7628_s20, %s6656_s3 }
 0x19a   : > { %s6700_s6 = scalar_lea.vmem %s7627_s11, %s4905_s29  ;;  %s1109_s30 = scalar_lea.vmem [#allocation20], %s6640_s28 }
 0x19b PF: > { %v1312_v2 = vld [vmem:[#allocation2] sm:$0xff]  ;;  %vm1399_vm1 = vcmask 261120   ;;  %v1313_v3 = vld [vmem:[#allocation2 + $0x8] sm:$0xff]  ;;  %v6054_v18 = vmov 0.0   ;;  %vm6055_vm2 = vmmov 0   ;;  %s7629_s11 = scalar_lea.vmem [#allocation9], %s6626_s22 }
 0x19c   : > { %v1400_v4 = vsel %vm1399_vm1, %v1312_v2, 0.0  ;;  %v1403_v5 = vsel %vm1399_vm1, %v1313_v3, 0.0  ;;  %v5479_v16 = vld [vmem:[%s6666_s27] sm:$0xff]   ;;  %5007 = vmatprep.subr.bf16.mxu0 %v6054_v18  ;;  %5015 = vmatprep.subr.bf16.mxu1 %v6054_v18  ;;  %v5481_v19 = vld [vmem:[%s6666_s27 + $0x8] sm:$0xff]   ;;  %s7630_s0 = scalar_lea.vmem [#allocation11], %s6626_s22  ;;  %vm1708_vm3 = vcmask 64512  }
 0x19d   : > { %1401 = vadd.xlane.f32.xlu0 %v1400_v4  ;;  %v5480_v17 = vld [vmem:[%s6671_s13] sm:$0xff]   ;;  %5008 = vmatpush3.bf16.msra.mxu0 %v5479_v16  ;;  %v5482_v20 = vld [vmem:[%s6671_s13 + $0x8] sm:$0xff]   ;;  %s6056_s20 = smov 112   ;;  %s6057_s8 = smov 120   ;;  %vm2192_vm4 = vcmask 1043456   ;;  %vm2584_vm13 = vcmask 130048  }
 0x19e   : > { %5016 = vmatpush3.bf16.msra.mxu1 %v5480_v17  ;;  %5009 = vmatprep.subr.bf16.mxu0 %v6054_v18  ;;  %v4808_v29 = vld [vmem:[%s7629_s11] ss:$0 sm:$0xff]  ;;  %v5484_v39 = vld [vmem:[%s6676_s1 + $0x8] sm:$0xff]   ;;  %s6058_s5 = smov 104   ;;  %s6062_s12 = smov 8   ;;  %vm2587_vm14 = vcmask 195584  }
 0x19f   : > { %5017 = vmatprep.subr.bf16.mxu1 %v6054_v18  ;;  %5011 = vmatprep.mubr.msk.bf16.mxu0 %vm6055_vm2, %v6054_v18  ;;  %v4809_v33 = vld [vmem:[%s7630_s0] ss:$0 sm:$0xff]  ;;  %s6063_s14 = smov 24   ;;  %s7631_s27 = scalar_lea.vmem [#allocation15], %s6640_s28  ;;  %vm3629_vm15 = vcmask 1045504  }
 0x1a0   : > { %5019 = vmatprep.mubr.msk.bf16.mxu1 %vm6055_vm2, %v6054_v18  ;;  %v5483_v37 = vld [vmem:[%s6676_s1] sm:$0xff]   ;;  %s6061_s1 = smov 16   ;;  %s7632_s13 = smov %s7631_s27 }
 0x1a1   : > { %1404 = vadd.xlane.f32.xlu0 %v1403_v5  ;;  %5010 = vmatpush3.bf16.msra.mxu0 %v5481_v19  ;;  %s7633_s17 = sld [smem:[#allocation43_spill]]  ;;  %s7634_s9 = scalar_lea.vmem [#allocation17], %s6640_s28 }
 0x1a2   : > { %5018 = vmatpush3.bf16.msra.mxu1 %v5482_v20  ;;  %5023 = vmatprep.subr.bf16.mxu0 %v6054_v18  ;;  %s7636_s11 = scalar_lea.vmem [#allocation14], %s6626_s22  ;;  %s7637_s0 = smov %s7634_s9 }
 0x1a3   : > { %5031 = vmatprep.subr.bf16.mxu1 %v6054_v18 }
 0x22a   : > { %v1402_v6 = vpop.xlane.xlu0 %1401 }
 0x22b   : > { %v1407_v7 = vmul.f32 0.03125, %v1402_v6 }
 0x22d   : > { %v1409_v8 = vsub.f32 %v1312_v2, %v1407_v7 }
 0x22e   : > { %v1405_v9 = vpop.xlane.xlu0 %1404 }
 0x22f   : > { %v1408_v10 = vmul.f32 0.03125, %v1405_v9  ;;  %v1411_v11 = vmul.f32 %v1409_v8, %v1409_v8 }
 0x231   : > { %v1410_v12 = vsub.f32 %v1313_v3, %v1408_v10  ;;  %v1413_v13 = vsel %vm1399_vm1, %v1411_v11, 0.0 }
 0x232   : > { %1414 = vadd.xlane.f32.xlu1 %v1413_v13 }
 0x233   : > { %v1412_v14 = vmul.f32 %v1410_v12, %v1410_v12 }
 0x235   : > { %v1416_v15 = vsel %vm1399_vm1, %v1412_v14, 0.0 }
 0x236   : > { %1417 = vadd.xlane.f32.xlu1 %v1416_v15 }
 0x2bf   : > { %v1415_v21 = vpop.xlane.xlu1 %1414 }
 0x2c0   : > { %v1419_v22 = vmul.f32 0.03125, %v1415_v21 }
 0x2c2   : > { %v1421_v23 = vadd.f32 1e-05, %v1419_v22 }
 0x2c3   : > { %v1418_v24 = vpop.xlane.xlu1 %1417 }
 0x2c4   : > { %5501 = vrsqrt.f32 %v1421_v23  ;;  %v1420_v25 = vmul.f32 0.03125, %v1418_v24 }
 0x2c6   : > { %v1422_v26 = vadd.f32 1e-05, %v1420_v25 }
 0x2c8   : > { %5503 = vrsqrt.f32 %v1422_v26 }
 0x2ce   : > { %v5502_v27 = vpop.eup %5501 }
 0x2cf   : > { %v1425_v28 = vmul.f32 %v5502_v27, %v1409_v8  ;;  %v1318_v27 = vlaneseq }
 0x2d1   : > { %v1433_v32 = vmul.f32 %v4808_v29, %v1425_v28  ;;  %v6059_v28 = vmov 1966171168  }
 0x2d2   : > { %v5504_v30 = vpop.eup %5503 }
 0x2d3   : > { %v1426_v31 = vmul.f32 %v5504_v30, %v1410_v12  ;;  %v1441_v35 = vadd.f32 %v4809_v33, %v1433_v32  ;;  %v1323_v30 = vld [vmem:[#allocation6] sm:$0x3] }
 0x2d4   : > { %vm1324_vm5 = vcmp.eq.s32.totalorder %v1323_v30, 0 }
 0x2d5   : > { %v1434_v34 = vmul.f32 %v4808_v29, %v1426_v31  ;;  %v1329_v29 = vunpack.c.l.s4 %v6059_v28  ;;  %v6810_v31 = vshrl.u32 %v1318_v27, 7 }
 0x2d7   : > { %v1442_v36 = vadd.f32 %v4809_v33, %v1434_v34  ;;  %v1330_v32 = vunpack.c.0.s8 %v1329_v29  ;;  %v6060_v34 = vmov 0  }
 0x2d9   : > { %v4906_v38 = vpack.c.bf16 %v1442_v36, %v1441_v35  ;;  %v6813_v33 = vsub.s32 %v1330_v32, %v6810_v31  ;;  %v1327_v35 = vsel %vm1324_vm5, 1, %v6060_v34  ;;  %vm3529_vm5 = vcmask 97280  }
 0x2db   : > { %5012 = vmatmul.mubr.msk.bf16.vlgmr.msra.gmra.mrb[0].mxu0 %vm1399_vm1, %v4906_v38  ;;  %5020 = vmatmul.mubr.msk.bf16.vlgmr.msra.gmra.mrb[0].mxu1 %vm1399_vm1, %v4906_v38  ;;  %v1334_v36 = vrot.slane %v1327_v35, %v6813_v33 }
 0x2dc   : > { %5024 = vmatpush3.bf16.msra.mxu0 %v5483_v37  ;;  %5027 = vmatprep.mubr.msk.bf16.mxu0 %vm6055_vm2, %v6054_v18 }
 0x2dd   : > { %5025 = vmatprep.subr.bf16.mxu0 %v6054_v18  ;;  %5033 = vmatprep.mubr.msk.bf16.mxu1 %vm6055_vm2, %v6054_v18  ;;  %v1342_v37 = vrot.slane %v1334_v36, %v6813_v33 }
 0x2df   : > { %vm1350_vm6 = vcmp.ne.s32.totalorder %v1342_v37, 0 }
 0x2e0   : > { %5026 = vmatpush3.bf16.msra.mxu0 %v5484_v39  ;;  %v1352_v39 = vsel %vm1350_vm6, 1, %v6060_v34 }
 0x2e1   : > { %5037 = vmatprep.subr.bf16.mxu0 %v6054_v18 }
 0x2e3   : > { %5028 = vmatmul.mubr.msk.bf16.vlgmr.msra.gmra.mrb[4].mxu0 %vm1399_vm1, %v4906_v38  ;;  %v6819_v38 = vsub.s32 0, %v6810_v31 }
 0x2e4   : > { %5039 = vmatprep.mubr.msk.bf16.mxu0 %vm6055_vm2, %v6054_v18 }
 0x3ae   : > { %v1503_v40 = vpop.f32.mrb[0].mxu0  ;;  %v1560_v41 = vpop.f32.mrb[0].mxu1 }
 0x3af   : > { %1660 = vrot.lane.b32.xlu1 %v1560_v41, %s6056_s20  ;;  %1654 = vrot.lane.b32.xlu0 %v1560_v41, %s6057_s8  ;;  %v5013_v42 = vpop.f32.mrb[1].mxu0  ;;  %v5021_v43 = vpop.f32.mrb[1].mxu1  ;;  %v1672_v44 = vpack.c.bf16 %v1560_v41, %v1560_v41  ;;  %v1644_v51 = vpack.c.bf16 %v1503_v40, %v1503_v40 }
 0x3b0   : > { %v6745_v45 = vpop.f32.mrb[2].mxu0  ;;  %v1563_v46 = vpop.f32.mrb[2].mxu1 }
 0x3b1   : > { %v5014_v47 = vpop.f32.mrb[3].mxu0  ;;  %v5022_v48 = vpop.f32.mrb[3].mxu1  ;;  %v1713_v49 = vsel %vm1708_vm3, %v1672_v44, 0  ;;  %v1676_v63 = vpack.c.bf16 %v1563_v46, %v1563_v46  ;;  %v1648_v11 = vpack.c.bf16 %v6745_v45, %v6745_v45 }
 0x3b2   : > { %5032 = vmatpush3.bf16.xpose.msra.mxu1 %v1713_v49 }
 0x3b3   : > { %1632 = vrot.lane.b32.xlu0 %v1503_v40, %s6056_s20  ;;  %1626 = vrot.lane.b32.xlu1 %v1503_v40, %s6057_s8  ;;  %v1897_v6 = vsel %vm1708_vm3, %v1676_v63, 0 }
 0x3b4   : > { %5043 = vmatprep.subr.bf16.mxu1 %v6054_v18 }
 0x3b6   : > { %v6751_v50 = vpop.f32.mrb[4].mxu0 }
 0x3b7   : > { %1656 = vrot.lane.b32.xlu0 %v1563_v46, %s6057_s8  ;;  %1666 = vrot.lane.b32.xlu1 %v1560_v41, %s6058_s5  ;;  %v5029_v52 = vpop.f32.mrb[5].mxu0  ;;  %v1700_v20 = vpack.c.bf16 %v6751_v50, %v6751_v50  ;;  %v1357_v41 = vrot.slane %v1352_v39, %v6819_v38 }
 0x3b8   : > { %v6755_v53 = vpop.f32.mrb[6].mxu0 }
 0x3b9   : > { %v5030_v54 = vpop.f32.mrb[7].mxu0  ;;  %5034 = vmatmul.mubr.msk.bf16.vlgmr.msra.gmra.mrb[4].mxu1 %vm1708_vm3, %v1644_v51  ;;  %v2194_v24 = vsel %vm2192_vm4, %v1700_v20, 0  ;;  %vm1362_vm8 = vcmp.eq.s32.totalorder %v1357_v41, 1  ;;  %v1335_v51 = vcombine.high %v1334_v36, %v1334_v36 }
 0x3ba   : > { %5045 = vmatprep.mubr.msk.bf16.mxu1 %vm6055_vm2, %v6054_v18 }
 0x3bb   : > { %1638 = vrot.lane.b32.xlu1 %v1503_v40, %s6058_s5  ;;  %1628 = vrot.lane.b32.xlu0 %v6745_v45, %s6057_s8  ;;  %v1321_v40 = vand.u32 127, %v1318_v27  ;;  %v1349_v52 = vrot.slane %v1335_v51, %v6813_v33 }
 0x3bd   : > { %vm1322_vm7 = vcmp.gt.s32.totalorder %v1321_v40, %v6810_v31  ;;  %vm1351_vm10 = vcmp.ne.s32.totalorder %v1349_v52, 0 }
 0x3be   : > { %vm1366_vm9 = vmor %vm1362_vm8, %vm1322_vm7  ;;  %v1353_v54 = vsel %vm1351_vm10, 1, %v6060_v34 }
 0x3bf   : > { %1662 = vrot.lane.b32.xlu1 %v1563_v46, %s6056_s20  ;;  %1634 = vrot.lane.b32.xlu0 %v6745_v45, %s6056_s20  ;;  %v1368_v43 = vsel %vm1366_vm9, -1e+09, %v6054_v18 }
 0x3c3   : > { %1668 = vrot.lane.b32.xlu1 %v1563_v46, %s6058_s5 }
 0x3c7   : > { %1640 = vrot.lane.b32.xlu1 %v6745_v45, %s6058_s5 }
 0x421   : > { %v1661_v55 = vpop.permute.xlu1 %1660  ;;  %v1655_v56 = vpop.permute.xlu0 %1654 }
 0x422   : > { %v1674_v57 = vpack.c.bf16 %v1661_v55, %v1661_v55  ;;  %v1673_v58 = vpack.c.bf16 %v1655_v56, %v1655_v56  ;;  %v1361_v55 = vrot.slane %v1353_v54, %v6819_v38 }
 0x424   : > { %v1759_v59 = vsel %vm1708_vm3, %v1673_v58, 0  ;;  %v1805_v60 = vsel %vm1708_vm3, %v1674_v57, 0  ;;  %vm1363_vm11 = vcmp.eq.s32.totalorder %v1361_v55, 1 }
 0x425   : > { %5038 = vmatpush3.bf16.xpose.msra.mxu0 %v1759_v59  ;;  %v1633_v61 = vpop.permute.xlu0 %1632  ;;  %v1627_v62 = vpop.permute.xlu1 %1626  ;;  %5044 = vmatpush3.bf16.xpose.msra.mxu1 %v1805_v60  ;;  %vm1367_vm12 = vmor %vm1363_vm11, %vm1322_vm7 }
 0x426   : > { %5049 = vmatprep.subr.bf16.mxu0 %v6054_v18  ;;  %5055 = vmatprep.subr.bf16.mxu1 %v6054_v18  ;;  %v1646_v1 = vpack.c.bf16 %v1633_v61, %v1633_v61  ;;  %v1645_v2 = vpack.c.bf16 %v1627_v62, %v1627_v62 }
 0x429   : > { %v1667_v0 = vpop.permute.xlu1 %1666  ;;  %v1657_v4 = vpop.permute.xlu0 %1656 }
 0x42a   : > { %v1675_v3 = vpack.c.bf16 %v1667_v0, %v1667_v0  ;;  %v1677_v8 = vpack.c.bf16 %v1657_v4, %v1657_v4 }
 0x42c   : > { %v1851_v5 = vsel %vm1708_vm3, %v1675_v3, 0  ;;  %5040 = vmatmul.mubr.msk.bf16.vlgmr.msra.gmra.mrb[8].mxu0 %vm1708_vm3, %v1645_v2  ;;  %5046 = vmatmul.mubr.msk.bf16.vlgmr.msra.gmra.mrb[8].mxu1 %vm1708_vm3, %v1646_v1  ;;  %v1943_v15 = vsel %vm1708_vm3, %v1677_v8, 0  ;;  %v1369_v8 = vsel %vm1367_vm12, -1e+09, %v6054_v18 }
 0x42d   : > { %5050 = vmatpush3.bf16.xpose.msra.mxu0 %v1851_v5  ;;  %v1639_v7 = vpop.permute.xlu1 %1638  ;;  %5056 = vmatpush3.bf16.xpose.msra.mxu1 %v1897_v6  ;;  %v1629_v9 = vpop.permute.xlu0 %1628 }
 0x42e   : > { %5051 = vmatprep.mubr.msk.bf16.mxu0 %vm6055_vm2, %v6054_v18  ;;  %5057 = vmatprep.mubr.msk.bf16.mxu1 %vm6055_vm2, %v6054_v18  ;;  %v1647_v12 = vpack.c.bf16 %v1639_v7, %v1639_v7  ;;  %v1649_v21 = vpack.c.bf16 %v1629_v9, %v1629_v9 }
 0x42f   : > { %5061 = vmatprep.subr.bf16.mxu0 %v6054_v18  ;;  %5067 = vmatprep.subr.bf16.mxu1 %v6054_v18 }
 0x431   : > { %v1663_v10 = vpop.permute.xlu1 %1662  ;;  %v1635_v17 = vpop.permute.xlu0 %1634 }
 0x432   : > { %v1678_v13 = vpack.c.bf16 %v1663_v10, %v1663_v10  ;;  %v1650_v22 = vpack.c.bf16 %v1635_v17, %v1635_v17 }
 0x434   : > { %v1989_v14 = vsel %vm1708_vm3, %v1678_v13, 0  ;;  %5052 = vmatmul.mubr.msk.bf16.vlgmr.msra.gmra.mrb[12].mxu0 %vm1708_vm3, %v1647_v12  ;;  %5058 = vmatmul.mubr.msk.bf16.vlgmr.msra.gmra.mrb[12].mxu1 %vm1708_vm3, %v1648_v11 }
 0x435   : > { %5062 = vmatpush3.bf16.xpose.msra.mxu0 %v1943_v15  ;;  %v1669_v16 = vpop.permute.xlu1 %1668  ;;  %5068 = vmatpush3.bf16.xpose.msra.mxu1 %v1989_v14 }
 0x436   : > { %5063 = vmatprep.mubr.msk.bf16.mxu0 %vm6055_vm2, %v6054_v18  ;;  %5069 = vmatprep.mubr.msk.bf16.mxu1 %vm6055_vm2, %v6054_v18  ;;  %v1679_v19 = vpack.c.bf16 %v1669_v16, %v1669_v16 }
 0x437   : > { %5073 = vmatprep.subr.bf16.mxu0 %v6054_v18  ;;  %5079 = vmatprep.subr.bf16.mxu1 %v6054_v18 }
 0x438   : > { %v2035_v23 = vsel %vm1708_vm3, %v1679_v19, 0 }
 0x439   : > { %v1641_v25 = vpop.permute.xlu1 %1640 }
 0x43a   : > { %v1651_v26 = vpack.c.bf16 %v1641_v25, %v1641_v25 }
 0x43c   : > { %5064 = vmatmul.mubr.msk.bf16.vlgmr.msra.gmra.mrb[16].mxu0 %vm1708_vm3, %v1649_v21  ;;  %5070 = vmatmul.mubr.msk.bf16.vlgmr.msra.gmra.mrb[16].mxu1 %vm1708_vm3, %v1650_v22 }
 0x43d   : > { %5074 = vmatpush3.bf16.xpose.msra.mxu0 %v2035_v23  ;;  %5080 = vmatpush3.bf16.msra.mxu1 %v2194_v24 }
 0x43e   : > { %5075 = vmatprep.mubr.msk.bf16.mxu0 %vm6055_vm2, %v6054_v18  ;;  %5085 = vmatprep.subr.bf16.mxu0 %v6054_v18 }
 0x43f   : > { %5081 = vmatprep.mubr.msk.bf16.mxu1 %vm6055_vm2, %v6054_v18  ;;  %5091 = vmatprep.subr.bf16.mxu1 %v6054_v18 }
 0x444   : > { %5076 = vmatmul.mubr.msk.bf16.vlgmr.msra.gmra.mrb[20].mxu0 %vm1708_vm3, %v1651_v26 }
 0x445   : > { %5087 = vmatprep.mubr.msk.bf16.mxu0 %vm6055_vm2, %v6054_v18 }
 0x48c   : > { %v1749_v42 = vpop.f32.mrb[4].mxu1 }
 0x48d   : > { %v2077_v44 = vmul.f32 0.35355338, %v1749_v42  ;;  %v5035_v45 = vpop.f32.mrb[5].mxu1 }
 0x48e   : > { %v1752_v46 = vpop.f32.mrb[6].mxu1 }
 0x48f   : > { %v5036_v47 = vpop.f32.mrb[7].mxu1  ;;  %v6827_v48 = vadd.f32 %v2077_v44, %v1368_v43 }
 0x491   : > { %v2093_v49 = vsel %vm1708_vm3, %v6827_v48, -inf }
 0x492   : > { %2094 = vmax.xlane.f32.xlu0 %v2093_v49 }
 0x4ff   : > { %v1795_v56 = vpop.f32.mrb[8].mxu0  ;;  %v1841_v57 = vpop.f32.mrb[8].mxu1 }
 0x500   : > { %v2078_v58 = vmul.f32 0.35355338, %v1795_v56  ;;  %v2079_v59 = vmul.f32 0.35355338, %v1841_v57  ;;  %v5041_v60 = vpop.f32.mrb[9].mxu0  ;;  %v5047_v61 = vpop.f32.mrb[9].mxu1 }
 0x501   : > { %v1798_v62 = vpop.f32.mrb[10].mxu0  ;;  %v1844_v63 = vpop.f32.mrb[10].mxu1 }
 0x502   : > { %v5042_v0 = vpop.f32.mrb[11].mxu0  ;;  %v5048_v1 = vpop.f32.mrb[11].mxu1  ;;  %v2087_v2 = vadd.f32 %v2079_v59, %v1368_v43  ;;  %v2086_v3 = vadd.f32 %v2078_v58, %v1368_v43 }
 0x504   : > { %v2099_v4 = vsel %vm1708_vm3, %v2087_v2, -inf  ;;  %v2096_v5 = vsel %vm1708_vm3, %v2086_v3, -inf }
 0x505   : > { %2100 = vmax.xlane.f32.xlu0 %v2099_v4  ;;  %2097 = vmax.xlane.f32.xlu1 %v2096_v5 }
 0x507   : > { %v1887_v6 = vpop.f32.mrb[12].mxu0  ;;  %v1933_v7 = vpop.f32.mrb[12].mxu1 }
 0x508   : > { %v2080_v9 = vmul.f32 0.35355338, %v1887_v6  ;;  %v2081_v10 = vmul.f32 0.35355338, %v1933_v7  ;;  %v5053_v11 = vpop.f32.mrb[13].mxu0  ;;  %v5059_v12 = vpop.f32.mrb[13].mxu1 }
 0x509   : > { %v1890_v13 = vpop.f32.mrb[14].mxu0  ;;  %v1936_v14 = vpop.f32.mrb[14].mxu1 }
 0x50a   : > { %v5054_v15 = vpop.f32.mrb[15].mxu0  ;;  %v5060_v16 = vpop.f32.mrb[15].mxu1  ;;  %v6839_v17 = vadd.f32 %v2080_v9, %v1368_v43  ;;  %v6841_v19 = vadd.f32 %v2081_v10, %v1369_v8 }
 0x50c   : > { %v2102_v20 = vsel %vm1708_vm3, %v6839_v17, -inf  ;;  %v2105_v23 = vsel %vm1708_vm3, %v6841_v19, -inf }
 0x50d   : > { %2103 = vmax.xlane.f32.xlu0 %v2102_v20 }
 0x50f   : > { %v1979_v21 = vpop.f32.mrb[16].mxu0  ;;  %v2025_v22 = vpop.f32.mrb[16].mxu1 }
 0x510   : > { %v2082_v24 = vmul.f32 0.35355338, %v1979_v21  ;;  %v2083_v25 = vmul.f32 0.35355338, %v2025_v22  ;;  %v5065_v26 = vpop.f32.mrb[17].mxu0  ;;  %v5071_v27 = vpop.f32.mrb[17].mxu1 }
 0x511   : > { %v2028_v28 = vpop.f32.mrb[18].mxu1  ;;  %2106 = vmax.xlane.f32.xlu0 %v2105_v23  ;;  %v1982_v29 = vpop.f32.mrb[18].mxu0 }
 0x512   : > { %v5066_v30 = vpop.f32.mrb[19].mxu0  ;;  %v5072_v32 = vpop.f32.mrb[19].mxu1  ;;  %v2091_v35 = vadd.f32 %v2083_v25, %v1369_v8  ;;  %v2090_v36 = vadd.f32 %v2082_v24, %v1369_v8 }
 0x514   : > { %v2111_v37 = vsel %vm1708_vm3, %v2091_v35, -inf  ;;  %v2108_v39 = vsel %vm1708_vm3, %v2090_v36, -inf }
 0x515   : > { %2112 = vmax.xlane.f32.xlu0 %v2111_v37  ;;  %2109 = vmax.xlane.f32.xlu1 %v2108_v39 }
 0x517   : > { %v2071_v40 = vpop.f32.mrb[20].mxu0 }
 0x518   : > { %v2084_v41 = vmul.f32 0.35355338, %v2071_v40  ;;  %v5077_v42 = vpop.f32.mrb[21].mxu0 }
 0x519   : > { %v2074_v43 = vpop.f32.mrb[22].mxu0 }
 0x51a   : > { %v5078_v44 = vpop.f32.mrb[23].mxu0  ;;  %v2092_v45 = vadd.f32 %v2084_v41, %v1369_v8 }
 0x51c   : > { %v2114_v46 = vsel %vm1708_vm3, %v2092_v45, -inf }
 0x51d   : > { %2115 = vmax.xlane.f32.xlu1 %v2114_v46 }
 0x51f   : > { %v2095_v47 = vpop.xlane.xlu0 %2094 }
 0x520   : > { %v2117_v49 = vsub.f32 %v6827_v48, %v2095_v47 }
 0x522   : > { %v2125_v51 = vmul.f32 1.442695, %v2117_v49 }
 0x524   : > { %5505 = vpow2.f32 %v2125_v51 }
 0x52b   : > { %1682 = vrot.lane.b32.xlu0 %v6751_v50, %s6057_s8 }
 0x52e   : > { %1688 = vrot.lane.b32.xlu1 %v6751_v50, %s6056_s20  ;;  %v5506_v52 = vpop.eup %5505 }
 0x52f   : > { %v2141_v54 = vsel %vm1708_vm3, %v5506_v52, 0.0 }
 0x54a   : > { %2142 = vadd.xlane.f32.xlu0 %v2141_v54 }
 0x592   : > { %v2101_v55 = vpop.xlane.xlu0 %2100  ;;  %v2098_v56 = vpop.xlane.xlu1 %2097 }
 0x593   : > { %v2119_v57 = vsub.f32 %v2087_v2, %v2101_v55  ;;  %v2118_v58 = vsub.f32 %v2086_v3, %v2098_v56 }
 0x595   : > { %v2129_v59 = vmul.f32 1.442695, %v2119_v57  ;;  %v2127_v60 = vmul.f32 1.442695, %v2118_v58 }
 0x597   : > { %5507 = vpow2.f32 %v2129_v59 }
 0x598   : > { %5509 = vpow2.f32 %v2127_v60 }
 0x59a   : > { %v2104_v61 = vpop.xlane.xlu0 %2103 }
 0x59b   : > { %v2120_v7 = vsub.f32 %v6839_v17, %v2104_v61 }
 0x59d   : > { %v2131_v10 = vmul.f32 1.442695, %v2120_v7 }
 0x59e   : > { %v2107_v62 = vpop.xlane.xlu0 %2106 }
 0x59f   : > { %v2121_v6 = vsub.f32 %v6841_v19, %v2107_v62 }
 0x5a1   : > { %v6856_v63 = vpop.eup %5507  ;;  %v2133_v9 = vmul.f32 1.442695, %v2121_v6 }
 0x5a2   : > { %v6858_v0 = vpop.eup %5509  ;;  %v2113_v48 = vpop.xlane.xlu0 %2112  ;;  %v2147_v1 = vsel %vm1708_vm3, %v6856_v63, 0.0 }
 0x5a3   : > { %2148 = vadd.xlane.f32.xlu0 %v2147_v1  ;;  %v2144_v4 = vsel %vm1708_vm3, %v6858_v0, 0.0  ;;  %v2110_v8 = vpop.xlane.xlu1 %2109  ;;  %5511 = vpow2.f32 %v2133_v9  ;;  %v2123_v12 = vsub.f32 %v2091_v35, %v2113_v48 }
 0x5a4   : > { %2145 = vadd.xlane.f32.xlu1 %v2144_v4  ;;  %v2122_v11 = vsub.f32 %v2090_v36, %v2110_v8  ;;  %5513 = vpow2.f32 %v2131_v10 }
 0x5a5   : > { %v2137_v15 = vmul.f32 1.442695, %v2123_v12 }
 0x5a6   : > { %v1683_v2 = vpop.permute.xlu0 %1682  ;;  %v2135_v13 = vmul.f32 1.442695, %v2122_v11 }
 0x5a7   : > { %v1701_v3 = vpack.c.bf16 %v1683_v2, %v1683_v2 }
 0x5a8   : > { %5515 = vpow2.f32 %v2135_v13 }
 0x5a9   : > { %v2240_v5 = vsel %vm2192_vm4, %v1701_v3, 0  ;;  %5517 = vpow2.f32 %v2137_v15 }
 0x5aa   : > { %5086 = vmatpush3.bf16.msra.mxu0 %v2240_v5  ;;  %v2116_v14 = vpop.xlane.xlu1 %2115 }
 0x5ab   : > { %5097 = vmatprep.subr.bf16.mxu0 %v6054_v18  ;;  %v2124_v16 = vsub.f32 %v2092_v45, %v2116_v14  ;;  %v1704_v45 = vpack.c.bf16 %v6755_v53, %v6755_v53 }
 0x5ad   : > { %v2139_v20 = vmul.f32 1.442695, %v2124_v16  ;;  %v6872_v21 = vpop.eup %5511 }
 0x5ae   : > { %v2153_v19 = vsel %vm1708_vm3, %v6872_v21, 0.0  ;;  %v1689_v26 = vpop.permute.xlu1 %1688 }
 0x5af   : > { %5519 = vpow2.f32 %v2139_v20  ;;  %v1702_v30 = vpack.c.bf16 %v1689_v26, %v1689_v26 }
 0x5b1   : > { %v2286_v37 = vsel %vm2192_vm4, %v1702_v30, 0 }
 0x5b5   : > { %1684 = vrot.lane.b32.xlu1 %v6755_v53, %s6057_s8 }
 0x5b9   : > { %1694 = vrot.lane.b32.xlu0 %v6751_v50, %s6058_s5  ;;  %v6874_v50 = vpop.eup %5513 }
 0x5ba   : > { %v2150_v22 = vsel %vm1708_vm3, %v6874_v50, 0.0  ;;  %v6880_v23 = vpop.eup %5515 }
 0x5bb   : > { %v2156_v24 = vsel %vm1708_vm3, %v6880_v23, 0.0  ;;  %v6884_v25 = vpop.eup %5517 }
 0x5bc   : > { %v2159_v27 = vsel %vm1708_vm3, %v6884_v25, 0.0  ;;  %v6888_v28 = vpop.eup %5519 }
 0x5bd   : > { %v2162_v35 = vsel %vm1708_vm3, %v6888_v28, 0.0 }
 0x5d7   : > { %v2143_v17 = vpop.xlane.xlu0 %2142 }
 0x5d8   : > { %5521 = vrcp.f32 %v2143_v17  ;;  %2154 = vadd.xlane.f32.xlu0 %v2153_v19 }
 0x5d9   : > { %2151 = vadd.xlane.f32.xlu1 %v2150_v22 }
 0x5dd   : > { %2157 = vadd.xlane.f32.xlu1 %v2156_v24 }
 0x5e1   : > { %2160 = vadd.xlane.f32.xlu1 %v2159_v27 }
 0x5e2   : > { %v5522_v29 = vpop.eup %5521 }
 0x5e3   : > { %v2173_v32 = vmul.f32 %v5522_v29, %v5506_v52  ;;  %v2378_v52 = vsel %vm2192_vm4, %v1704_v45, 0 }
 0x5e5   : > { %2163 = vadd.xlane.f32.xlu1 %v2162_v35  ;;  %v2181_v36 = vpack.c.bf16 %v2173_v32, %v2173_v32 }
 0x5e7   : > { %5082 = vmatmul.mubr.msk.bf16.vlgmr.msra.gmra.mrb[20].mxu1 %vm1708_vm3, %v2181_v36  ;;  %v5485_v36 = vld [vmem:[%s6681_s15] sm:$0xff]  }
 0x5e8   : > { %5092 = vmatpush3.bf16.msra.mxu1 %v2286_v37  ;;  %5093 = vmatprep.mubr.msk.bf16.mxu1 %vm6055_vm2, %v6054_v18 }
 0x5e9   : > { %5103 = vmatprep.subr.bf16.mxu1 %v6054_v18 }
 0x5ee   : > { %1690 = vrot.lane.b32.xlu0 %v6755_v53, %s6056_s20 }
 0x5f6   : > { %1696 = vrot.lane.b32.xlu1 %v6755_v53, %s6058_s5 }
 0x630   : > { %v2149_v39 = vpop.xlane.xlu0 %2148 }
 0x631   : > { %5523 = vrcp.f32 %v2149_v39  ;;  %v2146_v40 = vpop.xlane.xlu1 %2145 }
 0x632   : > { %5525 = vrcp.f32 %v2146_v40 }
 0x634   : > { %v1695_v41 = vpop.permute.xlu0 %1694 }
 0x635   : > { %v1703_v47 = vpack.c.bf16 %v1695_v41, %v1695_v41  ;;  %v1685_v53 = vpop.permute.xlu1 %1684 }
 0x637   : > { %v2332_v54 = vsel %vm2192_vm4, %v1703_v47, 0 }
 0x63b   : > { %v5524_v42 = vpop.eup %5523 }
 0x63c   : > { %v5526_v43 = vpop.eup %5525  ;;  %v2175_v44 = vmul.f32 %v5524_v42, %v6856_v63 }
 0x63d   : > { %v2174_v46 = vmul.f32 %v5526_v43, %v6858_v0  ;;  %v1705_v0 = vpack.c.bf16 %v1685_v53, %v1685_v53  ;;  %v5486_v43 = vld [vmem:[%s6681_s15 + $0x8] sm:$0xff]  }
 0x63e   : > { %v2183_v49 = vpack.c.bf16 %v2175_v44, %v2175_v44 }
 0x63f   : > { %v2182_v51 = vpack.c.bf16 %v2174_v46, %v2174_v46  ;;  %v2424_v6 = vsel %vm2192_vm4, %v1705_v0, 0 }
 0x640   : > { %5094 = vmatmul.mubr.msk.bf16.vlgmr.msra.gmra.mrb[24].mxu1 %vm1708_vm3, %v2183_v49 }
 0x641   : > { %5088 = vmatmul.mubr.msk.bf16.vlgmr.msra.gmra.mrb[24].mxu0 %vm1708_vm3, %v2182_v51  ;;  %5104 = vmatpush3.bf16.msra.mxu1 %v2378_v52 }
 0x642   : > { %5098 = vmatpush3.bf16.msra.mxu0 %v2332_v54  ;;  %5099 = vmatprep.mubr.msk.bf16.mxu0 %vm6055_vm2, %v6054_v18 }
 0x643   : > { %5105 = vmatprep.mubr.msk.bf16.mxu1 %vm6055_vm2, %v6054_v18  ;;  %5109 = vmatprep.subr.bf16.mxu0 %v6054_v18 }
 0x644   : > { %5115 = vmatprep.subr.bf16.mxu1 %v6054_v18 }
 0x665   : > { %v2155_v55 = vpop.xlane.xlu0 %2154 }
 0x666   : > { %5527 = vrcp.f32 %v2155_v55  ;;  %v2152_v56 = vpop.xlane.xlu1 %2151 }
 0x667   : > { %5529 = vrcp.f32 %v2152_v56 }
 0x669   : > { %v1691_v58 = vpop.permute.xlu0 %1690 }
 0x66a   : > { %v2158_v57 = vpop.xlane.xlu1 %2157  ;;  %v1706_v63 = vpack.c.bf16 %v1691_v58, %v1691_v58 }
 0x66b   : > { %5531 = vrcp.f32 %v2158_v57 }
 0x66c   : > { %v2470_v5 = vsel %vm2192_vm4, %v1706_v63, 0 }
 0x66e   : > { %v2161_v59 = vpop.xlane.xlu1 %2160 }
 0x66f   : > { %5533 = vrcp.f32 %v2161_v59 }
 0x670   : > { %v5528_v60 = vpop.eup %5527 }
 0x671   : > { %v5530_v61 = vpop.eup %5529  ;;  %v2177_v62 = vmul.f32 %v5528_v60, %v6872_v21 }
 0x672   : > { %v2176_v48 = vmul.f32 %v5530_v61, %v6874_v50  ;;  %v2164_v1 = vpop.xlane.xlu1 %2163 }
 0x673   : > { %5535 = vrcp.f32 %v2164_v1  ;;  %v2185_v4 = vpack.c.bf16 %v2177_v62, %v2177_v62 }
 0x674   : > { %v2184_v2 = vpack.c.bf16 %v2176_v48, %v2176_v48 }
 0x675   : > { %v5532_v3 = vpop.eup %5531  ;;  %5106 = vmatmul.mubr.msk.bf16.vlgmr.msra.gmra.mrb[28].mxu1 %vm1708_vm3, %v2185_v4 }
 0x676   : > { %5100 = vmatmul.mubr.msk.bf16.vlgmr.msra.gmra.mrb[28].mxu0 %vm1708_vm3, %v2184_v2  ;;  %5116 = vmatpush3.bf16.msra.mxu1 %v2470_v5  ;;  %v1697_v7 = vpop.permute.xlu1 %1696  ;;  %v2178_v8 = vmul.f32 %v5532_v3, %v6880_v23 }
 0x677   : > { %5110 = vmatpush3.bf16.msra.mxu0 %v2424_v6  ;;  %5111 = vmatprep.mubr.msk.bf16.mxu0 %vm6055_vm2, %v6054_v18  ;;  %v1707_v11 = vpack.c.bf16 %v1697_v7, %v1697_v7 }
 0x678   : > { %5117 = vmatprep.mubr.msk.bf16.mxu1 %vm6055_vm2, %v6054_v18  ;;  %5121 = vmatprep.subr.bf16.mxu0 %v6054_v18  ;;  %v2186_v12 = vpack.c.bf16 %v2178_v8, %v2178_v8 }
 0x679   : > { %v5534_v9 = vpop.eup %5533  ;;  %5127 = vmatprep.subr.bf16.mxu1 %v6054_v18  ;;  %v2516_v15 = vsel %vm2192_vm4, %v1707_v11, 0 }
 0x67a   : > { %v2179_v10 = vmul.f32 %v5534_v9, %v6884_v25 }
 0x67c   : > { %v2187_v13 = vpack.c.bf16 %v2179_v10, %v2179_v10 }
 0x67d   : > { %v5536_v14 = vpop.eup %5535 }
 0x67e   : > { %5112 = vmatmul.mubr.msk.bf16.vlgmr.msra.gmra.mrb[32].mxu0 %vm1708_vm3, %v2186_v12  ;;  %5118 = vmatmul.mubr.msk.bf16.vlgmr.msra.gmra.mrb[32].mxu1 %vm1708_vm3, %v2187_v13  ;;  %v2180_v16 = vmul.f32 %v5536_v14, %v6888_v28  ;;  %v5577_v13 = vld [vmem:[#allocation2] sm:$0xff] }
 0x67f   : > { %5122 = vmatpush3.bf16.msra.mxu0 %v2516_v15  ;;  %5123 = vmatprep.mubr.msk.bf16.mxu0 %vm6055_vm2, %v6054_v18 }
 0x680   : > { %5131 = vmatprep.mubr.msk.bf16.mxu1 %vm6055_vm2, %v6054_v18  ;;  %5135 = vmatprep.subr.bf16.mxu0 %v6054_v18  ;;  %v2188_v20 = vpack.c.bf16 %v2180_v16, %v2180_v16 }
 0x681   : > { %5128 = vmatpush3.bf16.msra.mxu1 %v5485_v36 }
 0x682   : > { %5129 = vmatprep.subr.bf16.mxu1 %v6054_v18 }
 0x685   : > { %5130 = vmatpush3.bf16.msra.mxu1 %v5486_v43 }
 0x686   : > { %5124 = vmatmul.mubr.msk.bf16.vlgmr.msra.gmra.mrb[36].mxu0 %vm1708_vm3, %v2188_v20  ;;  %v5578_v20 = vld [vmem:[#allocation2 + $0x8] sm:$0xff] }
 0x687   : > { %5139 = vmatprep.mubr.msk.bf16.mxu0 %vm6055_vm2, %v6054_v18 }
 0x6ba   : > { %v2230_v21 = vpop.f32.mrb[20].mxu1 }
 0x6bb   : > { %v5083_v50 = vpop.f32.mrb[21].mxu1 }
 0x6bc   : > { %v2233_v17 = vpop.f32.mrb[22].mxu1 }
 0x6bd   : > { %v5084_v19 = vpop.f32.mrb[23].mxu1 }
 0x713   : > { %v2322_v22 = vpop.f32.mrb[24].mxu1 }
 0x714   : > { %v2276_v23 = vpop.f32.mrb[24].mxu0  ;;  %v5095_v24 = vpop.f32.mrb[25].mxu1 }
 0x715   : > { %v5089_v25 = vpop.f32.mrb[25].mxu0  ;;  %v2325_v26 = vpop.f32.mrb[26].mxu1 }
 0x716   : > { %v2279_v27 = vpop.f32.mrb[26].mxu0  ;;  %v5096_v28 = vpop.f32.mrb[27].mxu1  ;;  %v5487_v26 = vld [vmem:[%s7631_s27] sm:$0xff]  }
 0x717   : > { %v5090_v29 = vpop.f32.mrb[27].mxu0  ;;  %v5488_v27 = vld [vmem:[%s7632_s13 + $0x8] sm:$0xff]   ;;  %v1314_v28 = vld [vmem:[%s7633_s17] sm:$0xff]  ;;  %5143 = vmatprep.subr.bf16.mxu1 %v5487_v26 }
 0x718   : > { %v1315_v29 = vld [vmem:[%s7633_s17 + $0x8] sm:$0xf] }
 0x719   : > { %v4841_v36 = vpack.c.bf16 %v1315_v29, %v1315_v29 }
 0x748   : > { %v2414_v30 = vpop.f32.mrb[28].mxu1 }
 0x749   : > { %v2368_v32 = vpop.f32.mrb[28].mxu0  ;;  %v5107_v35 = vpop.f32.mrb[29].mxu1 }
 0x74a   : > { %v5101_v37 = vpop.f32.mrb[29].mxu0  ;;  %v2417_v39 = vpop.f32.mrb[30].mxu1 }
 0x74b   : > { %v2371_v40 = vpop.f32.mrb[30].mxu0  ;;  %v5108_v41 = vpop.f32.mrb[31].mxu1 }
 0x74c   : > { %v5102_v42 = vpop.f32.mrb[31].mxu0 }
 0x751   : > { %v2460_v44 = vpop.f32.mrb[32].mxu0  ;;  %v2506_v45 = vpop.f32.mrb[32].mxu1 }
 0x752   : > { %v5434_v46 = vpack.i.bf16 %v2460_v44, %v2276_v23  ;;  %v5439_v47 = vpack.i.bf16 %v2506_v45, %v2322_v22  ;;  %v5113_v49 = vpop.f32.mrb[33].mxu0  ;;  %v5119_v51 = vpop.f32.mrb[33].mxu1  ;;  %v6064_v22 = vmov 1983009808  }
 0x753   : > { %v2463_v52 = vpop.f32.mrb[34].mxu0  ;;  %v2509_v54 = vpop.f32.mrb[34].mxu1  ;;  %v2705_v23 = vunpack.c.l.s4 %v6064_v22 }
 0x754   : > { %5440 = vrot.lane.b32.xlu1 %v5439_v47, %s6061_s1  ;;  %v5120_v53 = vpop.f32.mrb[35].mxu1  ;;  %5435 = vrot.lane.b32.xlu0 %v5434_v46, %s6062_s12  ;;  %v5114_v55 = vpop.f32.mrb[35].mxu0 }
 0x755   : > { %v2706_v24 = vunpack.c.0.s8 %v2705_v23 }
 0x757   : > { %v2709_v25 = vsub.s32 %v2706_v24, %v6810_v31  ;;  %v1317_v31 = vld [vmem:[%s7633_s17 + $0x18] sm:$0xf]  ;;  %v4840_v24 = vld [vmem:[%s7636_s11] ss:$0 sm:$0xff] }
 0x758   : > { %v4842_v37 = vpack.c.bf16 %v1317_v31, %v1317_v31 }
 0x759   : > { %v2552_v56 = vpop.f32.mrb[36].mxu0  ;;  %v2717_v40 = vrot.slane %v4841_v36, %v2709_v25 }
 0x75a   : > { %v5444_v57 = vpack.i.bf16 %v2552_v56, %v2368_v32  ;;  %v5125_v58 = vpop.f32.mrb[37].mxu0  ;;  %v2699_v32 = vpack.c.bf16 %v1315_v29, %v1314_v28  ;;  %v2733_v42 = vrot.slane %v4842_v37, %v2709_v25  ;;  %v5492_v29 = vld [vmem:[%s7637_s0 + $0x8] sm:$0xff]  }
 0x75b   : > { %v2555_v59 = vpop.f32.mrb[38].mxu0 }
 0x75c   : > { %5445 = vrot.lane.b32.xlu0 %v5444_v57, %s6063_s14  ;;  %v5126_v60 = vpop.f32.mrb[39].mxu0  ;;  %v2710_v39 = vrot.slane %v2699_v32, %v2709_v25 }
 0x75e   : > { %v2718_v43 = vcombine.high %v2710_v39, %v2710_v39 }
 0x760   : > { %v2804_v46 = vcombine.low %v2710_v39, %v2718_v43 }
 0x762   : > { %v2812_v51 = vrot.slane %v2804_v46, %v2709_v25 }
 0x7c6   : > { %v5436_v61 = vpop.permute.xlu0 %5435  ;;  %v5441_v62 = vpop.permute.xlu1 %5440 }
 0x7c7   : > { %v5438_v63 = vunpack.i.h.bf16 %v5436_v61  ;;  %v5437_v0 = vunpack.i.l.bf16 %v5436_v61  ;;  %v5443_v48 = vunpack.i.h.bf16 %v5441_v62  ;;  %v5442_v1 = vunpack.i.l.bf16 %v5441_v62 }
 0x7c9   : > { %v2583_v4 = vsel %vm1708_vm3, %v2414_v30, %v5438_v63  ;;  %v2582_v2 = vsel %vm1708_vm3, %v2230_v21, %v5437_v0  ;;  %v1316_v30 = vld [vmem:[%s7633_s17 + $0x10] sm:$0xff]  ;;  %v5489_v0 = vld [vmem:[%s6686_s18] sm:$0xff]  }
 0x7ca   : > { %v2585_v7 = vsel %vm2584_vm13, %v2582_v2, %v5442_v1  ;;  %v2586_v8 = vsel %vm2584_vm13, %v2583_v4, %v5443_v48  ;;  %v2700_v35 = vpack.c.bf16 %v1317_v31, %v1316_v30  ;;  %5136 = vmatpush3.bf16.msra.mxu0 %v5489_v0  ;;  %v5490_v48 = vld [vmem:[%s6686_s18 + $0x8] sm:$0xff]   ;;  %s7635_s18 = scalar_lea.vmem [#allocation12], %s6626_s22  ;;  %s7638_s22 = scalar_lea.vmem [#allocation18], %s6640_s28 }
 0x7cb   : > { %5137 = vmatprep.subr.bf16.mxu0 %v6054_v18  ;;  %v5491_v1 = vld [vmem:[%s7634_s9] sm:$0xff]  }
 0x7cc   : > { %v2726_v41 = vrot.slane %v2700_v35, %v2709_v25 }
 0x7ce   : > { %v5446_v3 = vpop.permute.xlu0 %5445  ;;  %v2734_v44 = vcombine.high %v2726_v41, %v2726_v41  ;;  %v2805_v45 = vcombine.low %v2717_v40, %v2726_v41  ;;  %5138 = vmatpush3.bf16.msra.mxu0 %v5490_v48 }
 0x7cf   : > { %v5448_v5 = vunpack.i.h.bf16 %v5446_v3  ;;  %v5447_v6 = vunpack.i.l.bf16 %v5446_v3  ;;  %5151 = vmatprep.subr.bf16.mxu0 %v5491_v1 }
 0x7d0   : > { %v2819_v47 = vrot.slane %v2805_v45, %v2709_v25  ;;  %v2821_v49 = vcombine.low %v2734_v44, %v2733_v42 }
 0x7d1   : > { %v2589_v9 = vsel %vm2587_vm14, %v2586_v8, %v5448_v5  ;;  %v2588_v10 = vsel %vm2587_vm14, %v2585_v7, %v5447_v6 }
 0x7d2   : > { %v2590_v11 = vpack.c.bf16 %v2589_v9, %v2588_v10  ;;  %v6980_v52 = vrot.slane %v2821_v49, %v2709_v25  ;;  %v2820_v54 = vcombine.low %v2812_v51, %v2819_v47 }
 0x7d4   : > { %5132 = vmatmul.mubr.msk.bf16.vlgmr.msra.gmra.mrb[36].mxu1 %vm1399_vm1, %v2590_v11 }
 0x7d5   : > { %5144 = vmatpush3.bf16.msra.mxu1 %v5487_v26  ;;  %5147 = vmatprep.mubr.msk.bf16.mxu1 %vm1399_vm1, %v2820_v54 }
 0x7d6   : > { %5145 = vmatprep.subr.bf16.mxu1 %v5488_v27 }
 0x7d9   : > { %5146 = vmatpush3.bf16.msra.mxu1 %v5488_v27 }
 0x7da   : > { %5159 = vmatprep.subr.bf16.mxu1 %v6054_v18 }
 0x7dc   : > { %5148 = vmatmul.mubr.msk.bf16.vlgmr.msra.gmra.mrb[40].mxu1 %vm1399_vm1, %v6980_v52 }
 0x7dd   : > { %5161 = vmatprep.mubr.msk.bf16.mxu1 %vm6055_vm2, %v6054_v18 }
 0x8a7   : > { %v2644_v12 = vpop.f32.mrb[36].mxu1 }
 0x8a8   : > { %v6954_v14 = vadd.f32 %v5577_v13, %v2644_v12  ;;  %v5133_v15 = vpop.f32.mrb[37].mxu1 }
 0x8a9   : > { %v2647_v16 = vpop.f32.mrb[38].mxu1 }
 0x8aa   : > { %v6956_v21 = vadd.f32 %v5578_v20, %v2647_v16  ;;  %v5134_v50 = vpop.f32.mrb[39].mxu1  ;;  %v2655_v17 = vsel %vm1399_vm1, %v6954_v14, 0.0 }
 0x8ab   : > { %2656 = vadd.xlane.f32.xlu1 %v2655_v17  ;;  %v4839_v17 = vld [vmem:[%s7635_s18] ss:$0 sm:$0xff] }
 0x8ac   : > { %v2658_v19 = vsel %vm1399_vm1, %v6956_v21, 0.0 }
 0x8ad   : > { %2659 = vadd.xlane.f32.xlu0 %v2658_v19 }
 0x8af   : > { %v6996_v4 = vpop.f32.mrb[40].mxu1 }
 0x8b0   : > { %v2881_v2 = vpop.f32.mrb[41].mxu1  ;;  %v2992_v40 = vcombine.high %v6996_v4, %v6996_v4 }
 0x8b1   : > { %v2990_v3 = vcombine.high %v2881_v2, %v2881_v2  ;;  %v5150_v5 = vpop.f32.mrb[42].mxu1 }
 0x8b2   : > { %v2884_v6 = vpop.f32.mrb[43].mxu1 }
 0x8b3   : > { %v3036_v7 = vcombine.low %v2881_v2, %v2990_v3  ;;  %v2991_v39 = vcombine.high %v2884_v6, %v2884_v6 }
 0x8b5   : > { %v3052_v8 = vpack.c.bf16 %v2884_v6, %v3036_v7 }
 0x8b7   : > { %v3137_v9 = vsel %vm1708_vm3, %v3052_v8, 0 }
 0x8b8   : > { %5160 = vmatpush3.bf16.xpose.msra.mxu1 %v3137_v9 }
 0x8b9   : > { %5171 = vmatprep.subr.bf16.mxu1 %v6054_v18 }
 0x8bc   : > { %2994 = vrot.lane.b32.xlu1 %v2881_v2, %s6057_s8 }
 0x8c0   : > { %3008 = vrot.lane.b32.xlu1 %v2881_v2, %s6056_s20 }
 0x8c4   : > { %3010 = vrot.lane.b32.xlu1 %v2990_v3, %s6056_s20 }
 0x8c8   : > { %3024 = vrot.lane.b32.xlu1 %v2990_v3, %s6058_s5 }
 0x938   : > { %v2657_v53 = vpop.xlane.xlu1 %2656 }
 0x939   : > { %v2661_v55 = vmul.f32 0.03125, %v2657_v53 }
 0x93a   : > { %v2660_v56 = vpop.xlane.xlu0 %2659 }
 0x93b   : > { %v2663_v57 = vsub.f32 %v6954_v14, %v2661_v55  ;;  %v2662_v58 = vmul.f32 0.03125, %v2660_v56 }
 0x93c   : > { %v2995_v47 = vpop.permute.xlu1 %2994 }
 0x93d   : > { %v2664_v59 = vsub.f32 %v6956_v21, %v2662_v58  ;;  %v2665_v60 = vmul.f32 %v2663_v57, %v2663_v57 }
 0x93f   : > { %v2667_v61 = vsel %vm1399_vm1, %v2665_v60, 0.0  ;;  %v2666_v62 = vmul.f32 %v2664_v59, %v2664_v59 }
 0x940   : > { %2668 = vadd.xlane.f32.xlu0 %v2667_v61  ;;  %v3009_v51 = vpop.permute.xlu1 %3008 }
 0x941   : > { %v2670_v63 = vsel %vm1399_vm1, %v2666_v62, 0.0 }
 0x944   : > { %2671 = vadd.xlane.f32.xlu0 %v2670_v63 }
 0x95a   : > { %2996 = vrot.lane.b32.xlu0 %v2990_v3, %s6057_s8  ;;  %v3040_v3 = vcombine.low %v2991_v39, %v6996_v4 }
 0x95e   : > { %3022 = vrot.lane.b32.xlu0 %v2881_v2, %s6058_s5 }
 0x9cd   : > { %v2669_v10 = vpop.xlane.xlu0 %2668 }
 0x9ce   : > { %v2673_v11 = vmul.f32 0.03125, %v2669_v10 }
 0x9d0   : > { %v2675_v12 = vadd.f32 1e-05, %v2673_v11  ;;  %v3056_v11 = vpack.c.bf16 %v2992_v40, %v3040_v3 }
 0x9d1   : > { %v2672_v13 = vpop.xlane.xlu0 %2671 }
 0x9d2   : > { %5537 = vrsqrt.f32 %v2675_v12  ;;  %v2674_v15 = vmul.f32 0.03125, %v2672_v13 }
 0x9d4   : > { %v2676_v16 = vadd.f32 1e-05, %v2674_v15 }
 0x9d6   : > { %5539 = vrsqrt.f32 %v2676_v16 }
 0x9dc   : > { %v5538_v20 = vpop.eup %5537 }
 0x9dd   : > { %v2679_v50 = vmul.f32 %v5538_v20, %v2663_v57 }
 0x9df   : > { %v2687_v22 = vmul.f32 %v4839_v17, %v2679_v50  ;;  %v3321_v50 = vsel %vm1708_vm3, %v3056_v11, 0 }
 0x9e0   : > { %v5540_v19 = vpop.eup %5539 }
 0x9e1   : > { %v2680_v23 = vmul.f32 %v5540_v19, %v2664_v59  ;;  %v2695_v26 = vadd.f32 %v4840_v24, %v2687_v22 }
 0x9e3   : > { %v2688_v25 = vmul.f32 %v4839_v17, %v2680_v23 }
 0x9e5   : > { %v2696_v27 = vadd.f32 %v4840_v24, %v2688_v25 }
 0x9e7   : > { %v4907_v28 = vpack.c.bf16 %v2696_v27, %v2695_v26 }
 0x9e9   : > { %5140 = vmatmul.mubr.msk.bf16.vlgmr.msra.gmra.mrb[40].mxu0 %vm1399_vm1, %v4907_v28 }
 0x9ea   : > { %5152 = vmatpush3.bf16.msra.mxu0 %v5491_v1  ;;  %5155 = vmatprep.mubr.msk.bf16.mxu0 %vm1399_vm1, %v2820_v54  ;;  %v2997_v54 = vpop.permute.xlu0 %2996 }
 0x9eb   : > { %5153 = vmatprep.subr.bf16.mxu0 %v5492_v29  ;;  %v3037_v59 = vcombine.low %v2995_v47, %v2997_v54 }
 0x9ee   : > { %5154 = vmatpush3.bf16.msra.mxu0 %v5492_v29  ;;  %v3023_v55 = vpop.permute.xlu0 %3022 }
 0x9ef   : > { %5165 = vmatprep.subr.bf16.mxu0 %v6054_v18 }
 0x9f1   : > { %5156 = vmatmul.mubr.msk.bf16.vlgmr.msra.gmra.mrb[44].mxu0 %vm1399_vm1, %v6980_v52  ;;  %v3011_v52 = vpop.permute.xlu1 %3010 }
 0x9f2   : > { %5167 = vmatprep.mubr.msk.bf16.mxu0 %vm6055_vm2, %v6054_v18  ;;  %v3038_v58 = vcombine.low %v3009_v51, %v3011_v52 }
 0x9f5   : > { %v3025_v53 = vpop.permute.xlu1 %3024 }
 0x9f6   : > { %v3039_v9 = vcombine.low %v3023_v55, %v3025_v53 }
 0xabc   : > { %v2793_v30 = vpop.f32.mrb[40].mxu0 }
 0xabd   : > { %v2979_v31 = vpack.c.bf16 %v2793_v30, %v2793_v30  ;;  %v5141_v32 = vpop.f32.mrb[41].mxu0  ;;  %v5454_v35 = vpack.i.bf16 %v2793_v30, %v2884_v6 }
 0xabe   : > { %v7019_v36 = vpop.f32.mrb[42].mxu0 }
 0xabf   : > { %5455 = vrot.lane.b32.xlu0 %v5454_v35, %s6056_s20  ;;  %5450 = vrot.lane.b32.xlu1 %v5454_v35, %s6057_s8  ;;  %v5142_v37 = vpop.f32.mrb[43].mxu0  ;;  %v2983_v25 = vpack.c.bf16 %v7019_v36, %v7019_v36 }
 0xac0   : > { %5162 = vmatmul.mubr.msk.bf16.vlgmr.msra.gmra.mrb[44].mxu1 %vm1708_vm3, %v2979_v31 }
 0xac1   : > { %5173 = vmatprep.mubr.msk.bf16.mxu1 %vm6055_vm2, %v6054_v18 }
 0xac3   : > { %3000 = vrot.lane.b32.xlu0 %v2991_v39, %s6057_s8  ;;  %3002 = vrot.lane.b32.xlu1 %v6996_v4, %s6057_s8 }
 0xac4   : > { %v7042_v41 = vpop.f32.mrb[44].mxu0 }
 0xac5   : > { %v2945_v42 = vpop.f32.mrb[45].mxu0 }
 0xac6   : > { %v5158_v43 = vpop.f32.mrb[46].mxu0  ;;  %v3063_v44 = vcombine.high %v2945_v42, %v2945_v42 }
 0xac7   : > { %3004 = vrot.lane.b32.xlu0 %v2992_v40, %s6057_s8  ;;  %5460 = vrot.lane.b32.xlu1 %v5454_v35, %s6058_s5  ;;  %v7054_v45 = vpop.f32.mrb[47].mxu0 }
 0xac8   : > { %v3109_v46 = vcombine.low %v2945_v42, %v3063_v44 }
 0xaca   : > { %v7059_v49 = vpack.c.bf16 %v7054_v45, %v3109_v46 }
 0xacb   : > { %3016 = vrot.lane.b32.xlu0 %v6996_v4, %s6056_s20  ;;  %3014 = vrot.lane.b32.xlu1 %v2991_v39, %s6056_s20 }
 0xacf   : > { %3030 = vrot.lane.b32.xlu0 %v6996_v4, %s6058_s5  ;;  %3028 = vrot.lane.b32.xlu1 %v2991_v39, %s6058_s5 }
 0xad3   : > { %3018 = vrot.lane.b32.xlu1 %v2992_v40, %s6056_s20  ;;  %2963 = vrot.lane.b32.xlu0 %v7019_v36, %s6057_s8 }
 0xad7   : > { %3032 = vrot.lane.b32.xlu1 %v2992_v40, %s6058_s5  ;;  %2969 = vrot.lane.b32.xlu0 %v7019_v36, %s6056_s20 }
 0xadb   : > { %2975 = vrot.lane.b32.xlu1 %v7019_v36, %s6058_s5  ;;  %3067 = vrot.lane.b32.xlu0 %v2945_v42, %s6057_s8 }
 0xadf   : > { %3081 = vrot.lane.b32.xlu0 %v2945_v42, %s6056_s20  ;;  %3095 = vrot.lane.b32.xlu1 %v2945_v42, %s6058_s5 }
 0xae3   : > { %3097 = vrot.lane.b32.xlu0 %v3063_v44, %s6058_s5  ;;  %3069 = vrot.lane.b32.xlu1 %v3063_v44, %s6057_s8 }
 0xae7   : > { %3071 = vrot.lane.b32.xlu1 %v7054_v45, %s6057_s8 }
 0xaeb   : > { %3083 = vrot.lane.b32.xlu1 %v3063_v44, %s6056_s20  ;;  %v3631_v44 = vsel %vm3629_vm15, %v7059_v49, 0  ;;  %v1325_v49 = vld [vmem:[#allocation8] sm:$0x3] }
 0xaec   : > { %vm1326_vm0 = vcmp.eq.s32.totalorder %v1325_v49, 0 }
 0xaed   : > { %v1370_v51 = vsel %vm1326_vm0, 1, %v6060_v34 }
 0xaee   : > { %v1377_v52 = vrot.slane %v1370_v51, %v6813_v33 }
 0xaf0   : > { %v1385_v54 = vrot.slane %v1377_v52, %v6813_v33 }
 0xaf2   : > { %vm1393_vm4 = vcmp.ne.s32.totalorder %v1385_v54, 0 }
 0xaf3   : > { %v1395_v53 = vsel %vm1393_vm4, -1e+09, %v6054_v18 }
 0xaf4   : > { %v3514_v55 = vrot.slane %v1395_v53, %v6819_v38 }
 0xb31   : > { %v5456_v56 = vpop.permute.xlu0 %5455  ;;  %v5451_v57 = vpop.permute.xlu1 %5450 }
 0xb32   : > { %v5457_v60 = vunpack.i.l.bf16 %v5456_v56  ;;  %v5452_v61 = vunpack.i.l.bf16 %v5451_v57  ;;  %v5458_v5 = vunpack.i.h.bf16 %v5456_v56  ;;  %v5453_v6 = vunpack.i.h.bf16 %v5451_v57 }
 0xb34   : > { %v3054_v62 = vpack.c.bf16 %v5457_v60, %v3038_v58  ;;  %v3053_v63 = vpack.c.bf16 %v5452_v61, %v3037_v59  ;;  %v2981_v12 = vpack.c.bf16 %v5458_v5, %v5458_v5  ;;  %v2980_v13 = vpack.c.bf16 %v5453_v6, %v5453_v6 }
 0xb35   : > { %v3001_v0 = vpop.permute.xlu0 %3000  ;;  %v3003_v48 = vpop.permute.xlu1 %3002  ;;  %v1378_v5 = vcombine.high %v1377_v52, %v1377_v52 }
 0xb36   : > { %v3183_v1 = vsel %vm1708_vm3, %v3053_v63, 0  ;;  %v3229_v2 = vsel %vm1708_vm3, %v3054_v62, 0  ;;  %v3041_v17 = vcombine.low %v3001_v0, %v3003_v48 }
 0xb37   : > { %5166 = vmatpush3.bf16.xpose.msra.mxu0 %v3183_v1  ;;  %5172 = vmatpush3.bf16.xpose.msra.mxu1 %v3229_v2  ;;  %v1392_v6 = vrot.slane %v1378_v5, %v6813_v33 }
 0xb38   : > { %5177 = vmatprep.subr.bf16.mxu0 %v6054_v18  ;;  %5183 = vmatprep.subr.bf16.mxu1 %v6054_v18 }
 0xb39   : > { %v3005_v7 = vpop.permute.xlu0 %3004  ;;  %v5461_v8 = vpop.permute.xlu1 %5460  ;;  %vm1394_vm6 = vcmp.ne.s32.totalorder %v1392_v6, 0 }
 0xb3a   : > { %v5462_v10 = vunpack.i.l.bf16 %v5461_v8  ;;  %v5463_v19 = vunpack.i.h.bf16 %v5461_v8  ;;  %v3057_v24 = vpack.c.bf16 %v3005_v7, %v3041_v17 }
 0xb3c   : > { %v3055_v15 = vpack.c.bf16 %v5462_v10, %v3039_v9  ;;  %v2982_v26 = vpack.c.bf16 %v5463_v19, %v5463_v19  ;;  %v3367_v30 = vsel %vm1708_vm3, %v3057_v24, 0  ;;  %v1396_v19 = vsel %vm1394_vm6, -1e+09, %v6054_v18 }
 0xb3d   : > { %v3017_v16 = vpop.permute.xlu0 %3016  ;;  %v3015_v20 = vpop.permute.xlu1 %3014 }
 0xb3e   : > { %5168 = vmatmul.mubr.msk.bf16.vlgmr.msra.gmra.mrb[48].mxu0 %vm1708_vm3, %v2980_v13  ;;  %5174 = vmatmul.mubr.msk.bf16.vlgmr.msra.gmra.mrb[48].mxu1 %vm1708_vm3, %v2981_v12  ;;  %v3275_v4 = vsel %vm1708_vm3, %v3055_v15, 0  ;;  %v3042_v27 = vcombine.low %v3015_v20, %v3017_v16 }
 0xb3f   : > { %5178 = vmatpush3.bf16.xpose.msra.mxu0 %v3275_v4  ;;  %5184 = vmatpush3.bf16.xpose.msra.mxu1 %v3321_v50 }
 0xb40   : > { %5179 = vmatprep.mubr.msk.bf16.mxu0 %vm6055_vm2, %v6054_v18  ;;  %5185 = vmatprep.mubr.msk.bf16.mxu1 %vm6055_vm2, %v6054_v18 }
 0xb41   : > { %v3031_v22 = vpop.permute.xlu0 %3030  ;;  %v3029_v23 = vpop.permute.xlu1 %3028  ;;  %5189 = vmatprep.subr.bf16.mxu0 %v6054_v18  ;;  %5195 = vmatprep.subr.bf16.mxu1 %v6054_v18 }
 0xb42   : > { %v3043_v32 = vcombine.low %v3029_v23, %v3031_v22 }
 0xb45   : > { %v3019_v28 = vpop.permute.xlu1 %3018  ;;  %v2964_v29 = vpop.permute.xlu0 %2963 }
 0xb46   : > { %v3058_v31 = vpack.c.bf16 %v3019_v28, %v3042_v27  ;;  %5180 = vmatmul.mubr.msk.bf16.vlgmr.msra.gmra.mrb[52].mxu0 %vm1708_vm3, %v2982_v26  ;;  %5186 = vmatmul.mubr.msk.bf16.vlgmr.msra.gmra.mrb[52].mxu1 %vm1708_vm3, %v2983_v25  ;;  %v2984_v40 = vpack.c.bf16 %v2964_v29, %v2964_v29  ;;  %v3518_v28 = vrot.slane %v1396_v19, %v6819_v38 }
 0xb47   : > { %5190 = vmatpush3.bf16.xpose.msra.mxu0 %v3367_v30  ;;  %5191 = vmatprep.mubr.msk.bf16.mxu0 %vm6055_vm2, %v6054_v18 }
 0xb48   : > { %v3413_v35 = vsel %vm1708_vm3, %v3058_v31, 0  ;;  %5201 = vmatprep.subr.bf16.mxu0 %v6054_v18  ;;  %5197 = vmatprep.mubr.msk.bf16.mxu1 %vm6055_vm2, %v6054_v18 }
 0xb49   : > { %v3033_v36 = vpop.permute.xlu1 %3032  ;;  %5196 = vmatpush3.bf16.xpose.msra.mxu1 %v3413_v35  ;;  %v2970_v39 = vpop.permute.xlu0 %2969 }
 0xb4a   : > { %v3059_v37 = vpack.c.bf16 %v3033_v36, %v3043_v32  ;;  %5207 = vmatprep.subr.bf16.mxu1 %v6054_v18  ;;  %v2985_v43 = vpack.c.bf16 %v2970_v39, %v2970_v39 }
 0xb4c   : > { %v3459_v42 = vsel %vm1708_vm3, %v3059_v37, 0 }
 0xb4d   : > { %v2976_v46 = vpop.permute.xlu1 %2975  ;;  %v3068_v63 = vpop.permute.xlu0 %3067 }
 0xb4e   : > { %5192 = vmatmul.mubr.msk.bf16.vlgmr.msra.gmra.mrb[56].mxu0 %vm1708_vm3, %v2984_v40  ;;  %v2986_v47 = vpack.c.bf16 %v2976_v46, %v2976_v46 }
 0xb4f   : > { %5202 = vmatpush3.bf16.xpose.msra.mxu0 %v3459_v42  ;;  %5203 = vmatprep.mubr.msk.bf16.mxu0 %vm6055_vm2, %v6054_v18 }
 0xb50   : > { %5198 = vmatmul.mubr.msk.bf16.vlgmr.msra.gmra.mrb[56].mxu1 %vm1708_vm3, %v2985_v43  ;;  %5213 = vmatprep.subr.bf16.mxu0 %v6054_v18 }
 0xb51   : > { %5208 = vmatpush3.bf16.msra.mxu1 %v3631_v44  ;;  %5209 = vmatprep.mubr.msk.bf16.mxu1 %vm6055_vm2, %v6054_v18  ;;  %v7112_v62 = vpop.permute.xlu1 %3095 }
 0xb52   : > { %5219 = vmatprep.subr.bf16.mxu1 %v6054_v18 }
 0xb55   : > { %v3070_v0 = vpop.permute.xlu1 %3069 }
 0xb56   : > { %5204 = vmatmul.mubr.msk.bf16.vlgmr.msra.gmra.mrb[60].mxu0 %vm1708_vm3, %v2986_v47  ;;  %v3110_v48 = vcombine.low %v3068_v63, %v3070_v0 }
 0xb57   : > { %5215 = vmatprep.mubr.msk.bf16.mxu0 %vm6055_vm2, %v6054_v18 }
 0xb59   : > { %v3072_v1 = vpop.permute.xlu1 %3071 }
 0xb5a   : > { %v3126_v2 = vpack.c.bf16 %v3072_v1, %v3110_v48  ;;  %v7147_v48 = vcombine.high %v7054_v45, %v7054_v45  ;;  %v3082_v1 = vpop.permute.xlu0 %3081 }
 0xb5c   : > { %v3677_v3 = vsel %vm3629_vm15, %v3126_v2, 0  ;;  %v7155_v2 = vcombine.high %v7042_v41, %v7042_v41 }
 0xb5d   : > { %5214 = vmatpush3.bf16.msra.mxu0 %v3677_v3 }
 0xb5e   : > { %5225 = vmatprep.subr.bf16.mxu0 %v6054_v18  ;;  %v3098_v3 = vpop.permute.xlu0 %3097 }
 0xb93   : > { %v3173_v56 = vpop.f32.mrb[44].mxu1 }
 0xb94   : > { %v3501_v57 = vmul.f32 0.35355338, %v3173_v56  ;;  %v5163_v58 = vpop.f32.mrb[45].mxu1 }
 0xb95   : > { %v3176_v59 = vpop.f32.mrb[46].mxu1 }
 0xb96   : > { %v5164_v60 = vpop.f32.mrb[47].mxu1  ;;  %v7108_v61 = vadd.f32 %v3514_v55, %v3501_v57 }
 0xb98   : > { %v3530_v34 = vsel %vm3529_vm5, %v7108_v61, -inf }
 0xb99   : > { %3531 = vmax.xlane.f32.xlu0 %v3530_v34 }
 0xc11   : > { %v3219_v7 = vpop.f32.mrb[48].mxu0  ;;  %v3265_v8 = vpop.f32.mrb[48].mxu1 }
 0xc12   : > { %v3502_v9 = vmul.f32 0.35355338, %v3219_v7  ;;  %v3503_v10 = vmul.f32 0.35355338, %v3265_v8  ;;  %v5169_v11 = vpop.f32.mrb[49].mxu0  ;;  %v5175_v12 = vpop.f32.mrb[49].mxu1 }
 0xc13   : > { %v3222_v13 = vpop.f32.mrb[50].mxu0  ;;  %v3268_v15 = vpop.f32.mrb[50].mxu1 }
 0xc14   : > { %v5170_v16 = vpop.f32.mrb[51].mxu0  ;;  %v5176_v20 = vpop.f32.mrb[51].mxu1  ;;  %v7117_v4 = vadd.f32 %v3514_v55, %v3503_v10  ;;  %v7119_v50 = vadd.f32 %v3514_v55, %v3502_v9 }
 0xc15   : > { %v3084_v9 = vpop.permute.xlu1 %3083 }
 0xc16   : > { %v3536_v17 = vsel %vm3529_vm5, %v7117_v4, -inf  ;;  %v3533_v33 = vsel %vm3529_vm5, %v7119_v50, -inf }
 0xc17   : > { %3537 = vmax.xlane.f32.xlu0 %v3536_v17  ;;  %3534 = vmax.xlane.f32.xlu1 %v3533_v33  ;;  %v3112_v33 = vcombine.low %v7112_v62, %v3098_v3 }
 0xc19   : > { %v3357_v22 = vpop.f32.mrb[52].mxu1  ;;  %v3311_v23 = vpop.f32.mrb[52].mxu0 }
 0xc1a   : > { %v3505_v24 = vmul.f32 0.35355338, %v3357_v22  ;;  %v3504_v25 = vmul.f32 0.35355338, %v3311_v23  ;;  %v5181_v26 = vpop.f32.mrb[53].mxu0  ;;  %v5187_v27 = vpop.f32.mrb[53].mxu1 }
 0xc1b   : > { %v3314_v29 = vpop.f32.mrb[54].mxu0  ;;  %v3360_v30 = vpop.f32.mrb[54].mxu1 }
 0xc1c   : > { %v5182_v31 = vpop.f32.mrb[55].mxu0  ;;  %v5188_v32 = vpop.f32.mrb[55].mxu1  ;;  %v3524_v35 = vadd.f32 %v3514_v55, %v3504_v25  ;;  %v7128_v37 = vadd.f32 %v3518_v28, %v3505_v24 }
 0xc1e   : > { %v3539_v36 = vsel %vm3529_vm5, %v3524_v35, -inf  ;;  %v3542_v43 = vsel %vm3529_vm5, %v7128_v37, -inf }
 0xc1f   : > { %3540 = vmax.xlane.f32.xlu0 %v3539_v36 }
 0xc21   : > { %v3403_v39 = vpop.f32.mrb[56].mxu0 }
 0xc22   : > { %v3506_v40 = vmul.f32 0.35355338, %v3403_v39  ;;  %v5193_v42 = vpop.f32.mrb[57].mxu0 }
 0xc23   : > { %v3449_v44 = vpop.f32.mrb[56].mxu1  ;;  %3543 = vmax.xlane.f32.xlu0 %v3542_v43  ;;  %v3406_v46 = vpop.f32.mrb[58].mxu0 }
 0xc24   : > { %v5194_v38 = vpop.f32.mrb[59].mxu0  ;;  %v5199_v47 = vpop.f32.mrb[57].mxu1  ;;  %v3526_v49 = vadd.f32 %v3518_v28, %v3506_v40  ;;  %v3507_v58 = vmul.f32 0.35355338, %v3449_v44 }
 0xc25   : > { %v3452_v51 = vpop.f32.mrb[58].mxu1 }
 0xc26   : > { %v5200_v52 = vpop.f32.mrb[59].mxu1  ;;  %v3545_v54 = vsel %vm3529_vm5, %v3526_v49, -inf  ;;  %v7137_v60 = vadd.f32 %v3518_v28, %v3507_v58 }
 0xc27   : > { %3546 = vmax.xlane.f32.xlu1 %v3545_v54 }
 0xc28   : > { %v3548_v34 = vsel %vm3529_vm5, %v7137_v60, -inf }
 0xc29   : > { %v3495_v53 = vpop.f32.mrb[60].mxu0 }
 0xc2a   : > { %v5205_v55 = vpop.f32.mrb[61].mxu0  ;;  %v3508_v59 = vmul.f32 0.35355338, %v3495_v53 }
 0xc2b   : > { %v3498_v56 = vpop.f32.mrb[62].mxu0 }
 0xc2c   : > { %v5206_v57 = vpop.f32.mrb[63].mxu0  ;;  %v7141_v63 = vadd.f32 %v3518_v28, %v3508_v59  ;;  %v3111_v28 = vcombine.low %v3082_v1, %v3084_v9 }
 0xc2e   : > { %v3551_v0 = vsel %vm3529_vm5, %v7141_v63, -inf }
 0xc38   : > { %3085 = vrot.lane.b32.xlu1 %v7054_v45, %s6056_s20 }
 0xc39   : > { %3099 = vrot.lane.b32.xlu0 %v7054_v45, %s6058_s5  ;;  %v3532_v45 = vpop.xlane.xlu0 %3531 }
 0xc3a   : > { %v3554_v5 = vsub.f32 %v7108_v61, %v3532_v45 }
 0xc3c   : > { %v3562_v6 = vmul.f32 1.442695, %v3554_v5 }
 0xc3e   : > { %5541 = vpow2.f32 %v3562_v6 }
 0xc48   : > { %v7166_v7 = vpop.eup %5541 }
 0xc49   : > { %v3578_v8 = vsel %vm3529_vm5, %v7166_v7, 0.0 }
 0xc58   : > { %3549 = vmax.xlane.f32.xlu0 %v3548_v34 }
 0xc5c   : > { %3552 = vmax.xlane.f32.xlu1 %v3551_v0 }
 0xc6d   : > { %3073 = vrot.lane.b32.xlu1 %v7147_v48, %s6057_s8 }
 0xc6e   : > { %3075 = vrot.lane.b32.xlu0 %v7042_v41, %s6057_s8 }
 0xc71   : > { %3077 = vrot.lane.b32.xlu1 %v7155_v2, %s6057_s8  ;;  %s7640_s8 = sld [smem:[#allocation58_spill]] }
 0xc72   : > { %3087 = vrot.lane.b32.xlu0 %v7147_v48, %s6056_s20 }
 0xc75   : > { %3089 = vrot.lane.b32.xlu1 %v7042_v41, %s6056_s20 }
 0xc79   : > { %3103 = vrot.lane.b32.xlu1 %v7042_v41, %s6058_s5 }
 0xc91   : > { %3579 = vadd.xlane.f32.xlu0 %v3578_v8 }
 0xca4   : > { %v3535_v10 = vpop.xlane.xlu1 %3534  ;;  %v3538_v13 = vpop.xlane.xlu0 %3537 }
 0xca5   : > { %v3555_v11 = vsub.f32 %v7119_v50, %v3535_v10  ;;  %v3556_v20 = vsub.f32 %v7117_v4, %v3538_v13 }
 0xca7   : > { %v3564_v12 = vmul.f32 1.442695, %v3555_v11  ;;  %3101 = vrot.lane.b32.xlu0 %v7147_v48, %s6058_s5  ;;  %v3566_v22 = vmul.f32 1.442695, %v3556_v20 }
 0xca9   : > { %5543 = vpow2.f32 %v3564_v12 }
 0xcac   : > { %v3541_v15 = vpop.xlane.xlu0 %3540 }
 0xcad   : > { %v3557_v61 = vsub.f32 %v3524_v35, %v3541_v15 }
 0xcaf   : > { %v3568_v16 = vmul.f32 1.442695, %v3557_v61 }
 0xcb0   : > { %v3544_v17 = vpop.xlane.xlu0 %3543 }
 0xcb1   : > { %5545 = vpow2.f32 %v3568_v16  ;;  %v3558_v50 = vsub.f32 %v7128_v37, %v3544_v17 }
 0xcb2   : > { %5547 = vpow2.f32 %v3566_v22  ;;  %v3113_v22 = vcombine.low %v7147_v48, %v7042_v41 }
 0xcb3   : > { %v7175_v19 = vpop.eup %5543  ;;  %v3570_v29 = vmul.f32 1.442695, %v3558_v50 }
 0xcb4   : > { %v3100_v23 = vpop.permute.xlu0 %3099  ;;  %v3547_v24 = vpop.xlane.xlu1 %3546  ;;  %v3581_v27 = vsel %vm3529_vm5, %v7175_v19, 0.0 }
 0xcb5   : > { %v7178_v25 = vpack.c.bf16 %v3100_v23, %v3112_v33  ;;  %v3559_v26 = vsub.f32 %v3526_v49, %v3547_v24  ;;  %3582 = vadd.xlane.f32.xlu1 %v3581_v27 }
 0xcb7   : > { %v3572_v4 = vmul.f32 1.442695, %v3559_v26  ;;  %v3769_v12 = vsel %vm3629_vm15, %v7178_v25, 0  ;;  %v3129_v26 = vpack.c.bf16 %v7155_v2, %v3113_v22 }
 0xcb8   : > { %v3086_v30 = vpop.permute.xlu1 %3085 }
 0xcb9   : > { %5549 = vpow2.f32 %v3572_v4  ;;  %v3127_v62 = vpack.c.bf16 %v3086_v30, %v3111_v28  ;;  %v3815_v28 = vsel %vm3629_vm15, %v3129_v26, 0 }
 0xcba   : > { %5551 = vpow2.f32 %v3570_v29 }
 0xcbb   : > { %v7182_v31 = vpop.eup %5545  ;;  %v3723_v3 = vsel %vm3629_vm15, %v3127_v62, 0 }
 0xcbc   : > { %v3587_v32 = vsel %vm3529_vm5, %v7182_v31, 0.0  ;;  %v7186_v35 = vpop.eup %5547 }
 0xcbd   : > { %3588 = vadd.xlane.f32.xlu1 %v3587_v32  ;;  %v3584_v39 = vsel %vm3529_vm5, %v7186_v35, 0.0 }
 0xcc3   : > { %v7188_v36 = vpop.eup %5549 }
 0xcc4   : > { %v3593_v37 = vsel %vm3529_vm5, %v7188_v36, 0.0  ;;  %v7194_v40 = vpop.eup %5551 }
 0xcc5   : > { %3594 = vadd.xlane.f32.xlu1 %v3593_v37  ;;  %v3590_v42 = vsel %vm3529_vm5, %v7194_v40, 0.0 }
 0xcc6   : > { %3585 = vadd.xlane.f32.xlu0 %v3584_v39 }
 0xcca   : > { %3591 = vadd.xlane.f32.xlu0 %v3590_v42 }
 0xce5   : > { %v3550_v43 = vpop.xlane.xlu0 %3549 }
 0xce6   : > { %v3560_v44 = vsub.f32 %v7137_v60, %v3550_v43 }
 0xce8   : > { %v3574_v46 = vmul.f32 1.442695, %v3560_v44 }
 0xce9   : > { %v3553_v38 = vpop.xlane.xlu1 %3552  ;;  %v3076_v52 = vpop.permute.xlu0 %3075 }
 0xcea   : > { %5553 = vpow2.f32 %v3574_v46  ;;  %v3561_v47 = vsub.f32 %v7141_v63, %v3553_v38 }
 0xcec   : > { %v3576_v49 = vmul.f32 1.442695, %v3561_v47 }
 0xced   : > { %v3074_v51 = vpop.permute.xlu1 %3073  ;;  %v7202_v55 = vpop.permute.xlu0 %3087 }
 0xcee   : > { %5555 = vpow2.f32 %v3576_v49  ;;  %v3114_v61 = vcombine.low %v3074_v51, %v3076_v52 }
 0xcf1   : > { %v3078_v54 = vpop.permute.xlu1 %3077 }
 0xcf2   : > { %v3130_v20 = vpack.c.bf16 %v3078_v54, %v3114_v61 }
 0xcf4   : > { %v7200_v53 = vpop.eup %5553 }
 0xcf5   : > { %v7204_v56 = vpop.permute.xlu1 %3089  ;;  %v3596_v57 = vsel %vm3529_vm5, %v7200_v53, 0.0 }
 0xcf6   : > { %v3115_v58 = vcombine.low %v7202_v55, %v7204_v56  ;;  %3597 = vadd.xlane.f32.xlu1 %v3596_v57 }
 0xcf8   : > { %v7210_v59 = vpop.eup %5555 }
 0xcf9   : > { %v3599_v60 = vsel %vm3529_vm5, %v7210_v59, 0.0  ;;  %v3104_v45 = vpop.permute.xlu1 %3103 }
 0xcfa   : > { %3600 = vadd.xlane.f32.xlu0 %v3599_v60 }
 0xd07   : > { %3105 = vrot.lane.b32.xlu1 %v7155_v2, %s6058_s5  ;;  %s7641_s5 = scalar_lea.vmem %s7640_s8, %s6656_s3 }
 0xd10   : > { %3091 = vrot.lane.b32.xlu0 %v7155_v2, %s6056_s20  ;;  %s7639_s20 = smov %s7638_s22 }
 0xd11   : > { %v5494_v61 = vld [vmem:[%s7639_s20 + $0x8] sm:$0xff]  }
 0xd1e   : > { %v3580_v34 = vpop.xlane.xlu0 %3579 }
 0xd1f   : > { %5557 = vrcp.f32 %v3580_v34 }
 0xd22   : > { %v3102_v8 = vpop.permute.xlu0 %3101 }
 0xd23   : > { %v3116_v30 = vcombine.low %v3102_v8, %v3104_v45 }
 0xd29   : > { %v5558_v63 = vpop.eup %5557 }
 0xd2a   : > { %v7219_v0 = vmul.f32 %v5558_v63, %v7166_v7 }
 0xd2c   : > { %v3618_v1 = vpack.c.bf16 %v7219_v0, %v7219_v0 }
 0xd2e   : > { %5210 = vmatmul.mubr.msk.bf16.vlgmr.msra.gmra.mrb[60].mxu1 %vm3529_vm5, %v3618_v1 }
 0xd2f   : > { %5220 = vmatpush3.bf16.msra.mxu1 %v3723_v3  ;;  %5221 = vmatprep.mubr.msk.bf16.mxu1 %vm6055_vm2, %v6054_v18 }
 0xd30   : > { %5231 = vmatprep.subr.bf16.mxu1 %v6054_v18 }
 0xd42   : > { %v3583_v5 = vpop.xlane.xlu1 %3582 }
 0xd43   : > { %5559 = vrcp.f32 %v3583_v5 }
 0xd4a   : > { %v3589_v6 = vpop.xlane.xlu1 %3588 }
 0xd4b   : > { %5561 = vrcp.f32 %v3589_v6 }
 0xd4d   : > { %v5560_v7 = vpop.eup %5559 }
 0xd4e   : > { %v7229_v9 = vmul.f32 %v5560_v7, %v7175_v19  ;;  %v3861_v19 = vsel %vm3629_vm15, %v3130_v20, 0 }
 0xd50   : > { %v3619_v10 = vpack.c.bf16 %v7229_v9, %v7229_v9 }
 0xd52   : > { %v3595_v11 = vpop.xlane.xlu1 %3594  ;;  %5216 = vmatmul.mubr.msk.bf16.vlgmr.msra.gmra.mrb[64].mxu0 %vm3529_vm5, %v3619_v10 }
 0xd53   : > { %5563 = vrcp.f32 %v3595_v11  ;;  %v3586_v13 = vpop.xlane.xlu0 %3585  ;;  %5226 = vmatpush3.bf16.msra.mxu0 %v3769_v12  ;;  %5227 = vmatprep.mubr.msk.bf16.mxu0 %vm6055_vm2, %v6054_v18 }
 0xd54   : > { %5565 = vrcp.f32 %v3586_v13  ;;  %5237 = vmatprep.subr.bf16.mxu0 %v6054_v18 }
 0xd55   : > { %v5562_v15 = vpop.eup %5561 }
 0xd56   : > { %v7240_v16 = vmul.f32 %v5562_v15, %v7182_v31  ;;  %v5493_v15 = vld [vmem:[%s7638_s22] sm:$0xff]  }
 0xd57   : > { %v3592_v17 = vpop.xlane.xlu0 %3591 }
 0xd58   : > { %5567 = vrcp.f32 %v3592_v17  ;;  %v3621_v33 = vpack.c.bf16 %v7240_v16, %v7240_v16 }
 0xd5a   : > { %5228 = vmatmul.mubr.msk.bf16.vlgmr.msra.gmra.mrb[68].mxu0 %vm3529_vm5, %v3621_v33 }
 0xd5b   : > { %5238 = vmatpush3.bf16.msra.mxu0 %v3861_v19  ;;  %5239 = vmatprep.mubr.msk.bf16.mxu0 %vm6055_vm2, %v6054_v18 }
 0xd5c   : > { %5249 = vmatprep.subr.bf16.mxu0 %v6054_v18 }
 0xd5d   : > { %v5564_v50 = vpop.eup %5563 }
 0xd5e   : > { %v5566_v23 = vpop.eup %5565  ;;  %v7252_v24 = vmul.f32 %v5564_v50, %v7188_v36 }
 0xd5f   : > { %v7255_v25 = vmul.f32 %v5566_v23, %v7186_v35 }
 0xd60   : > { %v3623_v27 = vpack.c.bf16 %v7252_v24, %v7252_v24 }
 0xd61   : > { %v3620_v41 = vpack.c.bf16 %v7255_v25, %v7255_v25 }
 0xd62   : > { %v5568_v48 = vpop.eup %5567  ;;  %5240 = vmatmul.mubr.msk.bf16.vlgmr.msra.gmra.mrb[72].mxu0 %vm3529_vm5, %v3623_v27 }
 0xd63   : > { %5222 = vmatmul.mubr.msk.bf16.vlgmr.msra.gmra.mrb[64].mxu1 %vm3529_vm5, %v3620_v41  ;;  %v7268_v4 = vmul.f32 %v5568_v48, %v7194_v40  ;;  %5251 = vmatprep.mubr.msk.bf16.mxu0 %vm6055_vm2, %v6054_v18 }
 0xd64   : > { %5232 = vmatpush3.bf16.msra.mxu1 %v3815_v28  ;;  %5233 = vmatprep.mubr.msk.bf16.mxu1 %vm6055_vm2, %v6054_v18 }
 0xd65   : > { %5243 = vmatprep.subr.bf16.mxu1 %v6054_v18  ;;  %v3622_v2 = vpack.c.bf16 %v7268_v4, %v7268_v4 }
 0xd6b   : > { %5234 = vmatmul.mubr.msk.bf16.vlgmr.msra.gmra.mrb[68].mxu1 %vm3529_vm5, %v3622_v2 }
 0xd6c   : > { %5245 = vmatprep.mubr.msk.bf16.mxu1 %vm6055_vm2, %v6054_v18 }
 0xd83   : > { %v3598_v29 = vpop.xlane.xlu1 %3597 }
 0xd84   : > { %5569 = vrcp.f32 %v3598_v29 }
 0xd87   : > { %v3601_v62 = vpop.xlane.xlu0 %3600  ;;  %v3106_v31 = vpop.permute.xlu1 %3105 }
 0xd88   : > { %5571 = vrcp.f32 %v3601_v62  ;;  %v3132_v32 = vpack.c.bf16 %v3106_v31, %v3116_v30 }
 0xd8a   : > { %v3953_v35 = vsel %vm3629_vm15, %v3132_v32, 0 }
 0xd8b   : > { %v3092_v36 = vpop.permute.xlu0 %3091  ;;  %5250 = vmatpush3.bf16.msra.mxu0 %v3953_v35 }
 0xd8c   : > { %v3131_v37 = vpack.c.bf16 %v3092_v36, %v3115_v58  ;;  %5263 = vmatprep.subr.bf16.mxu0 %v6054_v18 }
 0xd8e   : > { %v5570_v39 = vpop.eup %5569  ;;  %v3907_v40 = vsel %vm3629_vm15, %v3131_v37, 0 }
 0xd8f   : > { %v7285_v42 = vmul.f32 %v5570_v39, %v7200_v53  ;;  %5244 = vmatpush3.bf16.msra.mxu1 %v3907_v40 }
 0xd90   : > { %5255 = vmatprep.subr.bf16.mxu1 %v6054_v18 }
 0xd91   : > { %v3624_v43 = vpack.c.bf16 %v7285_v42, %v7285_v42 }
 0xd92   : > { %v5572_v44 = vpop.eup %5571 }
 0xd93   : > { %v7291_v46 = vmul.f32 %v5572_v44, %v7210_v59  ;;  %5246 = vmatmul.mubr.msk.bf16.vlgmr.msra.gmra.mrb[72].mxu1 %vm3529_vm5, %v3624_v43 }
 0xd94   : > { %5259 = vmatprep.mubr.msk.bf16.mxu1 %vm6055_vm2, %v6054_v18  ;;  %5256 = vmatpush3.bf16.msra.mxu1 %v5493_v15 }
 0xd95   : > { %v3625_v38 = vpack.c.bf16 %v7291_v46, %v7291_v46  ;;  %5257 = vmatprep.subr.bf16.mxu1 %v6054_v18 }
 0xd97   : > { %5252 = vmatmul.mubr.msk.bf16.vlgmr.msra.gmra.mrb[76].mxu0 %vm3529_vm5, %v3625_v38 }
 0xd98   : > { %5267 = vmatprep.mubr.msk.bf16.mxu0 %vm6055_vm2, %v6054_v18  ;;  %5258 = vmatpush3.bf16.msra.mxu1 %v5494_v61 }
 0xd99   : > { %5271 = vmatprep.subr.bf16.mxu1 %v6054_v18 }
 0xe01   : > { %v3667_v47 = vpop.f32.mrb[60].mxu1 }
 0xe02   : > { %v5211_v49 = vpop.f32.mrb[61].mxu1 }
 0xe03   : > { %v3670_v51 = vpop.f32.mrb[62].mxu1 }
 0xe04   : > { %v5212_v52 = vpop.f32.mrb[63].mxu1 }
 0xe25   : > { %v3713_v54 = vpop.f32.mrb[64].mxu0 }
 0xe26   : > { %v5217_v53 = vpop.f32.mrb[65].mxu0 }
 0xe27   : > { %v3716_v55 = vpop.f32.mrb[66].mxu0 }
 0xe28   : > { %v5218_v56 = vpop.f32.mrb[67].mxu0 }
 0xe2d   : > { %v3805_v57 = vpop.f32.mrb[68].mxu0 }
 0xe2e   : > { %v5229_v58 = vpop.f32.mrb[69].mxu0 }
 0xe2f   : > { %v3808_v59 = vpop.f32.mrb[70].mxu0 }
 0xe30   : > { %v5230_v60 = vpop.f32.mrb[71].mxu0 }
 0xe35   : > { %v3897_v34 = vpop.f32.mrb[72].mxu0 }
 0xe36   : > { %v3759_v63 = vpop.f32.mrb[64].mxu1  ;;  %v5464_v1 = vpack.i.bf16 %v3897_v34, %v3713_v54  ;;  %v5241_v3 = vpop.f32.mrb[73].mxu0 }
 0xe37   : > { %v5223_v45 = vpop.f32.mrb[65].mxu1  ;;  %v3900_v5 = vpop.f32.mrb[74].mxu0 }
 0xe38   : > { %v3762_v6 = vpop.f32.mrb[66].mxu1  ;;  %5465 = vrot.lane.b32.xlu0 %v5464_v1, %s6062_s12  ;;  %v5242_v7 = vpop.f32.mrb[75].mxu0  ;;  %v5495_v45 = vld [vmem:[%s1109_s30] sm:$0xff]   ;;  %v5496_v5 = vld [vmem:[%s1109_s30 + $0x8] sm:$0xff]  }
 0xe39   : > { %v5224_v8 = vpop.f32.mrb[67].mxu1  ;;  %5264 = vmatpush3.bf16.msra.mxu0 %v5495_v45  ;;  %v5497_v6 = vld [vmem:[%s6700_s6] sm:$0xff]   ;;  %v5498_v7 = vld [vmem:[%s6700_s6 + $0x8] sm:$0xff]  }
 0xe3a   : > { %5265 = vmatprep.subr.bf16.mxu0 %v6054_v18 }
 0xe3d   : > { %5266 = vmatpush3.bf16.msra.mxu0 %v5496_v5 }
 0xe3e   : > { %v3851_v10 = vpop.f32.mrb[68].mxu1 }
 0xe3f   : > { %v5235_v11 = vpop.f32.mrb[69].mxu1 }
 0xe40   : > { %v3854_v12 = vpop.f32.mrb[70].mxu1 }
 0xe41   : > { %v5236_v13 = vpop.f32.mrb[71].mxu1 }
 0xe66   : > { %v3943_v20 = vpop.f32.mrb[72].mxu1 }
 0xe67   : > { %v5469_v17 = vpack.i.bf16 %v3943_v20, %v3759_v63  ;;  %v5247_v33 = vpop.f32.mrb[73].mxu1 }
 0xe68   : > { %v3946_v19 = vpop.f32.mrb[74].mxu1 }
 0xe69   : > { %5470 = vrot.lane.b32.xlu1 %v5469_v17, %s6061_s1  ;;  %v5248_v22 = vpop.f32.mrb[75].mxu1  ;;  %v4874_v17 = vld [vmem:[%s7641_s5] ss:$0 sm:$0xff] }
 0xe6a   : > { %v3989_v50 = vpop.f32.mrb[76].mxu0 }
 0xe6b   : > { %v5474_v23 = vpack.i.bf16 %v3989_v50, %v3805_v57  ;;  %v5253_v26 = vpop.f32.mrb[77].mxu0  ;;  %v4875_v50 = vld [vmem:[%s1288_s21] ss:$0 sm:$0xff] }
 0xe6c   : > { %v3992_v27 = vpop.f32.mrb[78].mxu0 }
 0xe6d   : > { %5475 = vrot.lane.b32.xlu0 %v5474_v23, %s6063_s14  ;;  %v5254_v41 = vpop.f32.mrb[79].mxu0 }
 0xeaa   : > { %v5466_v48 = vpop.permute.xlu0 %5465 }
 0xeab   : > { %v5468_v2 = vunpack.i.h.bf16 %v5466_v48  ;;  %v5467_v29 = vunpack.i.l.bf16 %v5466_v48  ;;  %v5499_v48 = vld [vmem:[%s6700_s6 + $0x10] sm:$0xff]  }
 0xead   : > { %v4019_v32 = vsel %vm1708_vm3, %v3667_v47, %v5467_v29  ;;  %v4020_v35 = vsel %vm1708_vm3, %v3851_v10, %v5468_v2  ;;  %v4876_v2 = vld [vmem:[%s1291_s16] ss:$0 sm:$0xff]  ;;  %s7645_s16 = sld [smem:[#allocation34_spill]] }
 0xeb3   : > { %p4887_p13 = scmp.ne.s32.totalorder %s7645_s16, 1 }
 0xeb4   : > { %v4354_v45 = vsel (!%p4887_p13), %vm3529_vm5, %v7268_v4, 0.0  ;;  %v4355_v5 = vsel (!%p4887_p13), %vm3529_vm5, %v7252_v24, 0.0  ;;  %s7646_s24 = sld [smem:[#allocation64_spill]] (!%p4887_p13)  ;;  %s7647_s19 = sld [smem:[#allocation65_spill]] (!%p4887_p13) }
 0xedb   : > { %v5471_v28 = vpop.permute.xlu1 %5470 }
 0xedc   : > { %v5473_v30 = vunpack.i.h.bf16 %v5471_v28  ;;  %v5472_v62 = vunpack.i.l.bf16 %v5471_v28  ;;  %v5500_v28 = vld [vmem:[%s6700_s6 + $0x18] sm:$0xff]  }
 0xede   : > { %v4022_v39 = vsel %vm2584_vm13, %v4020_v35, %v5473_v30  ;;  %v4021_v40 = vsel %vm2584_vm13, %v4019_v32, %v5472_v62 }
 0xedf   : > { %v5476_v31 = vpop.permute.xlu0 %5475 }
 0xee0   : > { %v5478_v36 = vunpack.i.h.bf16 %v5476_v31  ;;  %v5477_v37 = vunpack.i.l.bf16 %v5476_v31 }
 0xee2   : > { %v4023_v43 = vsel %vm2587_vm14, %v4021_v40, %v5477_v37  ;;  %v4024_v44 = vsel %vm2587_vm14, %v4022_v39, %v5478_v36 }
 0xee3   : > { %v4025_v38 = vpack.c.bf16 %v4024_v44, %v4023_v43 }
 0xee5   : > { %5260 = vmatmul.mubr.msk.bf16.vlgmr.msra.gmra.mrb[76].mxu1 %vm1399_vm1, %v4025_v38 }
 0xee6   : > { %5279 = vmatprep.mubr.msk.bf16.mxu1 %vm6055_vm2, %v6054_v18  ;;  %5272 = vmatpush3.bf16.msra.mxu1 %v5497_v6  ;;  %vm4248_vm2 = vcmask 523264  }
 0xee7   : > { %5273 = vmatprep.subr.bf16.mxu1 %v6054_v18 }
 0xeea   : > { %5274 = vmatpush3.bf16.msra.mxu1 %v5498_v7  ;;  %v4356_v7 = vadd.f32 (!%p4887_p13), %v4355_v5, %v4354_v45 }
 0xeeb   : > { %5275 = vmatprep.subr.bf16.mxu1 %v6054_v18 }
 0xeee   : > { %5276 = vmatpush3.bf16.msra.mxu1 %v5499_v48 }
 0xeef   : > { %5277 = vmatprep.subr.bf16.mxu1 %v6054_v18  ;;  %v4881_v18 = vld [vmem:[%s1299_s7] ss:$0 sm:$0xff] }
 0xef2   : > { %5278 = vmatpush3.bf16.msra.mxu1 %v5500_v28 }
 0xfb8   : > { %v4079_v49 = vpop.f32.mrb[76].mxu1 }
 0xfb9   : > { %v7320_v47 = vadd.f32 %v4079_v49, %v6954_v14  ;;  %v5261_v51 = vpop.f32.mrb[77].mxu1 }
 0xfba   : > { %v4082_v52 = vpop.f32.mrb[78].mxu1 }
 0xfbb   : > { %v7323_v54 = vadd.f32 %v4082_v52, %v6956_v21  ;;  %v5262_v53 = vpop.f32.mrb[79].mxu1  ;;  %v4090_v55 = vsel %vm1399_vm1, %v7320_v47, 0.0 }
 0xfbc   : > { %4091 = vadd.xlane.f32.xlu1 %v4090_v55 }
 0xfbd   : > { %v4093_v56 = vsel %vm1399_vm1, %v7323_v54, 0.0 }
 0xfbe   : > { %4094 = vadd.xlane.f32.xlu0 %v4093_v56 }
0x1049   : > { %v4092_v57 = vpop.xlane.xlu1 %4091 }
0x104a   : > { %v4096_v58 = vmul.f32 0.03125, %v4092_v57 }
0x104b   : > { %v4095_v14 = vpop.xlane.xlu0 %4094 }
0x104c   : > { %v4098_v59 = vsub.f32 %v7320_v47, %v4096_v58  ;;  %v4097_v21 = vmul.f32 0.03125, %v4095_v14 }
0x104e   : > { %v4099_v60 = vsub.f32 %v7323_v54, %v4097_v21  ;;  %v4100_v34 = vmul.f32 %v4098_v59, %v4098_v59 }
0x1050   : > { %v4102_v63 = vsel %vm1399_vm1, %v4100_v34, 0.0  ;;  %v4101_v1 = vmul.f32 %v4099_v60, %v4099_v60 }
0x1051   : > { %4103 = vadd.xlane.f32.xlu0 %v4102_v63 }
0x1052   : > { %v4105_v3 = vsel %vm1399_vm1, %v4101_v1, 0.0  ;;  %v4347_v1 = vsel (!%p4887_p13), %vm3529_vm5, %v7219_v0, 0.0  ;;  %v4352_v0 = vsel (!%p4887_p13), %vm3529_vm5, %v7240_v16, 0.0 }
0x1055   : > { %4106 = vadd.xlane.f32.xlu0 %v4105_v3  ;;  %v4348_v3 = vsel (!%p4887_p13), %vm3529_vm5, %v7229_v9, 0.0  ;;  %v4359_v9 = vsel (!%p4887_p13), %vm3529_vm5, %v7291_v46, 0.0  ;;  %v4888_v46 = vld [vmem:[%s7646_s24] ss:$0 sm:$0xff] (!%p4887_p13) }
0x1056   : > { %v4349_v6 = vadd.f32 (!%p4887_p13), %v4348_v3, %v4347_v1 }
0x10de   : > { %v4104_v8 = vpop.xlane.xlu0 %4103 }
0x10df   : > { %v4108_v10 = vmul.f32 0.03125, %v4104_v8  ;;  %v4350_v8 = vsel (!%p4887_p13), %vm3529_vm5, %v7255_v25, 0.0 }
0x10e1   : > { %v4110_v11 = vadd.f32 1e-05, %v4108_v10  ;;  %v4357_v10 = vsel (!%p4887_p13), %vm3529_vm5, %v7285_v42, 0.0 }
0x10e2   : > { %v4107_v12 = vpop.xlane.xlu0 %4106 }
0x10e3   : > { %5573 = vrsqrt.f32 %v4110_v11  ;;  %v4109_v13 = vmul.f32 0.03125, %v4107_v12  ;;  %v4351_v11 = vadd.f32 (!%p4887_p13), %v4350_v8, %v4349_v6  ;;  %v4358_v12 = vadd.f32 (!%p4887_p13), %v4357_v10, %v4356_v7 }
0x10e5   : > { %v4111_v15 = vadd.f32 1e-05, %v4109_v13  ;;  %v4353_v4 = vadd.f32 (!%p4887_p13), %v4352_v0, %v4351_v11  ;;  %v4360_v13 = vadd.f32 (!%p4887_p13), %v4359_v9, %v4358_v12 }
0x10e7   : > { %5575 = vrsqrt.f32 %v4111_v15  ;;  %v4361_v15 = vmul.f32 (!%p4887_p13), 0.25, %v4353_v4  ;;  %v4362_v24 = vmul.f32 (!%p4887_p13), 0.25, %v4360_v13 }
0x10e9   : > { %4363 = vst.msk [vmem:[#allocation22] sm:$0xff] (!%p4887_p13), %vm3529_vm5, %v4361_v15  ;;  %4364 = vst.msk [vmem:[#allocation22 + $0x8] sm:$0xff] (!%p4887_p13), %vm3529_vm5, %v4362_v24 }
0x10ed   : > { %v5574_v61 = vpop.eup %5573 }
0x10ee   : > { %v4114_v20 = vmul.f32 %v5574_v61, %v4098_v59 }
0x10f0   : > { %v4122_v19 = vmul.f32 %v4874_v17, %v4114_v20 }
0x10f1   : > { %v5576_v33 = vpop.eup %5575 }
0x10f2   : > { %v4115_v22 = vmul.f32 %v5576_v33, %v4099_v60  ;;  %v4130_v26 = vadd.f32 %v4875_v50, %v4122_v19 }
0x10f4   : > { %v4123_v23 = vmul.f32 %v4874_v17, %v4115_v22  ;;  %v4889_v22 = vld [vmem:[%s7647_s19] ss:$0 sm:$0xff] (!%p4887_p13) }
0x10f6   : > { %v4131_v27 = vadd.f32 %v4875_v50, %v4123_v23 }
0x10f8   : > { %v4908_v41 = vpack.c.bf16 %v4131_v27, %v4130_v26 }
0x10fa   : > { %5268 = vmatmul.mubr.msk.bf16.vlgmr.msra.gmra.mrb[80].mxu0 %vm1399_vm1, %v4908_v41 }
0x11cd   : > { %v4199_v29 = vpop.f32.mrb[80].mxu0 }
0x11ce   : > { %v4200_v30 = vadd.f32 %v4876_v2, %v4199_v29  ;;  %v5269_v62 = vpop.f32.mrb[81].mxu0 }
0x11cf   : > { %v4202_v31 = vpop.f32.mrb[82].mxu0 }
0x11d0   : > { %v4203_v32 = vadd.f32 %v4876_v2, %v4202_v31  ;;  %v5270_v35 = vpop.f32.mrb[83].mxu0  ;;  %v4206_v36 = vmax.f32 %v4200_v30, 0.0 }
0x11d2   : > { %v4207_v37 = vmax.f32 %v4203_v32, 0.0 }
0x11d4   : > { %v4208_v39 = vpack.c.bf16 %v4207_v37, %v4206_v36 }
0x11d6   : > { %5280 = vmatmul.mubr.msk.bf16.vlgmr.msra.gmra.mrb[80].mxu1 %vm4248_vm2, %v4208_v39 }
0x12a9   : > { %v4286_v40 = vpop.f32.mrb[80].mxu1 }
0x12aa   : > { %v4287_v43 = vadd.f32 %v4881_v18, %v4286_v40  ;;  %v5281_v44 = vpop.f32.mrb[81].mxu1  ;;  %4300 = sbr.rel (%p4887_p13) target bundleno = 5100 (0x13ec), region = 168 }
0x12ab   : > { %v4289_v38 = vpop.f32.mrb[82].mxu1 }
0x12ac   : > { %v4293_v49 = vadd.f32 %v4287_v43, %v7320_v47  ;;  %v4290_v51 = vadd.f32 %v4881_v18, %v4289_v38  ;;  %v5282_v52 = vpop.f32.mrb[83].mxu1 }
0x12ae   : > { %4295 = vst.msk [vmem:[#allocation2] sm:$0xff] %vm1399_vm1, %v4293_v49  ;;  %v4294_v53 = vadd.f32 %v4290_v51, %v7323_v54  ;;  %v4303_v55 = vsel (!%p4887_p13), %vm1399_vm1, %v4293_v49, 0.0 }
0x12af   : > { %4304 = vadd.xlane.f32.xlu0 (!%p4887_p13), %v4303_v55 }
0x12b0   : > { %4296 = vst.msk [vmem:[#allocation2 + $0x8] sm:$0xff] %vm1399_vm1, %v4294_v53  ;;  %v4306_v56 = vsel (!%p4887_p13), %vm1399_vm1, %v4294_v53, 0.0 }
0x12b3   : > { %4307 = vadd.xlane.f32.xlu0 %v4306_v56 }
0x133c   : > { %v4305_v57 = vpop.xlane.xlu0 %4304 }
0x133d   : > { %v4309_v58 = vmul.f32 0.03125, %v4305_v57 }
0x133f   : > { %v4311_v47 = vsub.f32 %v4293_v49, %v4309_v58 }
0x1340   : > { %v4308_v14 = vpop.xlane.xlu0 %4307 }
0x1341   : > { %v4310_v59 = vmul.f32 0.03125, %v4308_v14  ;;  %v4313_v21 = vmul.f32 %v4311_v47, %v4311_v47 }
0x1343   : > { %v4312_v60 = vsub.f32 %v4294_v53, %v4310_v59  ;;  %v4315_v54 = vsel %vm1399_vm1, %v4313_v21, 0.0 }
0x1344   : > { %4316 = vadd.xlane.f32.xlu1 %v4315_v54 }
0x1345   : > { %v4314_v34 = vmul.f32 %v4312_v60, %v4312_v60 }
0x1347   : > { %v4318_v63 = vsel %vm1399_vm1, %v4314_v34, 0.0 }
0x1348   : > { %4319 = vadd.xlane.f32.xlu1 %v4318_v63 }
0x13d1   : > { %v4317_v25 = vpop.xlane.xlu1 %4316 }
0x13d2   : > { %v4321_v61 = vmul.f32 0.03125, %v4317_v25 }
0x13d4   : > { %v4323_v20 = vadd.f32 1e-05, %v4321_v61 }
0x13d5   : > { %v4320_v42 = vpop.xlane.xlu1 %4319 }
0x13d6   : > { %5579 = vrsqrt.f32 %v4323_v20  ;;  %v4322_v17 = vmul.f32 0.03125, %v4320_v42 }
0x13d8   : > { %v4324_v33 = vadd.f32 1e-05, %v4322_v17 }
0x13da   : > { %5581 = vrsqrt.f32 %v4324_v33 }
0x13e0   : > { %v5580_v16 = vpop.eup %5579 }
0x13e1   : > { %v4327_v19 = vmul.f32 %v5580_v16, %v4311_v47 }
0x13e3   : > { %v4335_v50 = vmul.f32 %v4888_v46, %v4327_v19 }
0x13e4   : > { %v5582_v23 = vpop.eup %5581 }
0x13e5   : > { %v4343_v26 = vadd.f32 %v4889_v22, %v4335_v50  ;;  %v4328_v27 = vmul.f32 %v5582_v23, %v4312_v60 }
0x13e7   : > { %4345 = vst.msk [vmem:[#allocation21] sm:$0xff] %vm1399_vm1, %v4343_v26  ;;  %v4336_v41 = vmul.f32 %v4888_v46, %v4328_v27 }
0x13e9   : > { %v4344_v48 = vadd.f32 %v4889_v22, %v4336_v41 }
0x13eb   : > { %4346 = vst.msk [vmem:[#allocation21 + $0x8] sm:$0xff] %vm1399_vm1, %v4344_v48 }
0x13ec PF: > { %s7648_s4 = sld [smem:[#allocation37_spill]]  ;;  %s6065_s9 = smov [#allocation21]  }
0x13ed   : > { %s4374_s18 = sshll.u32 %s6065_s9, 4  ;;  %s6066_s11 = smov [#allocation22]   ;;  %s4375_s18 = int_to_ptr.vmem [resolvable:$true] %s4374_s18 }
0x13ee   : > { %s4390_s0 = sshll.u32 %s6066_s11, 4  ;;  %s5907_s22 = scalar_lea.vmem %s4375_s18, 256  ;;  %s4391_s0 = int_to_ptr.vmem [resolvable:$true] %s4390_s0 }
0x13ef   : > { %p5908_p2 = scmp.ne.s32.totalorder %s4375_s18, %s5907_s22  ;;  %p5914_p0 = scmp.lt.s32.totalorder %s4375_s18, %s4375_s18 }
0x13f0   : > { %p5915_p5 = scmp.lt.s32.totalorder %s5907_s22, %s5907_s22 }
0x13f2   : > { %p5361_p6 = scmp.eq.s32.totalorder %s7648_s4, 1  ;;  %p5916_p7 = por %p5915_p5, %p5914_p0 }
0x13f4   : > { %p5909_p1 = pnand %p5908_p2, %p5361_p6 }
0x13f6   : > { %p5910_p10 = pneg %p5909_p1 }
0x13f8   : > { %p5917_p4 = pnand %p5916_p7, %p5910_p10 }
0x13fa   : > { %5920 = shalt.err (!%p5917_p4)
}
0x13fb   : > { %s7649_s30 = sld [smem:[#allocation66_spill]] }
0x1401   : > { %s7650_s8 = smov %s7649_s30  ;;  %s5921_s5 = scalar_lea.hbm %s7649_s30, 256 }
0x1402   : > { %p5922_p3 = scmp.ne.s32.totalorder %s7650_s8, %s5921_s5  ;;  %p5927_p12 = scmp.lt.u32.totalorder %s5921_s5, %s7650_s8 }
0x1404   : > { %p5923_p8 = pnand %p5922_p3, %p5361_p6 }
0x1406   : > { %p5924_p11 = pneg %p5923_p8 }
0x1408   : > { %p5929_p9 = pnand %p5927_p12, %p5924_p11 }
0x140a   : > { %5932 = shalt.err (!%p5929_p9)
}
0x140b   : > { %s6067_s15 = smov 128   ;;  %s5933_s23 = scalar_lea.vmem %s4391_s0, 256 }
0x140c   : > { %5312 = dma.vmem_to_hbm [thread:$0]  (%p5361_p6), %s4375_s18, 256, %s7650_s8, [#allocation5], %s6067_s15, %s6067_s15, %s6062_s12  }
0x140d   : > { %p5934_p13 = scmp.ne.s32.totalorder %s4391_s0, %s5933_s23  ;;  %p5940_p10 = scmp.lt.s32.totalorder %s4391_s0, %s4391_s0 }
0x140e   : > { %p5941_p0 = scmp.lt.s32.totalorder %s5933_s23, %s5933_s23 }
0x140f   : > { %p5935_p2 = pnand %p5934_p13, %p5361_p6 }
0x1410   : > { %p5942_p5 = por %p5941_p0, %p5940_p10 }
0x1411   : > { %p5936_p1 = pneg %p5935_p2 }
0x1413   : > { %p5943_p7 = pnand %p5942_p5, %p5936_p1 }
0x1415   : > { %5946 = shalt.err (!%p5943_p7)
}
0x1416   : > { %s7651_s3 = sld [smem:[#allocation67_spill]] }
0x141c   : > { %s7652_s24 = smov %s7651_s3  ;;  %s5947_s7 = scalar_lea.hbm %s7651_s3, 256 }
0x141d   : > { %p5948_p4 = scmp.ne.s32.totalorder %s7652_s24, %s5947_s7  ;;  %p5953_p11 = scmp.lt.u32.totalorder %s5947_s7, %s7652_s24 }
0x141f   : > { %p5949_p3 = pnand %p5948_p4, %p5361_p6 }
0x1421   : > { %p5950_p8 = pneg %p5949_p3 }
0x1423   : > { %p5955_p12 = pnand %p5953_p11, %p5950_p8 }
0x1425   : > { %5958 = shalt.err (!%p5955_p12)
}
0x1426   : > { %5314 = dma.vmem_to_hbm [thread:$0]  (%p5361_p6), %s4391_s0, 256, %s7652_s24, [#allocation23], %s6067_s15, %s6067_s15, %s6062_s12  }
0x1427   : > { %6008 = dma.done.wait (%p5361_p6), [#allocation5], 256  }
0x1428   : > { %6010 = vsyncadd (%p5361_p6), [#allocation5], 4294967040 }
0x1429   : > { %6012 = dma.done.wait (%p5361_p6), [#allocation23], 256  }
0x142a   : > { %6014 = vsyncadd (%p5361_p6), [#allocation23], 4294967040 }
0x142b PF: > { %s7653_s22 = sld [smem:[#allocation36_spill]]  ;;  %s7654_s29 = sld [smem:[#allocation32_spill]] }
0x142c   : > { %s7655_s2 = sld [smem:[#allocation33_spill]]  ;;  %s7656_s6 = sld [smem:[#allocation41_spill]] }
0x142d   : > { %s7657_s30 = sld [smem:[#allocation35_spill]]  ;;  %s7658_s7 = sld [smem:[#allocation40_spill]] }
0x1431   : > { %s52_s3 = sadd.s32 1, %s7653_s22  }
0x1432   : > { %p49_p9 = scmp.ge.s32.totalorder %s52_s3, 4  }
0x1434   :  { %51 = sbr.rel (!%p49_p9) target bundleno = 41 (0x29), region = 303 }
0x143b   :  { %4410 = vsyncpa [#allocation4], 1 }
0x143c   :  { %4412 = vsyncpa [#allocation4 + $0x1], 1 }
0x143d   :  { %4413 = vsyncpa [#allocation7], 1 }
0x143e   :  { %4414 = vsyncpa [#allocation10], 1 }
0x143f   :  { %4416 = vsyncpa [#allocation10 + $0x1], 1 }
0x1440   :  { %4417 = vsyncpa [#allocation13], 1 }
0x1441   :  { %4419 = vsyncpa [#allocation13 + $0x1], 1 }
0x1442   :  { %4420 = vsyncpa [#allocation16], 1 }
0x1443   :  { %4422 = vsyncpa [#allocation16 + $0x1], 1 }
0x1444   :  { %4423 = vsyncpa [#allocation19], 1 }
0x1445   :  { %4425 = vsyncpa [#allocation19 + $0x1], 1 }
0x1446   :  { %4426 = vsyncpa [#allocation5], 1 }
0x1447   :  { %4428 = vsyncpa [#allocation5 + $0x1], 1 }
0x1448   :  { %4429 = vsyncpa [#allocation23], 1 }

</bundles_post_ra>
